<compile_context>
chip_gen: v5e
topology: v5e:2x2
jax: 0.10.0
libtpu: 0.0.40
codegen_flags: <defaults>
</compile_context>

<pallas_src>
import jax
import jax.numpy as jnp
from jax.experimental import pallas as pl
from jax.experimental.pallas import tpu as pltpu

EPS = 1e-5
CIN = 3
C_OUT = 8                      # all six branches forced to 8 channels (see TODO above)
N_BRANCH = 6
FUSED_CIN = 2 * CIN            # x1 and x2 channels stacked -> 6
K_PAD = 8                      # padded to one full f32 sublane tile (6 data + ones + zero)
N_GROUP = 3                    # A = b1+b2+b3, B = b4, C = b5+b6  ->  out = A*B + C
GROUP_ROWS = N_GROUP * C_OUT   # 24


def _round_up(x, m):
    return (x + m - 1) // m * m


def _fused_kernel(x_ref, w_ref, o_ref):
    # x_ref: (8, T)   fused-channel-major input tile (pixels on the 128-lane axis;
    #                 rows 0..5 = x1/x2 channels, row 6 = 1.0 bias channel, row 7 = 0)
    # w_ref: (24, 8)  BN-folded, group-major weights [A | B | C] x [6 in-ch, bias, 0]
    # o_ref: (8, T)   combined output tile (lane-dense, unmasked stores)
    x = x_ref[...]                       # (8, T)
    w = w_ref[...]                       # (24, 8)
    t = x.shape[1]
    acc = [jnp.zeros((C_OUT, t), jnp.float32) for _ in range(N_GROUP)]
    # Exact-f32 VPU contraction: 8 unrolled broadcast MACs per group (K=8, N=24
    # is <2% MXU utilisation, so the systolic array buys nothing here).
    for c in range(K_PAD):
        xc = jnp.broadcast_to(x[c:c + 1, :], (C_OUT, t))          # (8, T)
        for g in range(N_GROUP):
            wc = w[g * C_OUT:(g + 1) * C_OUT, c:c + 1]            # (8, 1) lane-splat
            acc[g] = acc[g] + wc * xc
    o_ref[...] = acc[0] * acc[1] + acc[2]                          # A*B + C


def fused_forward(x1_nchw, x2_nchw, w, b, gamma, beta, *, max_tile_m=8192):
    """x*_nchw: (N, 3, H, W) f32. w: (6,3,8), b/gamma/beta: (6,8).
    Returns (N, 8, H+2, W+2) f32 (training-mode BatchNorm semantics)."""
    n, cin, h, wd = x1_nchw.shape
    assert cin == CIN and x2_nchw.shape == x1_nchw.shape
    hp, wp = h + 2, wd + 2
    m_true = n * hp * wp               # BN pixel count (includes the padding=1 border)
    n_int = n * h * wd
    f32 = jnp.float32
    hi = jax.lax.Precision.HIGHEST

    x1 = x1_nchw.astype(f32)
    x2 = x2_nchw.astype(f32)

    # ---- batch statistics of the fused 6-channel padded input (training-mode BN) ----
    xi = jnp.concatenate([x1.reshape(n, CIN, -1), x2.reshape(n, CIN, -1)], axis=1)
    xi = jnp.transpose(xi, (1, 0, 2)).reshape(FUSED_CIN, n_int)     # (6, N*H*W)
    mean_x = jnp.sum(xi, axis=1) / m_true          # border pixels are 0 but count in m_true
    xc = xi - mean_x[:, None]
    # Each zero border pixel contributes (0-mean)(0-mean)^T to the covariance:
    cov_x = (jnp.dot(xc, xc.T, precision=hi)
             + (m_true - n_int) * jnp.outer(mean_x, mean_x)) / m_true          # (6, 6)

    # ---- per-branch weights embedded in the fused 6-channel input space ----
    # conv{k+1}: even k reads x1 (rows 0:3), odd k reads x2 (rows 3:6).
    w6 = jnp.zeros((N_BRANCH, FUSED_CIN, C_OUT), f32)
    for k in range(N_BRANCH):
        r0 = 0 if k % 2 == 0 else CIN
        w6 = w6.at[k, r0:r0 + CIN, :].set(w[k].astype(f32))

    # ---- fold training-mode BatchNorm into each branch ----
    # BN(Wx + b) = scale * W^T (x - mean_x) + beta  (the conv bias cancels exactly).
    var_y = jnp.einsum("kio,ij,kjo->ko", w6, cov_x, w6, precision=hi)           # (6, 8)
    scale = gamma.astype(f32) * jax.lax.rsqrt(var_y + EPS)                      # (6, 8)
    w_fold = w6 * scale[:, None, :]                                             # (6, 6, 8)
    b_fold = beta.astype(f32) - scale * jnp.einsum("i,kio->ko", mean_x, w6, precision=hi)

    # ---- pre-sum the additive branches:  out = A * B + C ----
    w_a, b_a = w_fold[0] + w_fold[1] + w_fold[2], b_fold[0] + b_fold[1] + b_fold[2]
    w_b, b_b = w_fold[3], b_fold[3]
    w_c, b_c = w_fold[4] + w_fold[5], b_fold[4] + b_fold[5]

    def pack(wg, bg):   # (6,8),(8,) -> (8,8): [6 in-ch | bias (ones channel) | 0]
        return jnp.concatenate([wg.T, bg[:, None], jnp.zeros((C_OUT, 1), f32)], axis=1)

    w_t = jnp.concatenate([pack(w_a, b_a), pack(w_b, b_b), pack(w_c, b_c)], axis=0)  # (24, 8)

    # ---- padded, channel-major (lane-dense) input slab with a ones bias channel ----
    pad = ((0, 0), (0, 0), (1, 1), (1, 1))
    xt = jnp.concatenate(
        [jnp.pad(x1, pad), jnp.pad(x2, pad),
         jnp.ones((n, 1, hp, wp), f32), jnp.zeros((n, 1, hp, wp), f32)], axis=1)  # (N,8,Hp,Wp)
    xt = jnp.transpose(xt, (1, 0, 2, 3)).reshape(K_PAD, m_true)      # free reshape for N=1

    # Cover the slab in ~2 lane-dense tiles: minimal grid-step overhead on single-TC
    # v5e/v6e, and both v7x TensorCores get a tile. tile_m is a multiple of 128.
    tile_m = max(128, min(max_tile_m, _round_up(-(-m_true // 2), 128)))
    m_pad = _round_up(m_true, tile_m)
    xt = jnp.pad(xt, ((0, 0), (0, m_pad - m_true)))

    out = pl.pallas_call(
        _fused_kernel,
        out_shape=jax.ShapeDtypeStruct((C_OUT, m_pad), f32),
        grid_spec=pltpu.PrefetchScalarGridSpec(
            num_scalar_prefetch=0,
            grid=(m_pad // tile_m,),
            in_specs=[
                pl.BlockSpec((K_PAD, tile_m), lambda i: (0, i)),
                pl.BlockSpec((GROUP_ROWS, K_PAD), lambda i: (0, 0)),
            ],
            out_specs=pl.BlockSpec((C_OUT, tile_m), lambda i: (0, i)),
        ),
        compiler_params=pltpu.CompilerParams(
            dimension_semantics=("parallel",)),
    )(xt, w_t)

    out = out[:, :m_true].reshape(C_OUT, n, hp, wp)
    return jnp.transpose(out, (1, 0, 2, 3))                          # back to NCHW


def _reference(x1, x2, w, b, gamma, beta):
    """Pure-JAX reference mirroring the PyTorch semantics (NCHW, two-pass BN)."""
    hi = jax.lax.Precision.HIGHEST

    def branch(k, x):
        xp = jnp.pad(x, ((0, 0), (0, 0), (1, 1), (1, 1)))
        y = jnp.einsum("nchw,co->nohw", xp, w[k], precision=hi) + b[k][None, :, None, None]
        mean = jnp.mean(y, axis=(0, 2, 3), keepdims=True)
        var = jnp.mean((y - mean) ** 2, axis=(0, 2, 3), keepdims=True)
        yn = (y - mean) * jax.lax.rsqrt(var + EPS)
        return yn * gamma[k][None, :, None, None] + beta[k][None, :, None, None]

    v3 = branch(0, x1) + branch(1, x2)
    v4 = v3 + branch(2, x1)
    v5 = v4 * branch(3, x2)
    v6 = v5 + branch(4, x1)
    return v6 + branch(5, x2)


if __name__ == "__main__":
    key = jax.random.PRNGKey(0)
    k_w, k_b, k_g, k_be, k_x1, k_x2 = jax.random.split(key, 6)

    w = jax.random.normal(k_w, (N_BRANCH, CIN, C_OUT), jnp.float32) * 0.5
    b = jax.random.normal(k_b, (N_BRANCH, C_OUT), jnp.float32) * 0.1
    gamma = 1.0 + 0.1 * jax.random.normal(k_g, (N_BRANCH, C_OUT), jnp.float32)
    beta = 0.1 * jax.random.normal(k_be, (N_BRANCH, C_OUT), jnp.float32)

    # Shapes from the original module: (1, 3, 64, 64).
    x1 = jax.random.normal(k_x1, (1, CIN, 64, 64), jnp.float32)
    x2 = jax.random.normal(k_x2, (1, CIN, 64, 64), jnp.float32)

    fwd = jax.jit(fused_forward)   # one XLA program: stats + layout + pallas kernel
    out = jax.block_until_ready(fwd(x1, x2, w, b, gamma, beta))
    ref = jax.block_until_ready(_reference(x1, x2, w, b, gamma, beta))

    assert out.shape == ref.shape == (1, C_OUT, 66, 66), out.shape
    max_err = float(jnp.max(jnp.abs(out - ref)))
    assert jnp.allclose(out, ref, atol=1e-3, rtol=1e-3), max_err
    print("KERNEL_OK")
</pallas_src>

<mosaic_0001>
module attributes {stable_mosaic.version = 11 : i64} {
  func.func @_fused_kernel(%arg0: i32, %arg1: memref<8x2304xf32, #tpu.memory_space<vmem>>, %arg2: memref<24x8xf32, #tpu.memory_space<vmem>>, %arg3: memref<8x2304xf32, #tpu.memory_space<vmem>>) attributes {dimension_semantics = [#tpu.dimension_semantics<parallel>], iteration_bounds = array<i64: 2>, scalar_prefetch = 0 : i64, scratch_operands = 0 : i64, tpu.core_type = #tpu.core_type<tc>, window_params = [{transform_indices = @transform_0, window_bounds = array<i64: 8, 2304>}, {pipeline_mode = #tpu.pipeline_mode<synchronous>, transform_indices = @transform_1, window_bounds = array<i64: 24, 8>}, {transform_indices = @transform_2, window_bounds = array<i64: 8, 2304>}]} {
    %c0 = arith.constant 0 : index
    %c0_0 = arith.constant 0 : index
    %0 = vector.load %arg1[%c0, %c0_0] : memref<8x2304xf32, #tpu.memory_space<vmem>>, vector<8x2304xf32>
    %c0_1 = arith.constant 0 : index
    %c0_2 = arith.constant 0 : index
    %1 = vector.load %arg2[%c0_1, %c0_2] : memref<24x8xf32, #tpu.memory_space<vmem>>, vector<24x8xf32>
    %cst = arith.constant 0.000000e+00 : f32
    %2 = vector.broadcast %cst : f32 to vector<8x2304xf32>
    %cst_3 = arith.constant 0.000000e+00 : f32
    %3 = vector.broadcast %cst_3 : f32 to vector<8x2304xf32>
    %cst_4 = arith.constant 0.000000e+00 : f32
    %4 = vector.broadcast %cst_4 : f32 to vector<8x2304xf32>
    %5 = vector.extract_strided_slice %0 {offsets = [0, 0], sizes = [1, 2304], strides = [1, 1]} : vector<8x2304xf32> to vector<1x2304xf32>
    %6 = vector.shape_cast %5 : vector<1x2304xf32> to vector<1x2304xf32>
    %7 = vector.broadcast %6 : vector<1x2304xf32> to vector<8x2304xf32>
    %8 = vector.extract_strided_slice %1 {offsets = [0, 0], sizes = [8, 1], strides = [1, 1]} : vector<24x8xf32> to vector<8x1xf32>
    %9 = vector.broadcast %8 : vector<8x1xf32> to vector<8x2304xf32>
    %10 = arith.mulf %9, %7 : vector<8x2304xf32>
    %11 = arith.addf %2, %10 : vector<8x2304xf32>
    %12 = vector.extract_strided_slice %1 {offsets = [8, 0], sizes = [8, 1], strides = [1, 1]} : vector<24x8xf32> to vector<8x1xf32>
    %13 = vector.broadcast %12 : vector<8x1xf32> to vector<8x2304xf32>
    %14 = arith.mulf %13, %7 : vector<8x2304xf32>
    %15 = arith.addf %3, %14 : vector<8x2304xf32>
    %16 = vector.extract_strided_slice %1 {offsets = [16, 0], sizes = [8, 1], strides = [1, 1]} : vector<24x8xf32> to vector<8x1xf32>
    %17 = vector.broadcast %16 : vector<8x1xf32> to vector<8x2304xf32>
    %18 = arith.mulf %17, %7 : vector<8x2304xf32>
    %19 = arith.addf %4, %18 : vector<8x2304xf32>
    %20 = vector.extract_strided_slice %0 {offsets = [1, 0], sizes = [1, 2304], strides = [1, 1]} : vector<8x2304xf32> to vector<1x2304xf32>
    %21 = vector.shape_cast %20 : vector<1x2304xf32> to vector<1x2304xf32>
    %22 = vector.broadcast %21 : vector<1x2304xf32> to vector<8x2304xf32>
    %23 = vector.extract_strided_slice %1 {offsets = [0, 1], sizes = [8, 1], strides = [1, 1]} : vector<24x8xf32> to vector<8x1xf32>
    %24 = vector.broadcast %23 : vector<8x1xf32> to vector<8x2304xf32>
    %25 = arith.mulf %24, %22 : vector<8x2304xf32>
    %26 = arith.addf %11, %25 : vector<8x2304xf32>
    %27 = vector.extract_strided_slice %1 {offsets = [8, 1], sizes = [8, 1], strides = [1, 1]} : vector<24x8xf32> to vector<8x1xf32>
    %28 = vector.broadcast %27 : vector<8x1xf32> to vector<8x2304xf32>
    %29 = arith.mulf %28, %22 : vector<8x2304xf32>
    %30 = arith.addf %15, %29 : vector<8x2304xf32>
    %31 = vector.extract_strided_slice %1 {offsets = [16, 1], sizes = [8, 1], strides = [1, 1]} : vector<24x8xf32> to vector<8x1xf32>
    %32 = vector.broadcast %31 : vector<8x1xf32> to vector<8x2304xf32>
    %33 = arith.mulf %32, %22 : vector<8x2304xf32>
    %34 = arith.addf %19, %33 : vector<8x2304xf32>
    %35 = vector.extract_strided_slice %0 {offsets = [2, 0], sizes = [1, 2304], strides = [1, 1]} : vector<8x2304xf32> to vector<1x2304xf32>
    %36 = vector.shape_cast %35 : vector<1x2304xf32> to vector<1x2304xf32>
    %37 = vector.broadcast %36 : vector<1x2304xf32> to vector<8x2304xf32>
    %38 = vector.extract_strided_slice %1 {offsets = [0, 2], sizes = [8, 1], strides = [1, 1]} : vector<24x8xf32> to vector<8x1xf32>
    %39 = vector.broadcast %38 : vector<8x1xf32> to vector<8x2304xf32>
    %40 = arith.mulf %39, %37 : vector<8x2304xf32>
    %41 = arith.addf %26, %40 : vector<8x2304xf32>
    %42 = vector.extract_strided_slice %1 {offsets = [8, 2], sizes = [8, 1], strides = [1, 1]} : vector<24x8xf32> to vector<8x1xf32>
    %43 = vector.broadcast %42 : vector<8x1xf32> to vector<8x2304xf32>
    %44 = arith.mulf %43, %37 : vector<8x2304xf32>
    %45 = arith.addf %30, %44 : vector<8x2304xf32>
    %46 = vector.extract_strided_slice %1 {offsets = [16, 2], sizes = [8, 1], strides = [1, 1]} : vector<24x8xf32> to vector<8x1xf32>
    %47 = vector.broadcast %46 : vector<8x1xf32> to vector<8x2304xf32>
    %48 = arith.mulf %47, %37 : vector<8x2304xf32>
    %49 = arith.addf %34, %48 : vector<8x2304xf32>
    %50 = vector.extract_strided_slice %0 {offsets = [3, 0], sizes = [1, 2304], strides = [1, 1]} : vector<8x2304xf32> to vector<1x2304xf32>
    %51 = vector.shape_cast %50 : vector<1x2304xf32> to vector<1x2304xf32>
    %52 = vector.broadcast %51 : vector<1x2304xf32> to vector<8x2304xf32>
    %53 = vector.extract_strided_slice %1 {offsets = [0, 3], sizes = [8, 1], strides = [1, 1]} : vector<24x8xf32> to vector<8x1xf32>
    %54 = vector.broadcast %53 : vector<8x1xf32> to vector<8x2304xf32>
    %55 = arith.mulf %54, %52 : vector<8x2304xf32>
    %56 = arith.addf %41, %55 : vector<8x2304xf32>
    %57 = vector.extract_strided_slice %1 {offsets = [8, 3], sizes = [8, 1], strides = [1, 1]} : vector<24x8xf32> to vector<8x1xf32>
    %58 = vector.broadcast %57 : vector<8x1xf32> to vector<8x2304xf32>
    %59 = arith.mulf %58, %52 : vector<8x2304xf32>
    %60 = arith.addf %45, %59 : vector<8x2304xf32>
    %61 = vector.extract_strided_slice %1 {offsets = [16, 3], sizes = [8, 1], strides = [1, 1]} : vector<24x8xf32> to vector<8x1xf32>
    %62 = vector.broadcast %61 : vector<8x1xf32> to vector<8x2304xf32>
    %63 = arith.mulf %62, %52 : vector<8x2304xf32>
    %64 = arith.addf %49, %63 : vector<8x2304xf32>
    %65 = vector.extract_strided_slice %0 {offsets = [4, 0], sizes = [1, 2304], strides = [1, 1]} : vector<8x2304xf32> to vector<1x2304xf32>
    %66 = vector.shape_cast %65 : vector<1x2304xf32> to vector<1x2304xf32>
    %67 = vector.broadcast %66 : vector<1x2304xf32> to vector<8x2304xf32>
    %68 = vector.extract_strided_slice %1 {offsets = [0, 4], sizes = [8, 1], strides = [1, 1]} : vector<24x8xf32> to vector<8x1xf32>
    %69 = vector.broadcast %68 : vector<8x1xf32> to vector<8x2304xf32>
    %70 = arith.mulf %69, %67 : vector<8x2304xf32>
    %71 = arith.addf %56, %70 : vector<8x2304xf32>
    %72 = vector.extract_strided_slice %1 {offsets = [8, 4], sizes = [8, 1], strides = [1, 1]} : vector<24x8xf32> to vector<8x1xf32>
    %73 = vector.broadcast %72 : vector<8x1xf32> to vector<8x2304xf32>
    %74 = arith.mulf %73, %67 : vector<8x2304xf32>
    %75 = arith.addf %60, %74 : vector<8x2304xf32>
    %76 = vector.extract_strided_slice %1 {offsets = [16, 4], sizes = [8, 1], strides = [1, 1]} : vector<24x8xf32> to vector<8x1xf32>
    %77 = vector.broadcast %76 : vector<8x1xf32> to vector<8x2304xf32>
    %78 = arith.mulf %77, %67 : vector<8x2304xf32>
    %79 = arith.addf %64, %78 : vector<8x2304xf32>
    %80 = vector.extract_strided_slice %0 {offsets = [5, 0], sizes = [1, 2304], strides = [1, 1]} : vector<8x2304xf32> to vector<1x2304xf32>
    %81 = vector.shape_cast %80 : vector<1x2304xf32> to vector<1x2304xf32>
    %82 = vector.broadcast %81 : vector<1x2304xf32> to vector<8x2304xf32>
    %83 = vector.extract_strided_slice %1 {offsets = [0, 5], sizes = [8, 1], strides = [1, 1]} : vector<24x8xf32> to vector<8x1xf32>
    %84 = vector.broadcast %83 : vector<8x1xf32> to vector<8x2304xf32>
    %85 = arith.mulf %84, %82 : vector<8x2304xf32>
    %86 = arith.addf %71, %85 : vector<8x2304xf32>
    %87 = vector.extract_strided_slice %1 {offsets = [8, 5], sizes = [8, 1], strides = [1, 1]} : vector<24x8xf32> to vector<8x1xf32>
    %88 = vector.broadcast %87 : vector<8x1xf32> to vector<8x2304xf32>
    %89 = arith.mulf %88, %82 : vector<8x2304xf32>
    %90 = arith.addf %75, %89 : vector<8x2304xf32>
    %91 = vector.extract_strided_slice %1 {offsets = [16, 5], sizes = [8, 1], strides = [1, 1]} : vector<24x8xf32> to vector<8x1xf32>
    %92 = vector.broadcast %91 : vector<8x1xf32> to vector<8x2304xf32>
    %93 = arith.mulf %92, %82 : vector<8x2304xf32>
    %94 = arith.addf %79, %93 : vector<8x2304xf32>
    %95 = vector.extract_strided_slice %0 {offsets = [6, 0], sizes = [1, 2304], strides = [1, 1]} : vector<8x2304xf32> to vector<1x2304xf32>
    %96 = vector.shape_cast %95 : vector<1x2304xf32> to vector<1x2304xf32>
    %97 = vector.broadcast %96 : vector<1x2304xf32> to vector<8x2304xf32>
    %98 = vector.extract_strided_slice %1 {offsets = [0, 6], sizes = [8, 1], strides = [1, 1]} : vector<24x8xf32> to vector<8x1xf32>
    %99 = vector.broadcast %98 : vector<8x1xf32> to vector<8x2304xf32>
    %100 = arith.mulf %99, %97 : vector<8x2304xf32>
    %101 = arith.addf %86, %100 : vector<8x2304xf32>
    %102 = vector.extract_strided_slice %1 {offsets = [8, 6], sizes = [8, 1], strides = [1, 1]} : vector<24x8xf32> to vector<8x1xf32>
    %103 = vector.broadcast %102 : vector<8x1xf32> to vector<8x2304xf32>
    %104 = arith.mulf %103, %97 : vector<8x2304xf32>
    %105 = arith.addf %90, %104 : vector<8x2304xf32>
    %106 = vector.extract_strided_slice %1 {offsets = [16, 6], sizes = [8, 1], strides = [1, 1]} : vector<24x8xf32> to vector<8x1xf32>
    %107 = vector.broadcast %106 : vector<8x1xf32> to vector<8x2304xf32>
    %108 = arith.mulf %107, %97 : vector<8x2304xf32>
    %109 = arith.addf %94, %108 : vector<8x2304xf32>
    %110 = vector.extract_strided_slice %0 {offsets = [7, 0], sizes = [1, 2304], strides = [1, 1]} : vector<8x2304xf32> to vector<1x2304xf32>
    %111 = vector.shape_cast %110 : vector<1x2304xf32> to vector<1x2304xf32>
    %112 = vector.broadcast %111 : vector<1x2304xf32> to vector<8x2304xf32>
    %113 = vector.extract_strided_slice %1 {offsets = [0, 7], sizes = [8, 1], strides = [1, 1]} : vector<24x8xf32> to vector<8x1xf32>
    %114 = vector.broadcast %113 : vector<8x1xf32> to vector<8x2304xf32>
    %115 = arith.mulf %114, %112 : vector<8x2304xf32>
    %116 = arith.addf %101, %115 : vector<8x2304xf32>
    %117 = vector.extract_strided_slice %1 {offsets = [8, 7], sizes = [8, 1], strides = [1, 1]} : vector<24x8xf32> to vector<8x1xf32>
    %118 = vector.broadcast %117 : vector<8x1xf32> to vector<8x2304xf32>
    %119 = arith.mulf %118, %112 : vector<8x2304xf32>
    %120 = arith.addf %105, %119 : vector<8x2304xf32>
    %121 = vector.extract_strided_slice %1 {offsets = [16, 7], sizes = [8, 1], strides = [1, 1]} : vector<24x8xf32> to vector<8x1xf32>
    %122 = vector.broadcast %121 : vector<8x1xf32> to vector<8x2304xf32>
    %123 = arith.mulf %122, %112 : vector<8x2304xf32>
    %124 = arith.addf %109, %123 : vector<8x2304xf32>
    %125 = arith.mulf %116, %120 : vector<8x2304xf32>
    %126 = arith.addf %125, %124 : vector<8x2304xf32>
    %c0_5 = arith.constant 0 : index
    %c0_6 = arith.constant 0 : index
    %127 = vector.load %arg3[%c0_5, %c0_6] : memref<8x2304xf32, #tpu.memory_space<vmem>>, vector<8x2304xf32>
    tpu.vector_store %arg3[%c0_5, %c0_6], %126 {strides = array<i32>} : memref<8x2304xf32, #tpu.memory_space<vmem>>, vector<8x2304xf32>,
    return
  }
  func.func @transform_0(%arg0: i32) -> (i32, i32) {
    %c0_i32 = arith.constant 0 : i32
    %c0_i32_0 = arith.constant 0 : i32
    return %c0_i32, %arg0 : i32, i32
  }
  func.func @transform_1(%arg0: i32) -> (i32, i32) {
    %c0_i32 = arith.constant 0 : i32
    %c0_i32_0 = arith.constant 0 : i32
    %c0_i32_1 = arith.constant 0 : i32
    return %c0_i32, %c0_i32_0 : i32, i32
  }
  func.func @transform_2(%arg0: i32) -> (i32, i32) {
    %c0_i32 = arith.constant 0 : i32
    %c0_i32_0 = arith.constant 0 : i32
    return %c0_i32, %arg0 : i32, i32
  }
}

</mosaic_0001>

<bundles_post_ra>
// kernel: fused_forward.1
= control target key start
LH: loop header
LB: loop body
LE: loop exit
PB: predicated region body
PF: predicated region fallthrough
CT: control target
= control target key end

     0   :  { %s1479_s9 = smov 0   ;;  %s3413_s0 = inlined_call_operand.vmem [shape: f32[8,4608], index: 0, kind: input, shape index: {}]   ;;  %s3414_s1 = inlined_call_operand.vmem [shape: f32[24,8], index: 1, kind: input, shape index: {}]   ;;  %s3415_s2 = inlined_call_operand.vmem [shape: f32[8,4608], index: 2, kind: output, shape index: {}]  }
   0x1 LB: > { %s1385_s10 = sadd.s32 4294967295, %s1454_s9   ;;  %p1389_p0 = scmp.ge.s32.totalorder %s1454_s9, 1  ;;  %s1454_s9 = sphi %s1479_s9, %s12_s9  }
   0x2   : > { %p113_p1 = scmp.lt.s32.totalorder %s1454_s9, 3 }
   0x4   : > { %p114_p2 = pnand %p1389_p0, %p113_p1 }
   0x6   : > { %117 = sbr.rel (%p114_p2) target bundleno = 479 (0x1df), region = 28 }
   0xb   : > { %v167_v0 = vld [vmem:[%s3414_s1 + $0x10] sm:$0xff]  ;;  %v165_v1 = vld [vmem:[%s3414_s1] sm:$0xff]  ;;  %v1456_v2 = vmov 0   ;;  %v166_v3 = vld [vmem:[%s3414_s1 + $0x8] sm:$0xff]  ;;  %v1457_v4 = vmov 1   ;;  %v1458_v5 = vmov 2  }
   0xc   : > { %1411 = vset.pattern.permute.xlu1 %v1456_v2  ;;  %1410 = vset.pattern.permute.xlu0 %v1456_v2  ;;  %v1459_v6 = vmov 3   ;;  %v1460_v7 = vmov 5   ;;  %v1461_v8 = vmov 4   ;;  %v1462_v9 = vmov 7   ;;  %s135_s17 = smul.u32 18, %s1385_s10 }
   0xd   : > { %270 = vperm.xlu1 %1411, %v167_v0   ;;  %188 = vperm.xlu0 %1410, %v165_v1   ;;  %v1463_v10 = vmov 6  }
   0xe   : > { %1413 = vset.pattern.permute.xlu2 %v1457_v4  ;;  %p136_p3 = scmp.lt.s32.totalorder %s135_s17, 35 }
   0xf   : > { %368 = vperm.xlu2 %1413, %v166_v3  }
  0x10   : > { %s4469_s17 = smov (!%p136_p3, %s135_s17), 35 }
  0x11   : > { %s1390_s18 = sshll.u32 %s4469_s17, 3 }
  0x12   : > { %s1506_s21 = scalar_lea.vmem %s3413_s0, %s1390_s18  ;;  %s3353_s24 = scalar_lea.vmem %s3415_s2, %s1390_s18 }
  0x13   : > { %v1509_v11 = vld [vmem:[%s1506_s21] sm:$0xff]  ;;  %v1512_v12 = vld [vmem:[%s1506_s21 + $0x8] sm:$0xff]  ;;  %v1515_v13 = vld [vmem:[%s1506_s21 + $0x10] sm:$0xff] }
  0x14   : > { %3674 = vst [vmem:[#allocation2_spill] sm:$0xff] %v1509_v11  ;;  %v1518_v14 = vld [vmem:[%s1506_s21 + $0x18] sm:$0xff]  ;;  %v1521_v15 = vld [vmem:[%s1506_s21 + $0x20] sm:$0xff]  ;;  %v1524_v16 = vld [vmem:[%s1506_s21 + $0x28] sm:$0xff]  ;;  %v1556_v27 = vperm.slane %v1509_v11, 1  ;;  %v1559_v28 = vperm.slane %v1512_v12, 1 }
  0x15   : > { %1412 = vset.pattern.permute.xlu1 %v1457_v4  ;;  %229 = vperm.xlu0 %1410, %v166_v3   ;;  %3675 = vst [vmem:[#allocation3_spill] sm:$0xff] %v1512_v12  ;;  %v1527_v17 = vld [vmem:[%s1506_s21 + $0x30] sm:$0xff]  ;;  %v1530_v18 = vld [vmem:[%s1506_s21 + $0x38] sm:$0xff]  ;;  %v1533_v19 = vld [vmem:[%s1506_s21 + $0x40] sm:$0xff]  ;;  %v1562_v29 = vperm.slane %v1515_v13, 1  ;;  %v1574_v33 = vperm.slane %v1518_v14, 1 }
  0x16   : > { %328 = vperm.xlu1 %1412, %v165_v1   ;;  %3676 = vst [vmem:[#allocation4_spill] sm:$0xff] %v1515_v13  ;;  %v1536_v20 = vld [vmem:[%s1506_s21 + $0x48] sm:$0xff]  ;;  %v1539_v21 = vld [vmem:[%s1506_s21 + $0x50] sm:$0xff]  ;;  %v1542_v22 = vld [vmem:[%s1506_s21 + $0x58] sm:$0xff]  ;;  %v1577_v34 = vperm.slane %v1521_v15, 1  ;;  %v1580_v35 = vperm.slane %v1524_v16, 1 }
  0x17   : > { %408 = vperm.xlu2 %1413, %v167_v0   ;;  %3677 = vst [vmem:[#allocation5_spill] sm:$0xff] %v1518_v14  ;;  %v1547_v24 = vld [vmem:[%s1506_s21 + $0x60] sm:$0xff]  ;;  %v1550_v25 = vld [vmem:[%s1506_s21 + $0x68] sm:$0xff]  ;;  %v1553_v26 = vld [vmem:[%s1506_s21 + $0x70] sm:$0xff]  ;;  %v1583_v36 = vperm.slane %v1527_v17, 1  ;;  %v1586_v37 = vperm.slane %v1530_v18, 1 }
  0x18   : > { %3678 = vst [vmem:[#allocation6_spill] sm:$0xff] %v1521_v15  ;;  %v1565_v30 = vld [vmem:[%s1506_s21 + $0x78] sm:$0xff]  ;;  %v1568_v31 = vld [vmem:[%s1506_s21 + $0x80] sm:$0xff]  ;;  %v1571_v32 = vld [vmem:[%s1506_s21 + $0x88] sm:$0xff]  ;;  %v1589_v38 = vperm.slane %v1533_v19, 1  ;;  %v1592_v39 = vperm.slane %v1536_v20, 1 }
  0x19   : > { %3679 = vst [vmem:[#allocation7_spill] sm:$0xff] %v1524_v16  ;;  %v1595_v40 = vperm.slane %v1539_v21, 1  ;;  %v1598_v41 = vperm.slane %v1542_v22, 1  ;;  %v1601_v42 = vperm.slane %v1547_v24, 1  ;;  %v1604_v43 = vperm.slane %v1550_v25, 1 }
  0x1a   : > { %3680 = vst [vmem:[#allocation8_spill] sm:$0xff] %v1527_v17  ;;  %v1607_v44 = vperm.slane %v1553_v26, 1  ;;  %v1610_v45 = vperm.slane %v1565_v30, 1  ;;  %v1613_v46 = vperm.slane %v1568_v31, 1  ;;  %v1616_v47 = vperm.slane %v1571_v32, 1 }
  0x1b   : > { %3681 = vst [vmem:[#allocation9_spill] sm:$0xff] %v1530_v18  ;;  %v1619_v48 = vperm.slane %v1509_v11, 0  ;;  %v1622_v49 = vperm.slane %v1512_v12, 0  ;;  %v1625_v50 = vperm.slane %v1515_v13, 0  ;;  %v1628_v51 = vperm.slane %v1518_v14, 0 }
  0x1c   : > { %3682 = vst [vmem:[#allocation10_spill] sm:$0xff] %v1533_v19  ;;  %v1631_v52 = vperm.slane %v1521_v15, 0  ;;  %v1634_v53 = vperm.slane %v1524_v16, 0  ;;  %v1637_v54 = vperm.slane %v1527_v17, 0  ;;  %v1640_v55 = vperm.slane %v1530_v18, 0 }
  0x1d   : > { %1414 = vset.pattern.permute.xlu0 %v1458_v5  ;;  %3683 = vst [vmem:[#allocation11_spill] sm:$0xff] %v1536_v20  ;;  %v1643_v56 = vperm.slane %v1533_v19, 0  ;;  %v1646_v57 = vperm.slane %v1536_v20, 0  ;;  %v1649_v58 = vperm.slane %v1539_v21, 0  ;;  %v1652_v59 = vperm.slane %v1542_v22, 0 }
  0x1e   : > { %1415 = vset.pattern.permute.xlu1 %v1458_v5  ;;  %466 = vperm.xlu0 %1414, %v165_v1   ;;  %3684 = vst [vmem:[#allocation12_spill] sm:$0xff] %v1539_v21  ;;  %v1655_v60 = vperm.slane %v1547_v24, 0  ;;  %v1658_v61 = vperm.slane %v1550_v25, 0  ;;  %v1661_v62 = vperm.slane %v1553_v26, 0  ;;  %v1664_v63 = vperm.slane %v1565_v30, 0 }
  0x1f   : > { %506 = vperm.xlu1 %1415, %v166_v3   ;;  %1416 = vset.pattern.permute.xlu2 %v1458_v5  ;;  %3685 = vst [vmem:[#allocation13_spill] sm:$0xff] %v1542_v22  ;;  %v1673_v2 = vperm.slane %v1509_v11, 2  ;;  %v1679_v5 = vperm.slane %v1515_v13, 2  ;;  %v1700_v13 = vperm.slane %v1536_v20, 2 }
  0x20   : > { %546 = vperm.xlu2 %1416, %v167_v0   ;;  %3686 = vst [vmem:[#allocation14_spill] sm:$0xff] %v1547_v24 }
  0x21   : > { %3687 = vst [vmem:[#allocation15_spill] sm:$0xff] %v1550_v25 }
  0x22   : > { %3688 = vst [vmem:[#allocation16_spill] sm:$0xff] %v1553_v26 }
  0x23   : > { %3689 = vst [vmem:[#allocation17_spill] sm:$0xff] %v1556_v27 }
  0x24   : > { %3690 = vst [vmem:[#allocation18_spill] sm:$0xff] %v1559_v28 }
  0x25   : > { %3691 = vst [vmem:[#allocation19_spill] sm:$0xff] %v1562_v29 }
  0x26   : > { %1419 = vset.pattern.permute.xlu0 %v1459_v6  ;;  %3692 = vst [vmem:[#allocation20_spill] sm:$0xff] %v1565_v30 }
  0x27   : > { %1417 = vset.pattern.permute.xlu1 %v1459_v6  ;;  %684 = vperm.xlu0 %1419, %v167_v0   ;;  %3693 = vst [vmem:[#allocation21_spill] sm:$0xff] %v1568_v31 }
  0x28   : > { %604 = vperm.xlu1 %1417, %v165_v1   ;;  %1418 = vset.pattern.permute.xlu2 %v1459_v6  ;;  %3694 = vst [vmem:[#allocation22_spill] sm:$0xff] %v1571_v32  ;;  %v1682_v6 = vperm.slane %v1518_v14, 2  ;;  %v1703_v14 = vperm.slane %v1539_v21, 2  ;;  %v1723_v21 = vperm.slane %v1553_v26, 2 }
  0x29   : > { %644 = vperm.xlu2 %1418, %v166_v3   ;;  %3695 = vst [vmem:[#allocation23_spill] sm:$0xff] %v1574_v33 }
  0x2a   : > { %3696 = vst [vmem:[#allocation24_spill] sm:$0xff] %v1577_v34 }
  0x2b   : > { %3697 = vst [vmem:[#allocation25_spill] sm:$0xff] %v1580_v35 }
  0x2c   : > { %3698 = vst [vmem:[#allocation26_spill] sm:$0xff] %v1583_v36 }
  0x2d   : > { %3699 = vst [vmem:[#allocation27_spill] sm:$0xff] %v1586_v37 }
  0x2e   : > { %3700 = vst [vmem:[#allocation28_spill] sm:$0xff] %v1589_v38 }
  0x2f   : > { %1423 = vset.pattern.permute.xlu0 %v1460_v7  ;;  %3701 = vst [vmem:[#allocation29_spill] sm:$0xff] %v1592_v39 }
  0x30   : > { %1420 = vset.pattern.permute.xlu1 %v1461_v8  ;;  %920 = vperm.xlu0 %1423, %v166_v3   ;;  %3702 = vst [vmem:[#allocation30_spill] sm:$0xff] %v1595_v40 }
  0x31   : > { %742 = vperm.xlu1 %1420, %v165_v1   ;;  %1421 = vset.pattern.permute.xlu2 %v1461_v8  ;;  %3703 = vst [vmem:[#allocation31_spill] sm:$0xff] %v1598_v41  ;;  %v1688_v8 = vperm.slane %v1524_v16, 2  ;;  %v1709_v16 = vperm.slane %v1547_v24, 2 }
  0x32   : > { %782 = vperm.xlu2 %1421, %v166_v3   ;;  %3704 = vst [vmem:[#allocation32_spill] sm:$0xff] %v1601_v42 }
  0x33   : > { %3705 = vst [vmem:[#allocation33_spill] sm:$0xff] %v1604_v43 }
  0x34   : > { %3706 = vst [vmem:[#allocation34_spill] sm:$0xff] %v1607_v44 }
  0x35   : > { %3707 = vst [vmem:[#allocation35_spill] sm:$0xff] %v1610_v45 }
  0x36   : > { %3708 = vst [vmem:[#allocation36_spill] sm:$0xff] %v1613_v46 }
  0x37   : > { %3709 = vst [vmem:[#allocation37_spill] sm:$0xff] %v1616_v47 }
  0x38   : > { %1427 = vset.pattern.permute.xlu0 %v1462_v9  ;;  %3710 = vst [vmem:[#allocation38_spill] sm:$0xff] %v1640_v55 }
  0x39   : > { %822 = vperm.xlu1 %1420, %v167_v0   ;;  %1156 = vperm.xlu0 %1427, %v165_v1   ;;  %3711 = vst [vmem:[#allocation39_spill] sm:$0xff] %v1643_v56 }
  0x3a   : > { %1422 = vset.pattern.permute.xlu2 %v1460_v7  ;;  %3712 = vst [vmem:[#allocation40_spill] sm:$0xff] %v1646_v57 }
  0x3b   : > { %880 = vperm.xlu2 %1422, %v165_v1   ;;  %3713 = vst [vmem:[#allocation41_spill] sm:$0xff] %v1649_v58 }
  0x3c   : > { %3714 = vst [vmem:[#allocation42_spill] sm:$0xff] %v1652_v59 }
  0x3d   : > { %3715 = vst [vmem:[#allocation43_spill] sm:$0xff] %v1655_v60 }
  0x3e   : > { %3716 = vst [vmem:[#allocation44_spill] sm:$0xff] %v1658_v61 }
  0x3f   : > { %3717 = vst [vmem:[#allocation45_spill] sm:$0xff] %v1661_v62 }
  0x40   : > { %3718 = vst [vmem:[#allocation46_spill] sm:$0xff] %v1664_v63 }
  0x41   : > { %1424 = vset.pattern.permute.xlu1 %v1460_v7  ;;  %3721 = vst [vmem:[#allocation49_spill] sm:$0xff] %v1673_v2  ;;  %v1685_v7 = vperm.slane %v1521_v15, 2  ;;  %v1706_v15 = vperm.slane %v1542_v22, 2  ;;  %v1726_v22 = vperm.slane %v1565_v30, 2 }
  0x42   : > { %960 = vperm.xlu1 %1424, %v167_v0   ;;  %3723 = vst [vmem:[#allocation51_spill] sm:$0xff] %v1679_v5 }
  0x43   : > { %1425 = vset.pattern.permute.xlu2 %v1463_v10  ;;  %3724 = vst [vmem:[#allocation52_spill] sm:$0xff] %v1682_v6 }
  0x44   : > { %1018 = vperm.xlu2 %1425, %v165_v1   ;;  %v1670_v1 = vperm.slane %v1571_v32, 0  ;;  %3725 = vst [vmem:[#allocation53_spill] sm:$0xff] %v1685_v7 }
  0x45   : > { %3726 = vst [vmem:[#allocation54_spill] sm:$0xff] %v1688_v8 }
  0x46   : > { %3720 = vst [vmem:[#allocation48_spill] sm:$0xff] %v1670_v1 }
  0x47   : > { %3730 = vst [vmem:[#allocation58_spill] sm:$0xff] %v1700_v13 }
  0x48   : > { %3731 = vst [vmem:[#allocation59_spill] sm:$0xff] %v1703_v14 }
  0x49   : > { %3732 = vst [vmem:[#allocation60_spill] sm:$0xff] %v1706_v15 }
  0x4a   : > { %1426 = vset.pattern.permute.xlu1 %v1463_v10  ;;  %v1694_v10 = vperm.slane %v1530_v18, 2  ;;  %3733 = vst [vmem:[#allocation61_spill] sm:$0xff] %v1709_v16 }
  0x4b   : > { %1058 = vperm.xlu1 %1426, %v166_v3   ;;  %3737 = vst [vmem:[#allocation65_spill] sm:$0xff] %v1723_v21 }
  0x4c   : > { %1098 = vperm.xlu2 %1425, %v167_v0   ;;  %3728 = vst [vmem:[#allocation56_spill] sm:$0xff] %v1694_v10 }
  0x4d   : > { %3738 = vst [vmem:[#allocation66_spill] sm:$0xff] %v1726_v22 }
  0x53   : > { %1428 = vset.pattern.permute.xlu1 %v1462_v9 }
  0x54   : > { %1196 = vperm.xlu1 %1428, %v166_v3   ;;  %1429 = vset.pattern.permute.xlu2 %v1462_v9  ;;  %v1676_v3 = vperm.slane %v1512_v12, 2  ;;  %v1691_v9 = vperm.slane %v1527_v17, 2  ;;  %v1697_v12 = vperm.slane %v1533_v19, 2  ;;  %v1712_v17 = vperm.slane %v1550_v25, 2 }
  0x55   : > { %1236 = vperm.xlu2 %1429, %v167_v0   ;;  %v1667_v0 = vperm.slane %v1568_v31, 0 }
  0x56   : > { %3722 = vst [vmem:[#allocation50_spill] sm:$0xff] %v1676_v3 }
  0x57   : > { %3719 = vst [vmem:[#allocation47_spill] sm:$0xff] %v1667_v0 }
  0x58   : > { %3727 = vst [vmem:[#allocation55_spill] sm:$0xff] %v1691_v9 }
  0x59   : > { %3729 = vst [vmem:[#allocation57_spill] sm:$0xff] %v1697_v12 }
  0x5a   : > { %3734 = vst [vmem:[#allocation62_spill] sm:$0xff] %v1712_v17 }
  0x69   : > { %v1544_v23 = vpop.permute.xlu2 %368 }
  0x6a   : > { %v1716_v18 = vmul.f32 %v1544_v23, %v1556_v27  ;;  %v1720_v20 = vmul.f32 %v1544_v23, %v1559_v28  ;;  %v1730_v24 = vmul.f32 %v1544_v23, %v1562_v29  ;;  %v1734_v25 = vmul.f32 %v1544_v23, %v1574_v33 }
  0x6b   : > { %v1738_v19 = vmul.f32 %v1544_v23, %v1577_v34  ;;  %v1742_v11 = vmul.f32 %v1544_v23, %v1580_v35  ;;  %v1746_v30 = vmul.f32 %v1544_v23, %v1583_v36  ;;  %v1750_v26 = vmul.f32 %v1544_v23, %v1586_v37 }
  0x6c   : > { %3735 = vst [vmem:[#allocation63_spill] sm:$0xff] %v1716_v18 }
  0x6d   : > { %3736 = vst [vmem:[#allocation64_spill] sm:$0xff] %v1720_v20  ;;  %v1795_v20 = vperm.slane %v1568_v31, 2 }
  0x6e   : > { %3739 = vst [vmem:[#allocation67_spill] sm:$0xff] %v1730_v24  ;;  %v1754_v24 = vmul.f32 %v1544_v23, %v1589_v38 }
  0x6f   : > { %3740 = vst [vmem:[#allocation68_spill] sm:$0xff] %v1734_v25  ;;  %v1758_v25 = vmul.f32 %v1544_v23, %v1592_v39 }
  0x70   : > { %3741 = vst [vmem:[#allocation69_spill] sm:$0xff] %v1738_v19  ;;  %v1762_v19 = vmul.f32 %v1544_v23, %v1595_v40 }
  0x71   : > { %v409_v4 = vpop.permute.xlu2 %408  ;;  %3742 = vst [vmem:[#allocation70_spill] sm:$0xff] %v1742_v11  ;;  %v1766_v11 = vmul.f32 %v1544_v23, %v1598_v41 }
  0x72   : > { %3743 = vst [vmem:[#allocation71_spill] sm:$0xff] %v1746_v30  ;;  %v1770_v30 = vmul.f32 %v1544_v23, %v1601_v42  ;;  %v414_v18 = vmul.f32 %v409_v4, %v1574_v33  ;;  %v416_v1 = vmul.f32 %v409_v4, %v1580_v35  ;;  %v420_v31 = vmul.f32 %v409_v4, %v1592_v39 }
  0x73   : > { %3744 = vst [vmem:[#allocation72_spill] sm:$0xff] %v1750_v26  ;;  %v1774_v26 = vmul.f32 %v1544_v23, %v1604_v43  ;;  %v422_v0 = vmul.f32 %v409_v4, %v1598_v41  ;;  %v424_v33 = vmul.f32 %v409_v4, %v1604_v43  ;;  %v426_v35 = vmul.f32 %v409_v4, %v1610_v45 }
  0x74   : > { %3745 = vst [vmem:[#allocation73_spill] sm:$0xff] %v1754_v24  ;;  %v1778_v24 = vmul.f32 %v1544_v23, %v1607_v44 }
  0x75   : > { %3746 = vst [vmem:[#allocation74_spill] sm:$0xff] %v1758_v25  ;;  %v1782_v25 = vmul.f32 %v1544_v23, %v1610_v45 }
  0x76   : > { %3747 = vst [vmem:[#allocation75_spill] sm:$0xff] %v1762_v19  ;;  %v1786_v19 = vmul.f32 %v1544_v23, %v1613_v46 }
  0x77   : > { %3748 = vst [vmem:[#allocation76_spill] sm:$0xff] %v1766_v11  ;;  %v1790_v11 = vmul.f32 %v1544_v23, %v1616_v47  ;;  %v417_v23 = vmul.f32 %v409_v4, %v1583_v36  ;;  %v427_v36 = vmul.f32 %v409_v4, %v1613_v46 }
  0x78   : > { %3749 = vst [vmem:[#allocation77_spill] sm:$0xff] %v1770_v30  ;;  %v411_v30 = vmul.f32 %v409_v4, %v1556_v27  ;;  %v418_v27 = vmul.f32 %v409_v4, %v1586_v37  ;;  %v428_v37 = vmul.f32 %v409_v4, %v1616_v47 }
  0x79   : > { %3750 = vst [vmem:[#allocation78_spill] sm:$0xff] %v1774_v26  ;;  %v412_v26 = vmul.f32 %v409_v4, %v1559_v28  ;;  %v419_v28 = vmul.f32 %v409_v4, %v1589_v38 }
  0x7a   : > { %3751 = vst [vmem:[#allocation79_spill] sm:$0xff] %v1778_v24  ;;  %v1798_v24 = vperm.slane %v1571_v32, 2  ;;  %v421_v32 = vmul.f32 %v409_v4, %v1595_v40 }
  0x7b   : > { %3752 = vst [vmem:[#allocation80_spill] sm:$0xff] %v1782_v25  ;;  %v413_v25 = vmul.f32 %v409_v4, %v1562_v29  ;;  %v423_v29 = vmul.f32 %v409_v4, %v1601_v42 }
  0x7c   : > { %3753 = vst [vmem:[#allocation81_spill] sm:$0xff] %v1786_v19  ;;  %v415_v19 = vmul.f32 %v409_v4, %v1577_v34  ;;  %v425_v34 = vmul.f32 %v409_v4, %v1607_v44 }
  0x7d   : > { %3754 = vst [vmem:[#allocation82_spill] sm:$0xff] %v1790_v11  ;;  %v547_v11 = vpop.permute.xlu2 %546 }
  0x7e   : > { %3755 = vst [vmem:[#allocation83_spill] sm:$0xff] %v1795_v20  ;;  %v1817_v38 = vmul.f32 %v547_v11, %v1673_v2  ;;  %v1820_v39 = vmul.f32 %v547_v11, %v1676_v3  ;;  %v1823_v41 = vmul.f32 %v547_v11, %v1679_v5  ;;  %v1826_v42 = vmul.f32 %v547_v11, %v1682_v6 }
  0x7f   : > { %3756 = vst [vmem:[#allocation84_spill] sm:$0xff] %v1798_v24  ;;  %v271_v43 = vpop.permute.xlu1 %270  ;;  %v1829_v44 = vmul.f32 %v547_v11, %v1685_v7  ;;  %v1832_v46 = vmul.f32 %v547_v11, %v1688_v8  ;;  %v1835_v4 = vmul.f32 %v547_v11, %v1691_v9  ;;  %v1838_v2 = vmul.f32 %v547_v11, %v1694_v10 }
  0x80   : > { %3757 = vst [vmem:[#allocation85_spill] sm:$0xff] %v1817_v38  ;;  %v1841_v3 = vmul.f32 %v547_v11, %v1697_v12  ;;  %v1844_v5 = vmul.f32 %v547_v11, %v1700_v13  ;;  %v1847_v6 = vmul.f32 %v547_v11, %v1703_v14  ;;  %v1850_v7 = vmul.f32 %v547_v11, %v1706_v15 }
  0x81   : > { %3758 = vst [vmem:[#allocation86_spill] sm:$0xff] %v1820_v39  ;;  %v1853_v8 = vmul.f32 %v547_v11, %v1709_v16  ;;  %v1856_v9 = vmul.f32 %v547_v11, %v1712_v17  ;;  %v1859_v10 = vmul.f32 %v547_v11, %v1723_v21  ;;  %v1862_v12 = vmul.f32 %v547_v11, %v1726_v22 }
  0x82   : > { %3759 = vst [vmem:[#allocation87_spill] sm:$0xff] %v1823_v41  ;;  %v273_v13 = vmul.f32 %v271_v43, %v1619_v48  ;;  %v274_v14 = vmul.f32 %v271_v43, %v1622_v49  ;;  %v1867_v47 = vmul.f32 %v547_v11, %v1795_v20  ;;  %v1870_v15 = vmul.f32 %v547_v11, %v1798_v24 }
  0x83   : > { %3760 = vst [vmem:[#allocation88_spill] sm:$0xff] %v1826_v42  ;;  %v275_v16 = vmul.f32 %v271_v43, %v1625_v50  ;;  %v276_v17 = vmul.f32 %v271_v43, %v1628_v51  ;;  %v277_v21 = vmul.f32 %v271_v43, %v1631_v52  ;;  %v278_v45 = vmul.f32 %v271_v43, %v1634_v53 }
  0x84   : > { %3761 = vst [vmem:[#allocation89_spill] sm:$0xff] %v1829_v44  ;;  %v279_v22 = vmul.f32 %v271_v43, %v1637_v54  ;;  %v280_v40 = vmul.f32 %v271_v43, %v1640_v55  ;;  %v282_v20 = vmul.f32 %v271_v43, %v1646_v57  ;;  %v284_v11 = vmul.f32 %v271_v43, %v1652_v59  ;;  %v189_v44 = vpop.permute.xlu0 %188 }
  0x85   : > { %3762 = vst [vmem:[#allocation90_spill] sm:$0xff] %v1832_v46  ;;  %v285_v24 = vmul.f32 %v271_v43, %v1655_v60  ;;  %v432_v46 = vadd.f32 %v414_v18, %v276_v17  ;;  %v433_v42 = vadd.f32 %v415_v19, %v277_v21  ;;  %v434_v41 = vadd.f32 %v416_v1, %v278_v45  ;;  %v3777_v19 = vld [vmem:[#allocation38_spill] sm:$0xff]  ;;  %v3778_v21 = vld [vmem:[#allocation39_spill] sm:$0xff] }
  0x86   : > { %3763 = vst [vmem:[#allocation91_spill] sm:$0xff] %v1835_v4  ;;  %v431_v4 = vadd.f32 %v413_v25, %v275_v16  ;;  %v435_v39 = vadd.f32 %v417_v23, %v279_v22  ;;  %v436_v38 = vadd.f32 %v418_v27, %v280_v40  ;;  %v438_v59 = vadd.f32 %v420_v31, %v282_v20  ;;  %v3788_v40 = vld [vmem:[#allocation47_spill] sm:$0xff] }
  0x87   : > { %3764 = vst [vmem:[#allocation92_spill] sm:$0xff] %v1838_v2  ;;  %v430_v2 = vadd.f32 %v412_v26, %v274_v14  ;;  %v1892_v14 = vmul.f32 %v189_v44, %v1622_v49  ;;  %v1895_v16 = vmul.f32 %v189_v44, %v1625_v50  ;;  %v1901_v17 = vmul.f32 %v189_v44, %v1631_v52  ;;  %v3780_v26 = vld [vmem:[#allocation41_spill] sm:$0xff] }
  0x88   : > { %3765 = vst [vmem:[#allocation93_spill] sm:$0xff] %v1841_v3  ;;  %v429_v3 = vadd.f32 %v411_v30, %v273_v13  ;;  %v1889_v13 = vmul.f32 %v189_v44, %v1619_v48  ;;  %v1907_v18 = vmul.f32 %v189_v44, %v1637_v54  ;;  %v1910_v20 = vmul.f32 %v189_v44, %v3777_v19  ;;  %v3782_v30 = vld [vmem:[#allocation43_spill] sm:$0xff]  ;;  %v3793_v1 = vld [vmem:[#allocation86_spill] sm:$0xff] }
  0x89   : > { %3766 = vst [vmem:[#allocation94_spill] sm:$0xff] %v1844_v5  ;;  %v1913_v22 = vmul.f32 %v189_v44, %v3778_v21  ;;  %v1919_v27 = vmul.f32 %v189_v44, %v3780_v26  ;;  %v1925_v31 = vmul.f32 %v189_v44, %v3782_v30 }
  0x8a   : > { %3767 = vst [vmem:[#allocation95_spill] sm:$0xff] %v1847_v6  ;;  %v3776_v6 = vld [vmem:[#allocation48_spill] sm:$0xff] }
  0x8b   : > { %3768 = vst [vmem:[#allocation96_spill] sm:$0xff] %v1850_v7  ;;  %v290_v5 = vmul.f32 %v271_v43, %v3776_v6  ;;  %v1940_v45 = vmul.f32 %v189_v44, %v3776_v6 }
  0x8c   : > { %3769 = vst [vmem:[#allocation97_spill] sm:$0xff] %v1853_v8  ;;  %v3775_v8 = vld [vmem:[#allocation47_spill] sm:$0xff] }
  0x8d   : > { %3770 = vst [vmem:[#allocation98_spill] sm:$0xff] %v1856_v9  ;;  %v288_v9 = vmul.f32 %v271_v43, %v1664_v63  ;;  %v289_v7 = vmul.f32 %v271_v43, %v3775_v8  ;;  %v446_v55 = vadd.f32 %v428_v37, %v290_v5  ;;  %v1946_v5 = vadd.f32 %v3793_v1, %v430_v2  ;;  %v230_v2 = vpop.permute.xlu0 %229 }
  0x8e   : > { %3771 = vst [vmem:[#allocation99_spill] sm:$0xff] %v1859_v10  ;;  %v287_v10 = vmul.f32 %v271_v43, %v1661_v62  ;;  %v441_v62 = vadd.f32 %v423_v29, %v285_v24  ;;  %v3779_v24 = vld [vmem:[#allocation40_spill] sm:$0xff] }
  0x8f   : > { %3772 = vst [vmem:[#allocation100_spill] sm:$0xff] %v1862_v12  ;;  %v281_v12 = vmul.f32 %v271_v43, %v1643_v56  ;;  %v444_v56 = vadd.f32 %v426_v35, %v288_v9  ;;  %v445_v8 = vadd.f32 %v427_v36, %v289_v7  ;;  %v1916_v25 = vmul.f32 %v189_v44, %v3779_v24  ;;  %v3786_v36 = vld [vmem:[#allocation46_spill] sm:$0xff]  ;;  %v3795_v7 = vld [vmem:[#allocation87_spill] sm:$0xff]  ;;  %v3807_v1 = vld [vmem:[#allocation93_spill] sm:$0xff] }
  0x90   : > { %3773 = vst [vmem:[#allocation101_spill] sm:$0xff] %v1867_v47  ;;  %v283_v47 = vmul.f32 %v271_v43, %v1649_v58  ;;  %v440_v58 = vadd.f32 %v422_v0, %v284_v11  ;;  %v443_v63 = vadd.f32 %v425_v34, %v287_v10  ;;  %v3784_v34 = vld [vmem:[#allocation45_spill] sm:$0xff]  ;;  %v1934_v37 = vmul.f32 %v189_v44, %v3786_v36  ;;  %v3797_v10 = vld [vmem:[#allocation88_spill] sm:$0xff] }
  0x91   : > { %3774 = vst [vmem:[#allocation102_spill] sm:$0xff] %v1870_v15  ;;  %v286_v15 = vmul.f32 %v271_v43, %v1658_v61  ;;  %v437_v60 = vadd.f32 %v419_v28, %v281_v12  ;;  %v1898_v12 = vmul.f32 %v189_v44, %v1628_v51  ;;  %v3781_v28 = vld [vmem:[#allocation42_spill] sm:$0xff]  ;;  %v1931_v35 = vmul.f32 %v189_v44, %v3784_v34  ;;  %v3799_v11 = vld [vmem:[#allocation89_spill] sm:$0xff] }
  0x92   : > { %v439_v61 = vadd.f32 %v421_v32, %v283_v47  ;;  %v1922_v29 = vmul.f32 %v189_v44, %v3781_v28  ;;  %v3783_v32 = vld [vmem:[#allocation44_spill] sm:$0xff]  ;;  %3787 = vst [vmem:[#allocation38_spill] sm:$0xff] %v1934_v37  ;;  %v1937_v43 = vmul.f32 %v189_v44, %v3788_v40  ;;  %v3791_v47 = vld [vmem:[#allocation85_spill] sm:$0xff]  ;;  %v1949_v9 = vadd.f32 %v3795_v7, %v431_v4  ;;  %v3809_v4 = vld [vmem:[#allocation94_spill] sm:$0xff] }
  0x93   : > { %v442_v57 = vadd.f32 %v424_v33, %v286_v15  ;;  %v1904_v15 = vmul.f32 %v189_v44, %v1634_v53  ;;  %v1928_v33 = vmul.f32 %v189_v44, %v3783_v32  ;;  %3785 = vst [vmem:[#allocation48_spill] sm:$0xff] %v1931_v35  ;;  %v1943_v0 = vadd.f32 %v3791_v47, %v429_v3  ;;  %v3801_v35 = vld [vmem:[#allocation90_spill] sm:$0xff]  ;;  %v3803_v44 = vld [vmem:[#allocation91_spill] sm:$0xff]  ;;  %v3805_v3 = vld [vmem:[#allocation92_spill] sm:$0xff] }
  0x94   : > { %3789 = vst [vmem:[#allocation39_spill] sm:$0xff] %v1937_v43  ;;  %v1952_v23 = vadd.f32 %v3797_v10, %v432_v46  ;;  %v1955_v37 = vadd.f32 %v3799_v11, %v433_v42  ;;  %v1958_v43 = vadd.f32 %v3801_v35, %v434_v41  ;;  %v1964_v47 = vadd.f32 %v3805_v3, %v436_v38  ;;  %v3811_v46 = vld [vmem:[#allocation95_spill] sm:$0xff]  ;;  %v3813_v42 = vld [vmem:[#allocation96_spill] sm:$0xff]  ;;  %v3815_v41 = vld [vmem:[#allocation97_spill] sm:$0xff] }
  0x95   : > { %3790 = vst [vmem:[#allocation40_spill] sm:$0xff] %v1940_v45  ;;  %v1961_v45 = vadd.f32 %v3803_v44, %v435_v39  ;;  %v1970_v7 = vadd.f32 %v3809_v4, %v438_v59  ;;  %v1973_v10 = vadd.f32 %v3811_v46, %v439_v61  ;;  %v1976_v11 = vadd.f32 %v3813_v42, %v440_v58  ;;  %v3817_v39 = vld [vmem:[#allocation98_spill] sm:$0xff]  ;;  %v3819_v38 = vld [vmem:[#allocation99_spill] sm:$0xff] }
  0x96   : > { %3792 = vst [vmem:[#allocation41_spill] sm:$0xff] %v1943_v0  ;;  %v1979_v35 = vadd.f32 %v3815_v41, %v441_v62  ;;  %v1982_v44 = vadd.f32 %v3817_v39, %v442_v57  ;;  %v1985_v3 = vadd.f32 %v3819_v38, %v443_v63  ;;  %v232_v58 = vmul.f32 %v230_v2, %v1619_v48  ;;  %v3827_v38 = vld [vmem:[#allocation63_spill] sm:$0xff] }
  0x97   : > { %3794 = vst [vmem:[#allocation42_spill] sm:$0xff] %v1946_v5  ;;  %v1967_v5 = vadd.f32 %v3807_v1, %v437_v60  ;;  %v3821_v60 = vld [vmem:[#allocation100_spill] sm:$0xff]  ;;  %v3823_v59 = vld [vmem:[#allocation101_spill] sm:$0xff]  ;;  %v233_v62 = vmul.f32 %v230_v2, %v1622_v49  ;;  %v234_v42 = vmul.f32 %v230_v2, %v1625_v50  ;;  %v235_v57 = vmul.f32 %v230_v2, %v1628_v51 }
  0x98   : > { %3796 = vst [vmem:[#allocation43_spill] sm:$0xff] %v1949_v9  ;;  %v1988_v1 = vadd.f32 %v3821_v60, %v444_v56  ;;  %v1991_v4 = vadd.f32 %v3823_v59, %v445_v8  ;;  %v3825_v61 = vld [vmem:[#allocation102_spill] sm:$0xff]  ;;  %v236_v63 = vmul.f32 %v230_v2, %v1631_v52  ;;  %v237_v41 = vmul.f32 %v230_v2, %v1634_v53  ;;  %v3908_v9 = vld [vmem:[#allocation15_spill] sm:$0xff] }
  0x99   : > { %3798 = vst [vmem:[#allocation44_spill] sm:$0xff] %v1952_v23  ;;  %v1994_v46 = vadd.f32 %v3825_v61, %v446_v55  ;;  %v238_v56 = vmul.f32 %v230_v2, %v1637_v54  ;;  %v239_v8 = vmul.f32 %v230_v2, %v3777_v19  ;;  %v240_v39 = vmul.f32 %v230_v2, %v3778_v21 }
  0x9a   : > { %3800 = vst [vmem:[#allocation45_spill] sm:$0xff] %v1955_v37  ;;  %v241_v55 = vmul.f32 %v230_v2, %v3779_v24  ;;  %v242_v48 = vmul.f32 %v230_v2, %v3780_v26  ;;  %v243_v49 = vmul.f32 %v230_v2, %v3781_v28  ;;  %v244_v50 = vmul.f32 %v230_v2, %v3782_v30  ;;  %v3828_v24 = vld [vmem:[#allocation64_spill] sm:$0xff]  ;;  %v3829_v26 = vld [vmem:[#allocation67_spill] sm:$0xff]  ;;  %v3877_v37 = vld [vmem:[#allocation37_spill] sm:$0xff] }
  0x9b   : > { %3802 = vst [vmem:[#allocation46_spill] sm:$0xff] %v1958_v43  ;;  %v245_v51 = vmul.f32 %v230_v2, %v3783_v32  ;;  %v246_v52 = vmul.f32 %v230_v2, %v3784_v34  ;;  %v247_v53 = vmul.f32 %v230_v2, %v3786_v36  ;;  %v248_v54 = vmul.f32 %v230_v2, %v3788_v40  ;;  %v3830_v30 = vld [vmem:[#allocation68_spill] sm:$0xff]  ;;  %v3832_v32 = vld [vmem:[#allocation69_spill] sm:$0xff]  ;;  %v3834_v36 = vld [vmem:[#allocation70_spill] sm:$0xff] }
  0x9c   : > { %3804 = vst [vmem:[#allocation47_spill] sm:$0xff] %v1961_v45  ;;  %v249_v19 = vmul.f32 %v230_v2, %v3776_v6  ;;  %v2015_v21 = vadd.f32 %v3827_v38, %v232_v58  ;;  %v2018_v60 = vadd.f32 %v3828_v24, %v233_v62  ;;  %v2021_v28 = vadd.f32 %v3829_v26, %v234_v42  ;;  %v3836_v40 = vld [vmem:[#allocation71_spill] sm:$0xff]  ;;  %v3838_v2 = vld [vmem:[#allocation72_spill] sm:$0xff]  ;;  %v329_v62 = vpop.permute.xlu1 %328  ;;  %v3840_v38 = vld [vmem:[#allocation73_spill] sm:$0xff] }
  0x9d   : > { %3806 = vst [vmem:[#allocation85_spill] sm:$0xff] %v1964_v47  ;;  %v2024_v59 = vadd.f32 %v3830_v30, %v235_v57  ;;  %v2027_v34 = vadd.f32 %v3832_v32, %v236_v63  ;;  %v2030_v61 = vadd.f32 %v3834_v36, %v237_v41  ;;  %v2033_v6 = vadd.f32 %v3836_v40, %v238_v56  ;;  %v3842_v42 = vld [vmem:[#allocation74_spill] sm:$0xff]  ;;  %v3844_v57 = vld [vmem:[#allocation75_spill] sm:$0xff]  ;;  %v3846_v63 = vld [vmem:[#allocation76_spill] sm:$0xff] }
  0x9e   : > { %3808 = vst [vmem:[#allocation86_spill] sm:$0xff] %v1967_v5  ;;  %v2036_v58 = vadd.f32 %v3838_v2, %v239_v8  ;;  %v2039_v24 = vadd.f32 %v3840_v38, %v240_v39  ;;  %v2042_v26 = vadd.f32 %v3842_v42, %v241_v55  ;;  %v2045_v30 = vadd.f32 %v3844_v57, %v242_v48  ;;  %v3848_v41 = vld [vmem:[#allocation77_spill] sm:$0xff]  ;;  %v3850_v56 = vld [vmem:[#allocation78_spill] sm:$0xff]  ;;  %v3852_v8 = vld [vmem:[#allocation79_spill] sm:$0xff] }
  0x9f   : > { %3810 = vst [vmem:[#allocation87_spill] sm:$0xff] %v1970_v7  ;;  %v2048_v32 = vadd.f32 %v3846_v63, %v243_v49  ;;  %v2051_v36 = vadd.f32 %v3848_v41, %v244_v50  ;;  %v2054_v40 = vadd.f32 %v3850_v56, %v245_v51  ;;  %v2057_v2 = vadd.f32 %v3852_v8, %v246_v52  ;;  %v3854_v39 = vld [vmem:[#allocation80_spill] sm:$0xff]  ;;  %v3856_v55 = vld [vmem:[#allocation81_spill] sm:$0xff]  ;;  %v3858_v48 = vld [vmem:[#allocation82_spill] sm:$0xff] }
  0xa0   : > { %3812 = vst [vmem:[#allocation88_spill] sm:$0xff] %v1973_v10  ;;  %v2060_v38 = vadd.f32 %v3854_v39, %v247_v53  ;;  %v2063_v42 = vadd.f32 %v3856_v55, %v248_v54  ;;  %v2066_v57 = vadd.f32 %v3858_v48, %v249_v19  ;;  %v3860_v49 = vld [vmem:[#allocation17_spill] sm:$0xff]  ;;  %v3862_v41 = vld [vmem:[#allocation19_spill] sm:$0xff]  ;;  %v3866_v53 = vld [vmem:[#allocation26_spill] sm:$0xff]  ;;  %v2180_v0 = vperm.slane %v3908_v9, 3 }
  0xa1   : > { %3814 = vst [vmem:[#allocation89_spill] sm:$0xff] %v1976_v11  ;;  %v331_v63 = vmul.f32 %v329_v62, %v3860_v49  ;;  %v3863_v51 = vld [vmem:[#allocation23_spill] sm:$0xff]  ;;  %v3865_v8 = vld [vmem:[#allocation25_spill] sm:$0xff]  ;;  %v337_v39 = vmul.f32 %v329_v62, %v3866_v53  ;;  %v3868_v55 = vld [vmem:[#allocation28_spill] sm:$0xff] }
  0xa2   : > { %3816 = vst [vmem:[#allocation90_spill] sm:$0xff] %v1979_v35  ;;  %v334_v56 = vmul.f32 %v329_v62, %v3863_v51  ;;  %v339_v35 = vmul.f32 %v329_v62, %v3868_v55  ;;  %v3869_v19 = vld [vmem:[#allocation29_spill] sm:$0xff]  ;;  %v3870_v11 = vld [vmem:[#allocation30_spill] sm:$0xff]  ;;  %v3871_v10 = vld [vmem:[#allocation31_spill] sm:$0xff] }
  0xa3   : > { %3818 = vst [vmem:[#allocation91_spill] sm:$0xff] %v1982_v44  ;;  %v3867_v44 = vld [vmem:[#allocation27_spill] sm:$0xff]  ;;  %v340_v48 = vmul.f32 %v329_v62, %v3869_v19  ;;  %v341_v49 = vmul.f32 %v329_v62, %v3870_v11  ;;  %v3872_v7 = vld [vmem:[#allocation32_spill] sm:$0xff]  ;;  %v3873_v5 = vld [vmem:[#allocation33_spill] sm:$0xff]  ;;  %v2087_v55 = vadd.f32 %v331_v63, %v1889_v13 }
  0xa4   : > { %3820 = vst [vmem:[#allocation92_spill] sm:$0xff] %v1985_v3  ;;  %v336_v3 = vmul.f32 %v329_v62, %v3865_v8  ;;  %v338_v54 = vmul.f32 %v329_v62, %v3867_v44  ;;  %v344_v51 = vmul.f32 %v329_v62, %v3873_v5  ;;  %v3874_v47 = vld [vmem:[#allocation34_spill] sm:$0xff]  ;;  %v3875_v45 = vld [vmem:[#allocation35_spill] sm:$0xff]  ;;  %v3876_v43 = vld [vmem:[#allocation36_spill] sm:$0xff]  ;;  %v348_v44 = vmul.f32 %v329_v62, %v3877_v37 }
  0xa5   : > { %3822 = vst [vmem:[#allocation93_spill] sm:$0xff] %v1988_v1  ;;  %v3864_v1 = vld [vmem:[#allocation24_spill] sm:$0xff]  ;;  %v346_v8 = vmul.f32 %v329_v62, %v3875_v45  ;;  %v347_v53 = vmul.f32 %v329_v62, %v3876_v43  ;;  %v2105_v37 = vadd.f32 %v337_v39, %v1907_v18  ;;  %v3888_v63 = vld [vmem:[#allocation5_spill] sm:$0xff]  ;;  %v3892_v39 = vld [vmem:[#allocation7_spill] sm:$0xff] }
  0xa6   : > { %3824 = vst [vmem:[#allocation94_spill] sm:$0xff] %v1991_v4  ;;  %v333_v4 = vmul.f32 %v329_v62, %v3862_v41  ;;  %v335_v52 = vmul.f32 %v329_v62, %v3864_v1  ;;  %v343_v41 = vmul.f32 %v329_v62, %v3872_v7  ;;  %v345_v1 = vmul.f32 %v329_v62, %v3874_v47 }
  0xa7   : > { %3826 = vst [vmem:[#allocation95_spill] sm:$0xff] %v1994_v46  ;;  %v3861_v46 = vld [vmem:[#allocation18_spill] sm:$0xff]  ;;  %v2096_v7 = vadd.f32 %v334_v56, %v1898_v12  ;;  %v2102_v45 = vadd.f32 %v336_v3, %v1904_v15  ;;  %v2108_v13 = vadd.f32 %v338_v54, %v1910_v20  ;;  %v2117_v12 = vadd.f32 %v341_v49, %v1919_v27  ;;  %v3878_v20 = vld [vmem:[#allocation48_spill] sm:$0xff] }
  0xa8   : > { %3831 = vst [vmem:[#allocation96_spill] sm:$0xff] %v2024_v59  ;;  %v332_v50 = vmul.f32 %v329_v62, %v3861_v46  ;;  %v342_v46 = vmul.f32 %v329_v62, %v3871_v10  ;;  %v2093_v10 = vadd.f32 %v333_v4, %v1895_v16  ;;  %v2099_v5 = vadd.f32 %v335_v52, %v1901_v17  ;;  %v3881_v27 = vld [vmem:[#allocation40_spill] sm:$0xff]  ;;  %v3890_v56 = vld [vmem:[#allocation6_spill] sm:$0xff] }
  0xa9   : > { %3833 = vst [vmem:[#allocation97_spill] sm:$0xff] %v2027_v34  ;;  %v2114_v16 = vadd.f32 %v340_v48, %v1916_v25  ;;  %v2123_v15 = vadd.f32 %v343_v41, %v1925_v31  ;;  %v2126_v18 = vadd.f32 %v344_v51, %v1928_v33  ;;  %v2129_v43 = vadd.f32 %v345_v1, %v3878_v20  ;;  %v3880_v25 = vld [vmem:[#allocation39_spill] sm:$0xff]  ;;  %v3886_v33 = vld [vmem:[#allocation4_spill] sm:$0xff]  ;;  %v3898_v51 = vld [vmem:[#allocation10_spill] sm:$0xff] }
  0xaa   : > { %3835 = vst [vmem:[#allocation98_spill] sm:$0xff] %v2030_v61  ;;  %v2090_v19 = vadd.f32 %v332_v50, %v1892_v14  ;;  %v2111_v14 = vadd.f32 %v339_v35, %v1913_v22  ;;  %v2120_v17 = vadd.f32 %v342_v46, %v1922_v29  ;;  %v3879_v22 = vld [vmem:[#allocation38_spill] sm:$0xff]  ;;  %v2135_v11 = vadd.f32 %v347_v53, %v3880_v25  ;;  %v3884_v31 = vld [vmem:[#allocation3_spill] sm:$0xff]  ;;  %v3894_v48 = vld [vmem:[#allocation8_spill] sm:$0xff] }
  0xab   : > { %3837 = vst [vmem:[#allocation99_spill] sm:$0xff] %v2033_v6  ;;  %v2132_v47 = vadd.f32 %v346_v8, %v3879_v22  ;;  %v2138_v35 = vadd.f32 %v348_v44, %v3881_v27  ;;  %v3882_v29 = vld [vmem:[#allocation2_spill] sm:$0xff]  ;;  %v2144_v4 = vperm.slane %v3884_v31, 3  ;;  %v2147_v62 = vperm.slane %v3886_v33, 3  ;;  %v3896_v46 = vld [vmem:[#allocation9_spill] sm:$0xff]  ;;  %v3900_v8 = vld [vmem:[#allocation11_spill] sm:$0xff] }
  0xac   : > { %3839 = vst [vmem:[#allocation100_spill] sm:$0xff] %v2036_v58  ;;  %v2141_v3 = vperm.slane %v3882_v29, 3  ;;  %v2150_v50 = vperm.slane %v3888_v63, 3  ;;  %v2153_v52 = vperm.slane %v3890_v56, 3  ;;  %v2156_v54 = vperm.slane %v3892_v39, 3  ;;  %v3902_v44 = vld [vmem:[#allocation12_spill] sm:$0xff] }
  0xad   : > { %3841 = vst [vmem:[#allocation101_spill] sm:$0xff] %v2039_v24  ;;  %v2159_v49 = vperm.slane %v3894_v48, 3  ;;  %v2162_v41 = vperm.slane %v3896_v46, 3  ;;  %v2165_v1 = vperm.slane %v3898_v51, 3  ;;  %v2168_v53 = vperm.slane %v3900_v8, 3  ;;  %v3904_v22 = vld [vmem:[#allocation13_spill] sm:$0xff]  ;;  %v645_v46 = vpop.permute.xlu2 %644 }
  0xae   : > { %3843 = vst [vmem:[#allocation102_spill] sm:$0xff] %v2042_v26  ;;  %v2171_v20 = vperm.slane %v3902_v44, 3  ;;  %v2174_v25 = vperm.slane %v3904_v22, 3  ;;  %v3906_v27 = vld [vmem:[#allocation14_spill] sm:$0xff]  ;;  %v3910_v48 = vld [vmem:[#allocation16_spill] sm:$0xff]  ;;  %v3914_v8 = vld [vmem:[#allocation21_spill] sm:$0xff]  ;;  %v2195_v22 = vmul.f32 %v645_v46, %v2141_v3  ;;  %v2201_v9 = vmul.f32 %v645_v46, %v2147_v62 }
  0xaf   : > { %3845 = vst [vmem:[#allocation63_spill] sm:$0xff] %v2045_v30  ;;  %v2177_v23 = vperm.slane %v3906_v27, 3  ;;  %v2183_v39 = vperm.slane %v3910_v48, 3  ;;  %v3912_v51 = vld [vmem:[#allocation20_spill] sm:$0xff]  ;;  %v2189_v63 = vperm.slane %v3914_v8, 3  ;;  %v3916_v44 = vld [vmem:[#allocation22_spill] sm:$0xff]  ;;  %v2198_v27 = vmul.f32 %v645_v46, %v2144_v4 }
  0xb0   : > { %3847 = vst [vmem:[#allocation64_spill] sm:$0xff] %v2048_v32  ;;  %v2186_v56 = vperm.slane %v3912_v51, 3  ;;  %v2192_v33 = vperm.slane %v3916_v44, 3  ;;  %v2204_v48 = vmul.f32 %v645_v46, %v2150_v50  ;;  %v2207_v51 = vmul.f32 %v645_v46, %v2153_v52  ;;  %v3949_v29 = vld [vmem:[#allocation62_spill] sm:$0xff]  ;;  %v3953_v30 = vld [vmem:[#allocation84_spill] sm:$0xff] }
  0xb1   : > { %3849 = vst [vmem:[#allocation67_spill] sm:$0xff] %v2051_v36  ;;  %v2210_v8 = vmul.f32 %v645_v46, %v2156_v54  ;;  %v2213_v44 = vmul.f32 %v645_v46, %v2159_v49  ;;  %v3952_v36 = vld [vmem:[#allocation83_spill] sm:$0xff] }
  0xb2   : > { %3851 = vst [vmem:[#allocation68_spill] sm:$0xff] %v2054_v40 }
  0xb3   : > { %3853 = vst [vmem:[#allocation69_spill] sm:$0xff] %v2057_v2  ;;  %v3951_v2 = vld [vmem:[#allocation66_spill] sm:$0xff] }
  0xb4   : > { %3855 = vst [vmem:[#allocation70_spill] sm:$0xff] %v2060_v38 }
  0xb5   : > { %3857 = vst [vmem:[#allocation71_spill] sm:$0xff] %v2063_v42  ;;  %v3950_v42 = vld [vmem:[#allocation65_spill] sm:$0xff] }
  0xb6   : > { %3859 = vst [vmem:[#allocation72_spill] sm:$0xff] %v2066_v57 }
  0xb7   : > { %3883 = vst [vmem:[#allocation73_spill] sm:$0xff] %v2141_v3  ;;  %v3948_v3 = vld [vmem:[#allocation61_spill] sm:$0xff] }
  0xb8   : > { %3885 = vst [vmem:[#allocation74_spill] sm:$0xff] %v2144_v4  ;;  %v467_v4 = vpop.permute.xlu0 %466 }
  0xb9   : > { %3887 = vst [vmem:[#allocation75_spill] sm:$0xff] %v2147_v62  ;;  %v481_v31 = vmul.f32 %v467_v4, %v3948_v3  ;;  %v482_v57 = vmul.f32 %v467_v4, %v3949_v29  ;;  %v483_v38 = vmul.f32 %v467_v4, %v3950_v42  ;;  %v484_v40 = vmul.f32 %v467_v4, %v3951_v2 }
  0xba   : > { %3889 = vst [vmem:[#allocation76_spill] sm:$0xff] %v2150_v50  ;;  %v3947_v50 = vld [vmem:[#allocation60_spill] sm:$0xff]  ;;  %v485_v32 = vmul.f32 %v467_v4, %v3952_v36  ;;  %v486_v26 = vmul.f32 %v467_v4, %v3953_v30 }
  0xbb   : > { %3891 = vst [vmem:[#allocation77_spill] sm:$0xff] %v2153_v52  ;;  %v480_v62 = vmul.f32 %v467_v4, %v3947_v50 }
  0xbc   : > { %3893 = vst [vmem:[#allocation78_spill] sm:$0xff] %v2156_v54 }
  0xbd   : > { %3895 = vst [vmem:[#allocation79_spill] sm:$0xff] %v2159_v49  ;;  %v3943_v49 = vld [vmem:[#allocation56_spill] sm:$0xff] }
  0xbe   : > { %3897 = vst [vmem:[#allocation80_spill] sm:$0xff] %v2162_v41 }
  0xbf   : > { %3899 = vst [vmem:[#allocation81_spill] sm:$0xff] %v2165_v1 }
  0xc0   : > { %3901 = vst [vmem:[#allocation82_spill] sm:$0xff] %v2168_v53 }
  0xc1   : > { %3903 = vst [vmem:[#allocation17_spill] sm:$0xff] %v2171_v20 }
  0xc2   : > { %3905 = vst [vmem:[#allocation18_spill] sm:$0xff] %v2174_v25 }
  0xc3   : > { %3907 = vst [vmem:[#allocation19_spill] sm:$0xff] %v2177_v23 }
  0xc4   : > { %3909 = vst [vmem:[#allocation23_spill] sm:$0xff] %v2180_v0 }
  0xc5   : > { %3911 = vst [vmem:[#allocation24_spill] sm:$0xff] %v2183_v39 }
  0xc6   : > { %3913 = vst [vmem:[#allocation25_spill] sm:$0xff] %v2186_v56 }
  0xc7   : > { %3915 = vst [vmem:[#allocation26_spill] sm:$0xff] %v2189_v63 }
  0xc8   : > { %3917 = vst [vmem:[#allocation27_spill] sm:$0xff] %v2192_v33 }
  0xc9   : > { %3918 = vst [vmem:[#allocation28_spill] sm:$0xff] %v2195_v22  ;;  %v2216_v22 = vmul.f32 %v645_v46, %v2162_v41 }
  0xca   : > { %3919 = vst [vmem:[#allocation29_spill] sm:$0xff] %v2198_v27  ;;  %v2219_v27 = vmul.f32 %v645_v46, %v2165_v1  ;;  %v3940_v1 = vld [vmem:[#allocation53_spill] sm:$0xff] }
  0xcb   : > { %3920 = vst [vmem:[#allocation30_spill] sm:$0xff] %v2201_v9  ;;  %v2222_v9 = vmul.f32 %v645_v46, %v2168_v53 }
  0xcc   : > { %3921 = vst [vmem:[#allocation31_spill] sm:$0xff] %v2204_v48  ;;  %v2225_v48 = vmul.f32 %v645_v46, %v2171_v20  ;;  %v3937_v20 = vld [vmem:[#allocation50_spill] sm:$0xff] }
  0xcd   : > { %3922 = vst [vmem:[#allocation32_spill] sm:$0xff] %v2207_v51  ;;  %v2228_v51 = vmul.f32 %v645_v46, %v2174_v25  ;;  %v3936_v25 = vld [vmem:[#allocation49_spill] sm:$0xff] }
  0xce   : > { %3923 = vst [vmem:[#allocation33_spill] sm:$0xff] %v2210_v8  ;;  %v2231_v8 = vmul.f32 %v645_v46, %v2177_v23  ;;  %v470_v23 = vmul.f32 %v467_v4, %v3937_v20 }
  0xcf   : > { %3924 = vst [vmem:[#allocation34_spill] sm:$0xff] %v2213_v44  ;;  %v2234_v44 = vmul.f32 %v645_v46, %v2180_v0  ;;  %v3939_v0 = vld [vmem:[#allocation52_spill] sm:$0xff] }
  0xd0   : > { %3925 = vst [vmem:[#allocation35_spill] sm:$0xff] %v2216_v22  ;;  %v2237_v22 = vmul.f32 %v645_v46, %v2183_v39  ;;  %v473_v39 = vmul.f32 %v467_v4, %v3940_v1  ;;  %v2270_v58 = vadd.f32 %v470_v23, %v2090_v19  ;;  %v507_v23 = vpop.permute.xlu1 %506 }
  0xd1   : > { %3926 = vst [vmem:[#allocation36_spill] sm:$0xff] %v2219_v27  ;;  %v2240_v27 = vmul.f32 %v645_v46, %v2186_v56  ;;  %v3942_v56 = vld [vmem:[#allocation55_spill] sm:$0xff] }
  0xd2   : > { %3927 = vst [vmem:[#allocation37_spill] sm:$0xff] %v2222_v9  ;;  %v2243_v9 = vmul.f32 %v645_v46, %v2189_v63  ;;  %v476_v63 = vmul.f32 %v467_v4, %v3943_v49  ;;  %v2279_v34 = vadd.f32 %v473_v39, %v2099_v5  ;;  %v2300_v5 = vadd.f32 %v480_v62, %v2120_v17 }
  0xd3   : > { %3928 = vst [vmem:[#allocation48_spill] sm:$0xff] %v2225_v48  ;;  %v2246_v48 = vmul.f32 %v645_v46, %v2192_v33  ;;  %v3945_v46 = vld [vmem:[#allocation58_spill] sm:$0xff]  ;;  %v3946_v33 = vld [vmem:[#allocation59_spill] sm:$0xff]  ;;  %v509_v17 = vmul.f32 %v507_v23, %v3936_v25  ;;  %v523_v62 = vmul.f32 %v507_v23, %v3950_v42 }
  0xd4   : > { %3929 = vst [vmem:[#allocation38_spill] sm:$0xff] %v2228_v51  ;;  %v469_v51 = vmul.f32 %v467_v4, %v3936_v25  ;;  %v479_v52 = vmul.f32 %v467_v4, %v3946_v33 }
  0xd5   : > { %3930 = vst [vmem:[#allocation39_spill] sm:$0xff] %v2231_v8  ;;  %v3938_v8 = vld [vmem:[#allocation51_spill] sm:$0xff] }
  0xd6   : > { %3931 = vst [vmem:[#allocation40_spill] sm:$0xff] %v2234_v44  ;;  %v471_v53 = vmul.f32 %v467_v4, %v3938_v8  ;;  %v472_v44 = vmul.f32 %v467_v4, %v3939_v0  ;;  %v2267_v24 = vadd.f32 %v469_v51, %v2087_v55  ;;  %v2288_v55 = vadd.f32 %v476_v63, %v2108_v13  ;;  %v3987_v51 = vld [vmem:[#allocation63_spill] sm:$0xff] }
  0xd7   : > { %3932 = vst [vmem:[#allocation103_spill] sm:$0xff] %v2237_v22  ;;  %v3941_v22 = vld [vmem:[#allocation54_spill] sm:$0xff]  ;;  %v2309_v13 = vadd.f32 %v483_v38, %v2129_v43  ;;  %v513_v38 = vmul.f32 %v507_v23, %v3940_v1  ;;  %v524_v63 = vmul.f32 %v507_v23, %v3951_v2 }
  0xd8   : > { %3933 = vst [vmem:[#allocation104_spill] sm:$0xff] %v2240_v27  ;;  %v474_v41 = vmul.f32 %v467_v4, %v3941_v22  ;;  %v475_v27 = vmul.f32 %v467_v4, %v3942_v56  ;;  %v2273_v6 = vadd.f32 %v471_v53, %v2093_v10  ;;  %v2276_v61 = vadd.f32 %v472_v44, %v2096_v7  ;;  %v3977_v2 = vld [vmem:[#allocation98_spill] sm:$0xff]  ;;  %v3991_v44 = vld [vmem:[#allocation67_spill] sm:$0xff] }
  0xd9   : > { %3934 = vst [vmem:[#allocation105_spill] sm:$0xff] %v2243_v9  ;;  %v3944_v9 = vld [vmem:[#allocation57_spill] sm:$0xff]  ;;  %v2297_v7 = vadd.f32 %v479_v52, %v2117_v12  ;;  %v2318_v12 = vadd.f32 %v486_v26, %v2138_v35  ;;  %v518_v26 = vmul.f32 %v507_v23, %v3945_v46  ;;  %v521_v35 = vmul.f32 %v507_v23, %v3948_v3  ;;  %v3973_v3 = vld [vmem:[#allocation96_spill] sm:$0xff] }
  0xda   : > { %3935 = vst [vmem:[#allocation106_spill] sm:$0xff] %v2246_v48  ;;  %v477_v54 = vmul.f32 %v467_v4, %v3944_v9  ;;  %v478_v48 = vmul.f32 %v467_v4, %v3945_v46  ;;  %v2282_v59 = vadd.f32 %v474_v41, %v2102_v45  ;;  %v2285_v4 = vadd.f32 %v475_v27, %v2105_v37  ;;  %v3995_v27 = vld [vmem:[#allocation69_spill] sm:$0xff] }
  0xdb   : > { %3954 = vst [vmem:[#allocation49_spill] sm:$0xff] %v2273_v6  ;;  %v2303_v45 = vadd.f32 %v481_v31, %v2123_v15  ;;  %v2306_v37 = vadd.f32 %v482_v57, %v2126_v18  ;;  %v510_v15 = vmul.f32 %v507_v23, %v3937_v20  ;;  %v511_v31 = vmul.f32 %v507_v23, %v3938_v8  ;;  %v3989_v8 = vld [vmem:[#allocation64_spill] sm:$0xff] }
  0xdc   : > { %3955 = vst [vmem:[#allocation50_spill] sm:$0xff] %v2276_v61  ;;  %v2291_v19 = vadd.f32 %v477_v54, %v2111_v14  ;;  %v2294_v10 = vadd.f32 %v478_v48, %v2114_v16  ;;  %v2312_v14 = vadd.f32 %v484_v40, %v2132_v47  ;;  %v2315_v16 = vadd.f32 %v485_v32, %v2135_v11 }
  0xdd   : > { %3956 = vst [vmem:[#allocation51_spill] sm:$0xff] %v2279_v34  ;;  %v512_v57 = vmul.f32 %v507_v23, %v3939_v0  ;;  %v514_v18 = vmul.f32 %v507_v23, %v3941_v22  ;;  %v515_v40 = vmul.f32 %v507_v23, %v3942_v56  ;;  %v516_v32 = vmul.f32 %v507_v23, %v3943_v49  ;;  %v3993_v22 = vld [vmem:[#allocation68_spill] sm:$0xff] }
  0xde   : > { %3957 = vst [vmem:[#allocation52_spill] sm:$0xff] %v2282_v59  ;;  %v517_v43 = vmul.f32 %v507_v23, %v3944_v9  ;;  %v519_v47 = vmul.f32 %v507_v23, %v3946_v33  ;;  %v520_v11 = vmul.f32 %v507_v23, %v3947_v50  ;;  %v522_v0 = vmul.f32 %v507_v23, %v3949_v29  ;;  %v3975_v29 = vld [vmem:[#allocation97_spill] sm:$0xff] }
  0xdf   : > { %3958 = vst [vmem:[#allocation53_spill] sm:$0xff] %v2285_v4  ;;  %v525_v56 = vmul.f32 %v507_v23, %v3952_v36  ;;  %v526_v52 = vmul.f32 %v507_v23, %v3953_v30  ;;  %v2339_v9 = vadd.f32 %v509_v17, %v2015_v21  ;;  %v2342_v39 = vadd.f32 %v510_v15, %v2018_v60  ;;  %v3979_v36 = vld [vmem:[#allocation99_spill] sm:$0xff]  ;;  %v3981_v21 = vld [vmem:[#allocation100_spill] sm:$0xff]  ;;  %v3983_v60 = vld [vmem:[#allocation101_spill] sm:$0xff] }
  0xe0   : > { %3959 = vst [vmem:[#allocation54_spill] sm:$0xff] %v2288_v55  ;;  %v2345_v33 = vadd.f32 %v511_v31, %v2021_v28  ;;  %v2348_v50 = vadd.f32 %v512_v57, %v3973_v3  ;;  %v2351_v42 = vadd.f32 %v513_v38, %v3975_v29  ;;  %v2354_v54 = vadd.f32 %v514_v18, %v3977_v2  ;;  %v3985_v28 = vld [vmem:[#allocation102_spill] sm:$0xff]  ;;  %v3999_v15 = vld [vmem:[#allocation71_spill] sm:$0xff]  ;;  %v4001_v57 = vld [vmem:[#allocation72_spill] sm:$0xff]  ;;  %v783_v3 = vpop.permute.xlu2 %782 }
  0xe1   : > { %3960 = vst [vmem:[#allocation55_spill] sm:$0xff] %v2291_v19  ;;  %v2357_v30 = vadd.f32 %v515_v40, %v3979_v36  ;;  %v2360_v48 = vadd.f32 %v516_v32, %v3981_v21  ;;  %v2363_v49 = vadd.f32 %v517_v43, %v3983_v60  ;;  %v2366_v41 = vadd.f32 %v518_v26, %v3985_v28  ;;  %v3997_v23 = vld [vmem:[#allocation70_spill] sm:$0xff]  ;;  %v4004_v32 = vld [vmem:[#allocation3_spill] sm:$0xff]  ;;  %v2398_v26 = vpop.permute.xlu1 %604  ;;  %v4009_v29 = vld [vmem:[#allocation8_spill] sm:$0xff] }
  0xe2   : > { %3961 = vst [vmem:[#allocation56_spill] sm:$0xff] %v2294_v10  ;;  %v2369_v1 = vadd.f32 %v519_v47, %v3987_v51  ;;  %v2372_v53 = vadd.f32 %v520_v11, %v3989_v8  ;;  %v2375_v20 = vadd.f32 %v521_v35, %v3991_v44  ;;  %v2378_v25 = vadd.f32 %v522_v0, %v3993_v22  ;;  %v4003_v18 = vld [vmem:[#allocation2_spill] sm:$0xff]  ;;  %v4005_v47 = vld [vmem:[#allocation4_spill] sm:$0xff]  ;;  %v4006_v35 = vld [vmem:[#allocation5_spill] sm:$0xff] }
  0xe3   : > { %3962 = vst [vmem:[#allocation57_spill] sm:$0xff] %v2297_v7  ;;  %v2381_v46 = vadd.f32 %v523_v62, %v3995_v27  ;;  %v2384_v17 = vadd.f32 %v524_v63, %v3997_v23  ;;  %v2387_v31 = vadd.f32 %v525_v56, %v3999_v15  ;;  %v2390_v38 = vadd.f32 %v526_v52, %v4001_v57  ;;  %v4007_v62 = vld [vmem:[#allocation6_spill] sm:$0xff]  ;;  %v4008_v56 = vld [vmem:[#allocation7_spill] sm:$0xff]  ;;  %v4010_v36 = vld [vmem:[#allocation9_spill] sm:$0xff] }
  0xe4   : > { %3963 = vst [vmem:[#allocation58_spill] sm:$0xff] %v2300_v5  ;;  %v2393_v40 = vperm.slane %v4003_v18, 4  ;;  %v2396_v43 = vperm.slane %v4004_v32, 4  ;;  %v2401_v11 = vperm.slane %v4005_v47, 4  ;;  %v2404_v0 = vperm.slane %v4006_v35, 4  ;;  %v4011_v60 = vld [vmem:[#allocation10_spill] sm:$0xff] }
  0xe5   : > { %3964 = vst [vmem:[#allocation59_spill] sm:$0xff] %v2303_v45  ;;  %v2407_v63 = vperm.slane %v4007_v62, 4  ;;  %v2410_v52 = vperm.slane %v4008_v56, 4  ;;  %v2413_v2 = vperm.slane %v4009_v29, 4  ;;  %v2416_v21 = vperm.slane %v4010_v36, 4  ;;  %v4012_v51 = vld [vmem:[#allocation11_spill] sm:$0xff] }
  0xe6   : > { %3965 = vst [vmem:[#allocation60_spill] sm:$0xff] %v2306_v37  ;;  %v2419_v28 = vperm.slane %v4011_v60, 4  ;;  %v2422_v8 = vperm.slane %v4012_v51, 4  ;;  %v4013_v44 = vld [vmem:[#allocation12_spill] sm:$0xff]  ;;  %v4014_v27 = vld [vmem:[#allocation13_spill] sm:$0xff]  ;;  %v4015_v15 = vld [vmem:[#allocation14_spill] sm:$0xff] }
  0xe7   : > { %3966 = vst [vmem:[#allocation61_spill] sm:$0xff] %v2309_v13  ;;  %v2425_v22 = vperm.slane %v4013_v44, 4  ;;  %v2428_v23 = vperm.slane %v4014_v27, 4  ;;  %v2431_v57 = vperm.slane %v4015_v15, 4  ;;  %v4016_v18 = vld [vmem:[#allocation15_spill] sm:$0xff]  ;;  %v4017_v47 = vld [vmem:[#allocation16_spill] sm:$0xff]  ;;  %v2449_v44 = vmul.f32 %v783_v3, %v2393_v40 }
  0xe8   : > { %3967 = vst [vmem:[#allocation62_spill] sm:$0xff] %v2312_v14  ;;  %v2434_v32 = vperm.slane %v4016_v18, 4  ;;  %v2437_v35 = vperm.slane %v4017_v47, 4  ;;  %v4018_v62 = vld [vmem:[#allocation20_spill] sm:$0xff]  ;;  %v4019_v29 = vld [vmem:[#allocation21_spill] sm:$0xff]  ;;  %v4020_v60 = vld [vmem:[#allocation22_spill] sm:$0xff]  ;;  %v2452_v27 = vmul.f32 %v783_v3, %v2396_v43  ;;  %v2455_v15 = vmul.f32 %v783_v3, %v2401_v11 }
  0xe9   : > { %3968 = vst [vmem:[#allocation65_spill] sm:$0xff] %v2315_v16  ;;  %v2440_v56 = vperm.slane %v4018_v62, 4  ;;  %v2443_v36 = vperm.slane %v4019_v29, 4  ;;  %v2446_v51 = vperm.slane %v4020_v60, 4  ;;  %v2458_v18 = vmul.f32 %v783_v3, %v2404_v0 }
  0xea   : > { %3969 = vst [vmem:[#allocation66_spill] sm:$0xff] %v2318_v12  ;;  %v2461_v47 = vmul.f32 %v783_v3, %v2407_v63  ;;  %v2464_v62 = vmul.f32 %v783_v3, %v2410_v52  ;;  %v2467_v29 = vmul.f32 %v783_v3, %v2413_v2  ;;  %v2470_v60 = vmul.f32 %v783_v3, %v2416_v21 }
  0xeb   : > { %3970 = vst [vmem:[#allocation83_spill] sm:$0xff] %v2339_v9  ;;  %v4063_v9 = vld [vmem:[#allocation19_spill] sm:$0xff] }
  0xec   : > { %3971 = vst [vmem:[#allocation84_spill] sm:$0xff] %v2342_v39 }
  0xed   : > { %3972 = vst [vmem:[#allocation107_spill] sm:$0xff] %v2345_v33  ;;  %v4061_v33 = vld [vmem:[#allocation18_spill] sm:$0xff] }
  0xee   : > { %3974 = vst [vmem:[#allocation96_spill] sm:$0xff] %v2348_v50 }
  0xef   : > { %3976 = vst [vmem:[#allocation97_spill] sm:$0xff] %v2351_v42  ;;  %v4059_v42 = vld [vmem:[#allocation17_spill] sm:$0xff] }
  0xf0   : > { %3978 = vst [vmem:[#allocation98_spill] sm:$0xff] %v2354_v54 }
  0xf1   : > { %3980 = vst [vmem:[#allocation99_spill] sm:$0xff] %v2357_v30  ;;  %v4057_v30 = vld [vmem:[#allocation82_spill] sm:$0xff] }
  0xf2   : > { %3982 = vst [vmem:[#allocation100_spill] sm:$0xff] %v2360_v48 }
  0xf3   : > { %3984 = vst [vmem:[#allocation101_spill] sm:$0xff] %v2363_v49  ;;  %v4055_v49 = vld [vmem:[#allocation81_spill] sm:$0xff] }
  0xf4   : > { %3986 = vst [vmem:[#allocation102_spill] sm:$0xff] %v2366_v41 }
  0xf5   : > { %3988 = vst [vmem:[#allocation63_spill] sm:$0xff] %v2369_v1  ;;  %v4053_v1 = vld [vmem:[#allocation80_spill] sm:$0xff] }
  0xf6   : > { %3990 = vst [vmem:[#allocation64_spill] sm:$0xff] %v2372_v53 }
  0xf7   : > { %3992 = vst [vmem:[#allocation67_spill] sm:$0xff] %v2375_v20  ;;  %v4049_v20 = vld [vmem:[#allocation78_spill] sm:$0xff] }
  0xf8   : > { %3994 = vst [vmem:[#allocation68_spill] sm:$0xff] %v2378_v25  ;;  %v4047_v25 = vld [vmem:[#allocation77_spill] sm:$0xff] }
  0xf9   : > { %3996 = vst [vmem:[#allocation69_spill] sm:$0xff] %v2381_v46  ;;  %v4045_v46 = vld [vmem:[#allocation76_spill] sm:$0xff] }
  0xfa   : > { %3998 = vst [vmem:[#allocation70_spill] sm:$0xff] %v2384_v17  ;;  %v4043_v17 = vld [vmem:[#allocation75_spill] sm:$0xff] }
  0xfb   : > { %4000 = vst [vmem:[#allocation71_spill] sm:$0xff] %v2387_v31  ;;  %v4041_v31 = vld [vmem:[#allocation74_spill] sm:$0xff] }
  0xfc   : > { %4002 = vst [vmem:[#allocation72_spill] sm:$0xff] %v2390_v38  ;;  %v4039_v38 = vld [vmem:[#allocation73_spill] sm:$0xff] }
  0xfd   : > { %4021 = vst [vmem:[#allocation2_spill] sm:$0xff] %v2449_v44  ;;  %v685_v44 = vpop.permute.xlu0 %684 }
  0xfe   : > { %4022 = vst [vmem:[#allocation3_spill] sm:$0xff] %v2452_v27  ;;  %v2473_v27 = vmul.f32 %v783_v3, %v2419_v28  ;;  %v2524_v41 = vmul.f32 %v685_v44, %v4053_v1  ;;  %v2527_v48 = vmul.f32 %v685_v44, %v4055_v49  ;;  %v2530_v54 = vmul.f32 %v685_v44, %v4057_v30 }
  0xff   : > { %4023 = vst [vmem:[#allocation4_spill] sm:$0xff] %v2455_v15  ;;  %v2476_v15 = vmul.f32 %v783_v3, %v2422_v8  ;;  %v2533_v50 = vmul.f32 %v685_v44, %v4059_v42  ;;  %v2536_v39 = vmul.f32 %v685_v44, %v4061_v33 }
 0x100   : > { %4024 = vst [vmem:[#allocation5_spill] sm:$0xff] %v2458_v18  ;;  %v2479_v18 = vmul.f32 %v783_v3, %v2425_v22 }
 0x101   : > { %4025 = vst [vmem:[#allocation6_spill] sm:$0xff] %v2461_v47  ;;  %v2482_v47 = vmul.f32 %v783_v3, %v2428_v23 }
 0x102   : > { %4026 = vst [vmem:[#allocation7_spill] sm:$0xff] %v2464_v62  ;;  %v2485_v62 = vmul.f32 %v783_v3, %v2431_v57 }
 0x103   : > { %4027 = vst [vmem:[#allocation8_spill] sm:$0xff] %v2467_v29  ;;  %v2488_v29 = vmul.f32 %v783_v3, %v2434_v32 }
 0x104   : > { %4028 = vst [vmem:[#allocation9_spill] sm:$0xff] %v2470_v60  ;;  %v2491_v60 = vmul.f32 %v783_v3, %v2437_v35 }
 0x105   : > { %4029 = vst [vmem:[#allocation10_spill] sm:$0xff] %v2473_v27  ;;  %v2494_v27 = vmul.f32 %v783_v3, %v2440_v56 }
 0x106   : > { %4030 = vst [vmem:[#allocation11_spill] sm:$0xff] %v2476_v15  ;;  %v2497_v15 = vmul.f32 %v783_v3, %v2443_v36 }
 0x107   : > { %4031 = vst [vmem:[#allocation12_spill] sm:$0xff] %v2479_v18  ;;  %v2500_v18 = vmul.f32 %v783_v3, %v2446_v51  ;;  %v743_v3 = vpop.permute.xlu1 %742 }
 0x108   : > { %4032 = vst [vmem:[#allocation13_spill] sm:$0xff] %v2482_v47  ;;  %v2503_v47 = vmul.f32 %v685_v44, %v4039_v38  ;;  %v749_v12 = vmul.f32 %v743_v3, %v2407_v63  ;;  %v752_v16 = vmul.f32 %v743_v3, %v2416_v21  ;;  %v755_v14 = vmul.f32 %v743_v3, %v2425_v22 }
 0x109   : > { %4033 = vst [vmem:[#allocation14_spill] sm:$0xff] %v2485_v62  ;;  %v2506_v62 = vmul.f32 %v685_v44, %v4041_v31  ;;  %v756_v13 = vmul.f32 %v743_v3, %v2428_v23  ;;  %v757_v37 = vmul.f32 %v743_v3, %v2431_v57  ;;  %v758_v45 = vmul.f32 %v743_v3, %v2434_v32 }
 0x10a   : > { %4034 = vst [vmem:[#allocation15_spill] sm:$0xff] %v2488_v29  ;;  %v2509_v29 = vmul.f32 %v685_v44, %v4043_v17  ;;  %v759_v5 = vmul.f32 %v743_v3, %v2437_v35  ;;  %v760_v7 = vmul.f32 %v743_v3, %v2440_v56  ;;  %v761_v10 = vmul.f32 %v743_v3, %v2443_v36 }
 0x10b   : > { %4035 = vst [vmem:[#allocation16_spill] sm:$0xff] %v2491_v60  ;;  %v2512_v60 = vmul.f32 %v685_v44, %v4045_v46  ;;  %v762_v19 = vmul.f32 %v743_v3, %v2446_v51 }
 0x10c   : > { %4036 = vst [vmem:[#allocation20_spill] sm:$0xff] %v2494_v27  ;;  %v2515_v27 = vmul.f32 %v685_v44, %v4047_v25 }
 0x10d   : > { %4037 = vst [vmem:[#allocation21_spill] sm:$0xff] %v2497_v15  ;;  %v2518_v15 = vmul.f32 %v685_v44, %v4049_v20 }
 0x10e   : > { %4038 = vst [vmem:[#allocation22_spill] sm:$0xff] %v2500_v18  ;;  %v4051_v18 = vld [vmem:[#allocation79_spill] sm:$0xff] }
 0x10f   : > { %4040 = vst [vmem:[#allocation73_spill] sm:$0xff] %v2503_v47  ;;  %v2521_v53 = vmul.f32 %v685_v44, %v4051_v18  ;;  %v4073_v47 = vld [vmem:[#allocation27_spill] sm:$0xff] }
 0x110   : > { %4042 = vst [vmem:[#allocation74_spill] sm:$0xff] %v2506_v62  ;;  %v4071_v62 = vld [vmem:[#allocation26_spill] sm:$0xff] }
 0x111   : > { %4044 = vst [vmem:[#allocation75_spill] sm:$0xff] %v2509_v29  ;;  %v4069_v29 = vld [vmem:[#allocation25_spill] sm:$0xff] }
 0x112   : > { %4046 = vst [vmem:[#allocation76_spill] sm:$0xff] %v2512_v60  ;;  %v4067_v60 = vld [vmem:[#allocation24_spill] sm:$0xff] }
 0x113   : > { %4048 = vst [vmem:[#allocation77_spill] sm:$0xff] %v2515_v27  ;;  %v4065_v27 = vld [vmem:[#allocation23_spill] sm:$0xff] }
 0x114   : > { %4050 = vst [vmem:[#allocation78_spill] sm:$0xff] %v2518_v15  ;;  %v2539_v15 = vmul.f32 %v685_v44, %v4063_v9 }
 0x115   : > { %4052 = vst [vmem:[#allocation79_spill] sm:$0xff] %v2521_v53  ;;  %v2542_v53 = vmul.f32 %v685_v44, %v4065_v27 }
 0x116   : > { %4054 = vst [vmem:[#allocation80_spill] sm:$0xff] %v2524_v41  ;;  %v2545_v41 = vmul.f32 %v685_v44, %v4067_v60 }
 0x117   : > { %4056 = vst [vmem:[#allocation81_spill] sm:$0xff] %v2527_v48  ;;  %v2548_v48 = vmul.f32 %v685_v44, %v4069_v29 }
 0x118   : > { %4058 = vst [vmem:[#allocation82_spill] sm:$0xff] %v2530_v54  ;;  %v2551_v54 = vmul.f32 %v685_v44, %v4071_v62 }
 0x119   : > { %4060 = vst [vmem:[#allocation17_spill] sm:$0xff] %v2533_v50  ;;  %v2554_v50 = vmul.f32 %v685_v44, %v4073_v47  ;;  %v613_v44 = vmul.f32 %v2398_v26, %v4051_v18  ;;  %v620_v18 = vmul.f32 %v2398_v26, %v4065_v27  ;;  %v748_v27 = vmul.f32 %v743_v3, %v2404_v0 }
 0x11a   : > { %4062 = vst [vmem:[#allocation18_spill] sm:$0xff] %v2536_v39  ;;  %v607_v39 = vmul.f32 %v2398_v26, %v4039_v38  ;;  %v614_v38 = vmul.f32 %v2398_v26, %v4053_v1  ;;  %v621_v1 = vmul.f32 %v2398_v26, %v4067_v60  ;;  %v750_v60 = vmul.f32 %v743_v3, %v2410_v52 }
 0x11b   : > { %4064 = vst [vmem:[#allocation19_spill] sm:$0xff] %v2539_v15  ;;  %v608_v15 = vmul.f32 %v2398_v26, %v4041_v31  ;;  %v615_v31 = vmul.f32 %v2398_v26, %v4055_v49  ;;  %v622_v49 = vmul.f32 %v2398_v26, %v4069_v29  ;;  %v751_v29 = vmul.f32 %v743_v3, %v2413_v2 }
 0x11c   : > { %4066 = vst [vmem:[#allocation23_spill] sm:$0xff] %v2542_v53  ;;  %v609_v53 = vmul.f32 %v2398_v26, %v4043_v17  ;;  %v616_v17 = vmul.f32 %v2398_v26, %v4057_v30  ;;  %v623_v30 = vmul.f32 %v2398_v26, %v4071_v62  ;;  %v753_v62 = vmul.f32 %v743_v3, %v2419_v28 }
 0x11d   : > { %4068 = vst [vmem:[#allocation24_spill] sm:$0xff] %v2545_v41  ;;  %v610_v41 = vmul.f32 %v2398_v26, %v4045_v46  ;;  %v617_v46 = vmul.f32 %v2398_v26, %v4059_v42  ;;  %v624_v42 = vmul.f32 %v2398_v26, %v4073_v47  ;;  %v823_v47 = vpop.permute.xlu1 %822 }
 0x11e   : > { %4070 = vst [vmem:[#allocation25_spill] sm:$0xff] %v2548_v48  ;;  %v611_v48 = vmul.f32 %v2398_v26, %v4047_v25  ;;  %v618_v25 = vmul.f32 %v2398_v26, %v4061_v33  ;;  %v745_v33 = vmul.f32 %v743_v3, %v2393_v40  ;;  %v2611_v55 = vmul.f32 %v823_v47, %v2393_v40 }
 0x11f   : > { %4072 = vst [vmem:[#allocation26_spill] sm:$0xff] %v2551_v54  ;;  %v612_v54 = vmul.f32 %v2398_v26, %v4049_v20  ;;  %v619_v20 = vmul.f32 %v2398_v26, %v4063_v9  ;;  %v747_v9 = vmul.f32 %v743_v3, %v2401_v11  ;;  %v754_v26 = vmul.f32 %v743_v3, %v2422_v8 }
 0x120   : > { %4074 = vst [vmem:[#allocation27_spill] sm:$0xff] %v2554_v50  ;;  %v746_v50 = vmul.f32 %v743_v3, %v2396_v43  ;;  %v2614_v4 = vmul.f32 %v823_v47, %v2396_v43  ;;  %v2617_v59 = vmul.f32 %v823_v47, %v2401_v11  ;;  %v2620_v34 = vmul.f32 %v823_v47, %v2404_v0 }
 0x121   : > { %4075 = vst [vmem:[#allocation108_spill] sm:$0xff] %v2611_v55  ;;  %v2623_v61 = vmul.f32 %v823_v47, %v2407_v63  ;;  %v2626_v6 = vmul.f32 %v823_v47, %v2410_v52  ;;  %v2629_v3 = vmul.f32 %v823_v47, %v2413_v2  ;;  %v2632_v40 = vmul.f32 %v823_v47, %v2416_v21 }
 0x122   : > { %4076 = vst [vmem:[#allocation109_spill] sm:$0xff] %v2614_v4  ;;  %v2635_v43 = vmul.f32 %v823_v47, %v2419_v28  ;;  %v2638_v11 = vmul.f32 %v823_v47, %v2422_v8  ;;  %v2641_v0 = vmul.f32 %v823_v47, %v2425_v22  ;;  %v2644_v63 = vmul.f32 %v823_v47, %v2428_v23 }
 0x123   : > { %4077 = vst [vmem:[#allocation110_spill] sm:$0xff] %v2617_v59  ;;  %v2647_v52 = vmul.f32 %v823_v47, %v2431_v57  ;;  %v2650_v2 = vmul.f32 %v823_v47, %v2434_v32  ;;  %v2653_v21 = vmul.f32 %v823_v47, %v2437_v35  ;;  %v2656_v28 = vmul.f32 %v823_v47, %v2440_v56  ;;  %v4094_v32 = vld [vmem:[#allocation50_spill] sm:$0xff]  ;;  %v4097_v56 = vld [vmem:[#allocation53_spill] sm:$0xff] }
 0x124   : > { %4078 = vst [vmem:[#allocation111_spill] sm:$0xff] %v2620_v34  ;;  %v2659_v8 = vmul.f32 %v823_v47, %v2443_v36  ;;  %v2662_v22 = vmul.f32 %v823_v47, %v2446_v51  ;;  %v625_v23 = vadd.f32 %v607_v39, %v2267_v24  ;;  %v626_v57 = vadd.f32 %v608_v15, %v2270_v58  ;;  %v4100_v51 = vld [vmem:[#allocation56_spill] sm:$0xff]  ;;  %v4102_v39 = vld [vmem:[#allocation58_spill] sm:$0xff]  ;;  %v4103_v15 = vld [vmem:[#allocation59_spill] sm:$0xff] }
 0x125   : > { %4079 = vst [vmem:[#allocation112_spill] sm:$0xff] %v2623_v61  ;;  %v634_v47 = vadd.f32 %v616_v17, %v4100_v51  ;;  %v636_v58 = vadd.f32 %v618_v25, %v4102_v39  ;;  %v2785_v51 = vld [vmem:[%s1506_s21 + $0x58] sm:$0xff] }
 0x126   : > { %4080 = vst [vmem:[#allocation113_spill] sm:$0xff] %v2626_v6 }
 0x127   : > { %4081 = vst [vmem:[#allocation114_spill] sm:$0xff] %v2629_v3 }
 0x128   : > { %4082 = vst [vmem:[#allocation115_spill] sm:$0xff] %v2632_v40 }
 0x129   : > { %4083 = vst [vmem:[#allocation116_spill] sm:$0xff] %v2635_v43  ;;  %v4098_v43 = vld [vmem:[#allocation54_spill] sm:$0xff] }
 0x12a   : > { %4084 = vst [vmem:[#allocation117_spill] sm:$0xff] %v2638_v11  ;;  %v632_v36 = vadd.f32 %v614_v38, %v4098_v43  ;;  %v2682_v43 = vadd.f32 %v745_v33, %v625_v23  ;;  %v2773_v23 = vld [vmem:[%s1506_s21 + $0x48] sm:$0xff] }
 0x12b   : > { %4085 = vst [vmem:[#allocation118_spill] sm:$0xff] %v2641_v0  ;;  %v4095_v0 = vld [vmem:[#allocation51_spill] sm:$0xff] }
 0x12c   : > { %4086 = vst [vmem:[#allocation119_spill] sm:$0xff] %v2644_v63  ;;  %v629_v35 = vadd.f32 %v611_v48, %v4095_v0  ;;  %v4106_v0 = vld [vmem:[#allocation62_spill] sm:$0xff] }
 0x12d   : > { %4087 = vst [vmem:[#allocation120_spill] sm:$0xff] %v2647_v52  ;;  %v4093_v52 = vld [vmem:[#allocation49_spill] sm:$0xff] }
 0x12e   : > { %4088 = vst [vmem:[#allocation121_spill] sm:$0xff] %v2650_v2  ;;  %v627_v63 = vadd.f32 %v609_v53, %v4093_v52  ;;  %v628_v2 = vadd.f32 %v610_v41, %v4094_v32  ;;  %v637_v53 = vadd.f32 %v619_v20, %v4103_v15  ;;  %v4104_v52 = vld [vmem:[#allocation60_spill] sm:$0xff]  ;;  %v4105_v32 = vld [vmem:[#allocation61_spill] sm:$0xff]  ;;  %v2690_v25 = vadd.f32 %v749_v12, %v629_v35 }
 0x12f   : > { %4089 = vst [vmem:[#allocation122_spill] sm:$0xff] %v2653_v21  ;;  %v4096_v21 = vld [vmem:[#allocation52_spill] sm:$0xff]  ;;  %v638_v41 = vadd.f32 %v620_v18, %v4104_v52  ;;  %v639_v48 = vadd.f32 %v621_v1, %v4105_v32  ;;  %v2696_v1 = vadd.f32 %v752_v16, %v632_v36  ;;  %v2809_v32 = vld [vmem:[%s1506_s21 + $0x78] sm:$0xff] }
 0x130   : > { %4090 = vst [vmem:[#allocation123_spill] sm:$0xff] %v2656_v28  ;;  %v630_v11 = vadd.f32 %v612_v54, %v4096_v21  ;;  %v631_v28 = vadd.f32 %v613_v44, %v4097_v56  ;;  %v640_v54 = vadd.f32 %v622_v49, %v4106_v0  ;;  %v4107_v21 = vld [vmem:[#allocation65_spill] sm:$0xff]  ;;  %v4108_v56 = vld [vmem:[#allocation66_spill] sm:$0xff]  ;;  %v2686_v17 = vadd.f32 %v747_v9, %v627_v63  ;;  %v2779_v35 = vld [vmem:[%s1506_s21 + $0x50] sm:$0xff] }
 0x131   : > { %4091 = vst [vmem:[#allocation124_spill] sm:$0xff] %v2659_v8  ;;  %v4099_v8 = vld [vmem:[#allocation55_spill] sm:$0xff]  ;;  %v641_v44 = vadd.f32 %v623_v30, %v4107_v21  ;;  %v642_v38 = vadd.f32 %v624_v42, %v4108_v56  ;;  %v2704_v42 = vadd.f32 %v756_v13, %v636_v58  ;;  %v2706_v12 = vadd.f32 %v757_v37, %v637_v53  ;;  %v881_v53 = vpop.permute.xlu2 %880  ;;  %v2803_v52 = vld [vmem:[%s1506_s21 + $0x70] sm:$0xff]  ;;  %v2815_v0 = vld [vmem:[%s1506_s21 + $0x80] sm:$0xff] }
 0x132   : > { %4092 = vst [vmem:[#allocation125_spill] sm:$0xff] %v2662_v22  ;;  %v633_v40 = vadd.f32 %v615_v31, %v4099_v8  ;;  %v4101_v22 = vld [vmem:[#allocation57_spill] sm:$0xff]  ;;  %v2684_v31 = vadd.f32 %v746_v50, %v626_v57  ;;  %v2692_v20 = vadd.f32 %v750_v60, %v630_v11  ;;  %v2694_v18 = vadd.f32 %v751_v29, %v631_v28  ;;  %v2725_v37 = vld [vmem:[%s1506_s21 + $0x8] sm:$0xff]  ;;  %v2743_v29 = vld [vmem:[%s1506_s21 + $0x20] sm:$0xff] }
 0x133   : > { %v635_v24 = vadd.f32 %v617_v46, %v4101_v22  ;;  %v2688_v46 = vadd.f32 %v748_v27, %v628_v2  ;;  %v2700_v50 = vadd.f32 %v754_v26, %v634_v47  ;;  %v2708_v33 = vadd.f32 %v758_v45, %v638_v41  ;;  %v2731_v45 = vld [vmem:[%s1506_s21 + $0x10] sm:$0xff]  ;;  %v2749_v26 = vld [vmem:[%s1506_s21 + $0x28] sm:$0xff]  ;;  %v2761_v2 = vld [vmem:[%s1506_s21 + $0x38] sm:$0xff]  ;;  %4119 = vst [vmem:[#allocation59_spill] sm:$0xff] %v2773_v23 }
 0x134   : > { %v2698_v49 = vadd.f32 %v753_v62, %v633_v40  ;;  %v2710_v9 = vadd.f32 %v759_v5, %v639_v48  ;;  %v2712_v16 = vadd.f32 %v760_v7, %v640_v54  ;;  %v2714_v27 = vadd.f32 %v761_v10, %v641_v44  ;;  %v2755_v11 = vld [vmem:[%s1506_s21 + $0x30] sm:$0xff]  ;;  %v2767_v8 = vld [vmem:[%s1506_s21 + $0x40] sm:$0xff]  ;;  %4121 = vst [vmem:[#allocation61_spill] sm:$0xff] %v2779_v35  ;;  %v2797_v58 = vld [vmem:[%s1506_s21 + $0x68] sm:$0xff] }
 0x135   : > { %v2702_v30 = vadd.f32 %v755_v14, %v635_v24  ;;  %v2716_v60 = vadd.f32 %v762_v19, %v642_v38  ;;  %v2719_v14 = vld [vmem:[%s1506_s21] sm:$0xff]  ;;  %v2728_v5 = vperm.slane %v2725_v37, 5  ;;  %v2734_v10 = vperm.slane %v2731_v45, 5  ;;  %v2737_v19 = vld [vmem:[%s1506_s21 + $0x18] sm:$0xff]  ;;  %4117 = vst [vmem:[#allocation57_spill] sm:$0xff] %v2767_v8  ;;  %v2821_v21 = vld [vmem:[%s1506_s21 + $0x88] sm:$0xff] }
 0x136   : > { %v2722_v13 = vperm.slane %v2719_v14, 5  ;;  %v2740_v7 = vperm.slane %v2737_v19, 5  ;;  %v2746_v62 = vperm.slane %v2743_v29, 5  ;;  %v2752_v40 = vperm.slane %v2749_v26, 5  ;;  %4123 = vst [vmem:[#allocation65_spill] sm:$0xff] %v2785_v51  ;;  %v2791_v24 = vld [vmem:[%s1506_s21 + $0x60] sm:$0xff] }
 0x137   : > { %4110 = vst [vmem:[#allocation50_spill] sm:$0xff] %v2728_v5  ;;  %v2758_v63 = vperm.slane %v2755_v11, 5  ;;  %v2764_v28 = vperm.slane %v2761_v2, 5  ;;  %v2770_v22 = vperm.slane %v2767_v8, 5  ;;  %v2776_v57 = vperm.slane %v2773_v23, 5 }
 0x138   : > { %4109 = vst [vmem:[#allocation49_spill] sm:$0xff] %v2722_v13  ;;  %v2782_v36 = vperm.slane %v2779_v35, 5  ;;  %v2788_v47 = vperm.slane %v2785_v51, 5  ;;  %v2794_v39 = vperm.slane %v2791_v24, 5  ;;  %v2800_v15 = vperm.slane %v2797_v58, 5 }
 0x139   : > { %4111 = vst [vmem:[#allocation51_spill] sm:$0xff] %v2734_v10  ;;  %v2806_v41 = vperm.slane %v2803_v52, 5  ;;  %v2812_v48 = vperm.slane %v2809_v32, 5  ;;  %v2818_v54 = vperm.slane %v2815_v0, 5  ;;  %v2824_v44 = vperm.slane %v2821_v21, 5 }
 0x13a   : > { %4112 = vst [vmem:[#allocation52_spill] sm:$0xff] %v2740_v7  ;;  %v883_v56 = vmul.f32 %v881_v53, %v2722_v13  ;;  %v884_v38 = vmul.f32 %v881_v53, %v2728_v5  ;;  %v885_v3 = vmul.f32 %v881_v53, %v2734_v10  ;;  %v886_v6 = vmul.f32 %v881_v53, %v2740_v7 }
 0x13b   : > { %4113 = vst [vmem:[#allocation53_spill] sm:$0xff] %v2746_v62  ;;  %v887_v61 = vmul.f32 %v881_v53, %v2746_v62  ;;  %v888_v34 = vmul.f32 %v881_v53, %v2752_v40  ;;  %v889_v59 = vmul.f32 %v881_v53, %v2758_v63  ;;  %v890_v4 = vmul.f32 %v881_v53, %v2764_v28 }
 0x13c   : > { %4114 = vst [vmem:[#allocation54_spill] sm:$0xff] %v2752_v40  ;;  %v891_v55 = vmul.f32 %v881_v53, %v2770_v22  ;;  %v893_v13 = vmul.f32 %v881_v53, %v2782_v36  ;;  %v894_v5 = vmul.f32 %v881_v53, %v2788_v47  ;;  %v895_v10 = vmul.f32 %v881_v53, %v2794_v39 }
 0x13d   : > { %4115 = vst [vmem:[#allocation55_spill] sm:$0xff] %v2758_v63  ;;  %v896_v7 = vmul.f32 %v881_v53, %v2800_v15  ;;  %v897_v62 = vmul.f32 %v881_v53, %v2806_v41  ;;  %v898_v40 = vmul.f32 %v881_v53, %v2812_v48  ;;  %v899_v63 = vmul.f32 %v881_v53, %v2818_v54 }
 0x13e   : > { %4116 = vst [vmem:[#allocation56_spill] sm:$0xff] %v2764_v28  ;;  %v900_v28 = vmul.f32 %v881_v53, %v2824_v44 }
 0x13f   : > { %4118 = vst [vmem:[#allocation58_spill] sm:$0xff] %v2770_v22  ;;  %v901_v22 = vadd.f32 %v883_v56, %v2682_v43  ;;  %v911_v43 = vadd.f32 %v893_v13, %v2702_v30  ;;  %v2887_v30 = vperm.slane %v2767_v8, 6  ;;  %v2911_v13 = vperm.slane %v2815_v0, 6 }
 0x140   : > { %4120 = vst [vmem:[#allocation60_spill] sm:$0xff] %v2776_v57 }
 0x141   : > { %4122 = vst [vmem:[#allocation62_spill] sm:$0xff] %v2782_v36  ;;  %v903_v36 = vadd.f32 %v885_v3, %v2686_v17  ;;  %v913_v3 = vadd.f32 %v895_v10, %v2706_v12  ;;  %v2866_v17 = vperm.slane %v2725_v37, 6  ;;  %v2893_v12 = vperm.slane %v2779_v35, 6 }
 0x142   : > { %4124 = vst [vmem:[#allocation66_spill] sm:$0xff] %v2788_v47  ;;  %v904_v47 = vadd.f32 %v886_v6, %v2688_v46  ;;  %v914_v6 = vadd.f32 %v896_v7, %v2708_v33  ;;  %v2869_v46 = vperm.slane %v2731_v45, 6  ;;  %v2896_v33 = vperm.slane %v2785_v51, 6 }
 0x143   : > { %4125 = vst [vmem:[#allocation126_spill] sm:$0xff] %v2791_v24 }
 0x144   : > { %4126 = vst [vmem:[#allocation127_spill] sm:$0xff] %v2794_v39  ;;  %v905_v39 = vadd.f32 %v887_v61, %v2690_v25  ;;  %v915_v61 = vadd.f32 %v897_v62, %v2710_v9  ;;  %v2872_v25 = vperm.slane %v2737_v19, 6  ;;  %v2899_v9 = vperm.slane %v2791_v24, 6 }
 0x145   : > { %4127 = vst [vmem:[#allocation128_spill] sm:$0xff] %v2797_v58 }
 0x146   : > { %4128 = vst [vmem:[#allocation129_spill] sm:$0xff] %v2800_v15  ;;  %v906_v15 = vadd.f32 %v888_v34, %v2692_v20  ;;  %v916_v34 = vadd.f32 %v898_v40, %v2712_v16  ;;  %v1019_v20 = vpop.permute.xlu2 %1018  ;;  %v2902_v16 = vperm.slane %v2797_v58, 6  ;;  %v2918_v40 = vpop.permute.xlu0 %920 }
 0x147   : > { %4129 = vst [vmem:[#allocation130_spill] sm:$0xff] %v2803_v52  ;;  %v1022_v62 = vmul.f32 %v1019_v20, %v2866_v17 }
 0x148   : > { %4130 = vst [vmem:[#allocation131_spill] sm:$0xff] %v2806_v41  ;;  %v907_v41 = vadd.f32 %v889_v59, %v2694_v18  ;;  %v917_v59 = vadd.f32 %v899_v63, %v2714_v27  ;;  %v2875_v18 = vperm.slane %v2743_v29, 6  ;;  %v2905_v27 = vperm.slane %v2803_v52, 6 }
 0x149   : > { %4131 = vst [vmem:[#allocation132_spill] sm:$0xff] %v2809_v32  ;;  %v1023_v63 = vmul.f32 %v1019_v20, %v2869_v46 }
 0x14a   : > { %4132 = vst [vmem:[#allocation133_spill] sm:$0xff] %v2812_v48  ;;  %v908_v48 = vadd.f32 %v890_v4, %v2696_v1  ;;  %v918_v4 = vadd.f32 %v900_v28, %v2716_v60  ;;  %v2878_v1 = vperm.slane %v2749_v26, 6  ;;  %v2908_v60 = vperm.slane %v2809_v32, 6 }
 0x14b   : > { %4133 = vst [vmem:[#allocation134_spill] sm:$0xff] %v2815_v0  ;;  %v1024_v28 = vmul.f32 %v1019_v20, %v2872_v25  ;;  %v1041_v32 = vadd.f32 %v1023_v63, %v903_v36  ;;  %v2946_v36 = vperm.slane %v2737_v19, 7  ;;  %v4167_v19 = vld [vmem:[#allocation61_spill] sm:$0xff] }
 0x14c   : > { %4134 = vst [vmem:[#allocation135_spill] sm:$0xff] %v2818_v54  ;;  %v909_v54 = vadd.f32 %v891_v55, %v2698_v49  ;;  %v2863_v55 = vperm.slane %v2719_v14, 6  ;;  %v2881_v49 = vperm.slane %v2755_v11, 6  ;;  %v1026_v56 = vmul.f32 %v1019_v20, %v2878_v1 }
 0x14d   : > { %4135 = vst [vmem:[#allocation136_spill] sm:$0xff] %v2821_v21  ;;  %v892_v21 = vmul.f32 %v881_v53, %v2776_v57  ;;  %v902_v57 = vadd.f32 %v884_v38, %v2684_v31  ;;  %v912_v31 = vadd.f32 %v894_v5, %v2704_v42  ;;  %v2890_v42 = vperm.slane %v2773_v23, 6 }
 0x14e   : > { %4136 = vst [vmem:[#allocation137_spill] sm:$0xff] %v2824_v44  ;;  %v1021_v7 = vmul.f32 %v1019_v20, %v2863_v55  ;;  %v1027_v38 = vmul.f32 %v1019_v20, %v2881_v49 }
 0x14f   : > { %v910_v53 = vadd.f32 %v892_v21, %v2700_v50  ;;  %4137 = vst [vmem:[#allocation138_spill] sm:$0xff] %v2863_v55  ;;  %v2884_v50 = vperm.slane %v2761_v2, 6  ;;  %v1025_v21 = vmul.f32 %v1019_v20, %v2875_v18  ;;  %v1030_v55 = vmul.f32 %v1019_v20, %v2890_v42 }
 0x150   : > { %4138 = vst [vmem:[#allocation139_spill] sm:$0xff] %v2866_v17  ;;  %v1031_v17 = vmul.f32 %v1019_v20, %v2893_v12  ;;  %v1039_v0 = vadd.f32 %v1021_v7, %v901_v22  ;;  %v1045_v58 = vadd.f32 %v1027_v38, %v907_v41  ;;  %v2940_v22 = vperm.slane %v2725_v37, 7  ;;  %v4163_v37 = vld [vmem:[#allocation57_spill] sm:$0xff] }
 0x151   : > { %4139 = vst [vmem:[#allocation140_spill] sm:$0xff] %v2869_v46  ;;  %v1028_v44 = vmul.f32 %v1019_v20, %v2884_v50  ;;  %v1033_v46 = vmul.f32 %v1019_v20, %v2899_v9  ;;  %v1043_v52 = vadd.f32 %v1025_v21, %v905_v39  ;;  %v2952_v39 = vperm.slane %v2749_v26, 7  ;;  %v4171_v26 = vld [vmem:[#allocation126_spill] sm:$0xff] }
 0x152   : > { %4140 = vst [vmem:[#allocation141_spill] sm:$0xff] %v2872_v25  ;;  %v1034_v25 = vmul.f32 %v1019_v20, %v2902_v16  ;;  %v1049_v51 = vadd.f32 %v1031_v17, %v911_v43  ;;  %v2955_v41 = vperm.slane %v2755_v11, 7  ;;  %v2973_v43 = vperm.slane %v4171_v26, 7  ;;  %v4173_v11 = vld [vmem:[#allocation128_spill] sm:$0xff] }
 0x153   : > { %4141 = vst [vmem:[#allocation142_spill] sm:$0xff] %v2875_v18  ;;  %v1035_v18 = vmul.f32 %v1019_v20, %v2905_v27  ;;  %v1051_v35 = vadd.f32 %v1033_v46, %v913_v3 }
 0x154   : > { %4142 = vst [vmem:[#allocation143_spill] sm:$0xff] %v2878_v1  ;;  %v4154_v5 = vld [vmem:[#allocation136_spill] sm:$0xff]  ;;  %v1036_v1 = vmul.f32 %v1019_v20, %v2908_v60 }
 0x155   : > { %4143 = vst [vmem:[#allocation144_spill] sm:$0xff] %v2881_v49  ;;  %v2914_v10 = vperm.slane %v4154_v5, 6  ;;  %v1029_v5 = vmul.f32 %v1019_v20, %v2887_v30  ;;  %v1037_v49 = vmul.f32 %v1019_v20, %v2911_v13  ;;  %v1053_v23 = vadd.f32 %v1035_v18, %v915_v61 }
 0x156   : > { %4144 = vst [vmem:[#allocation145_spill] sm:$0xff] %v2884_v50 }
 0x157   : > { %4145 = vst [vmem:[#allocation146_spill] sm:$0xff] %v2887_v30  ;;  %v1038_v50 = vmul.f32 %v1019_v20, %v2914_v10  ;;  %v1040_v30 = vadd.f32 %v1022_v62, %v902_v57  ;;  %v1047_v24 = vadd.f32 %v1029_v5, %v909_v54  ;;  %v1055_v8 = vadd.f32 %v1037_v49, %v917_v59 }
 0x158   : > { %4146 = vst [vmem:[#allocation147_spill] sm:$0xff] %v2890_v42  ;;  %v1042_v42 = vadd.f32 %v1024_v28, %v904_v47  ;;  %v2943_v57 = vperm.slane %v2731_v45, 7  ;;  %v2949_v47 = vperm.slane %v2743_v29, 7  ;;  %v4165_v45 = vld [vmem:[#allocation59_spill] sm:$0xff]  ;;  %v4169_v29 = vld [vmem:[#allocation65_spill] sm:$0xff] }
 0x159   : > { %4147 = vst [vmem:[#allocation148_spill] sm:$0xff] %v2893_v12  ;;  %v1044_v12 = vadd.f32 %v1026_v56, %v906_v15  ;;  %v1157_v15 = vpop.permute.xlu0 %1156  ;;  %v2964_v54 = vperm.slane %v4165_v45, 7 }
 0x15a   : > { %4148 = vst [vmem:[#allocation149_spill] sm:$0xff] %v2896_v33  ;;  %v1160_v46 = vmul.f32 %v1157_v15, %v2940_v22  ;;  %v1162_v18 = vmul.f32 %v1157_v15, %v2946_v36  ;;  %v1164_v49 = vmul.f32 %v1157_v15, %v2952_v39  ;;  %v1171_v28 = vmul.f32 %v1157_v15, %v2973_v43 }
 0x15b   : > { %4149 = vst [vmem:[#allocation150_spill] sm:$0xff] %v2899_v9  ;;  %v1048_v9 = vadd.f32 %v1030_v55, %v910_v53  ;;  %v2970_v53 = vperm.slane %v4169_v29, 7  ;;  %v1168_v62 = vmul.f32 %v1157_v15, %v2964_v54 }
 0x15c   : > { %4150 = vst [vmem:[#allocation151_spill] sm:$0xff] %v2902_v16  ;;  %v3010_v29 = vadd.f32 %v1160_v46, %v1040_v30 }
 0x15d   : > { %4151 = vst [vmem:[#allocation152_spill] sm:$0xff] %v2905_v27  ;;  %v1052_v27 = vadd.f32 %v1034_v25, %v914_v6  ;;  %v4177_v6 = vld [vmem:[#allocation132_spill] sm:$0xff]  ;;  %v1161_v25 = vmul.f32 %v1157_v15, %v2943_v57  ;;  %v1170_v63 = vmul.f32 %v1157_v15, %v2970_v53 }
 0x15e   : > { %4152 = vst [vmem:[#allocation153_spill] sm:$0xff] %v2908_v60  ;;  %v1054_v60 = vadd.f32 %v1036_v1, %v916_v34  ;;  %v2982_v61 = vperm.slane %v4177_v6, 7  ;;  %v4179_v34 = vld [vmem:[#allocation134_spill] sm:$0xff]  ;;  %v1163_v1 = vmul.f32 %v1157_v15, %v2949_v47  ;;  %v3018_v6 = vadd.f32 %v1164_v49, %v1044_v12  ;;  %v4210_v49 = vld [vmem:[#allocation77_spill] sm:$0xff] }
 0x15f   : > { %4153 = vst [vmem:[#allocation154_spill] sm:$0xff] %v2911_v13  ;;  %v1056_v13 = vadd.f32 %v1038_v50, %v918_v4  ;;  %v2985_v59 = vperm.slane %v4179_v34, 7  ;;  %v4181_v4 = vld [vmem:[#allocation136_spill] sm:$0xff]  ;;  %v1165_v50 = vmul.f32 %v1157_v15, %v2955_v41  ;;  %v3012_v26 = vadd.f32 %v1161_v25, %v1041_v32  ;;  %v4206_v25 = vld [vmem:[#allocation75_spill] sm:$0xff] }
 0x160   : > { %4155 = vst [vmem:[#allocation155_spill] sm:$0xff] %v2918_v40  ;;  %v1032_v40 = vmul.f32 %v1019_v20, %v2896_v33  ;;  %v1046_v33 = vadd.f32 %v1028_v44, %v908_v48  ;;  %v2937_v20 = vperm.slane %v2719_v14, 7  ;;  %v2958_v14 = vperm.slane %v2761_v2, 7  ;;  %v4175_v2 = vld [vmem:[#allocation130_spill] sm:$0xff] }
 0x161   : > { %4156 = vst [vmem:[#allocation156_spill] sm:$0xff] %v2940_v22  ;;  %v2961_v48 = vperm.slane %v4163_v37, 7  ;;  %v2967_v44 = vperm.slane %v4167_v19, 7  ;;  %v2979_v3 = vperm.slane %v4175_v2, 7  ;;  %v2988_v55 = vperm.slane %v4181_v4, 7 }
 0x162   : > { %v1050_v16 = vadd.f32 %v1032_v40, %v912_v31  ;;  %4157 = vst [vmem:[#allocation157_spill] sm:$0xff] %v2943_v57  ;;  %v2976_v31 = vperm.slane %v4173_v11, 7  ;;  %v1159_v17 = vmul.f32 %v1157_v15, %v2937_v20  ;;  %v1166_v5 = vmul.f32 %v1157_v15, %v2958_v14 }
 0x163   : > { %4158 = vst [vmem:[#allocation158_spill] sm:$0xff] %v2946_v36  ;;  %v1167_v7 = vmul.f32 %v1157_v15, %v2961_v48  ;;  %v1169_v40 = vmul.f32 %v1157_v15, %v2967_v44  ;;  %v1173_v56 = vmul.f32 %v1157_v15, %v2979_v3  ;;  %v1174_v38 = vmul.f32 %v1157_v15, %v2982_v61 }
 0x164   : > { %4159 = vst [vmem:[#allocation159_spill] sm:$0xff] %v2949_v47  ;;  %v1172_v21 = vmul.f32 %v1157_v15, %v2976_v31  ;;  %v1175_v37 = vmul.f32 %v1157_v15, %v2985_v59  ;;  %v1176_v45 = vmul.f32 %v1157_v15, %v2988_v55  ;;  %v3008_v19 = vadd.f32 %v1159_v17, %v1039_v0  ;;  %v4202_v15 = vld [vmem:[#allocation73_spill] sm:$0xff]  ;;  %v4203_v17 = vld [vmem:[#allocation42_spill] sm:$0xff] }
 0x165   : > { %4160 = vst [vmem:[#allocation160_spill] sm:$0xff] %v2952_v39  ;;  %v3014_v11 = vadd.f32 %v1162_v18, %v1042_v42  ;;  %v3016_v2 = vadd.f32 %v1163_v1, %v1043_v52  ;;  %v3020_v34 = vadd.f32 %v1165_v50, %v1045_v58  ;;  %v3022_v4 = vadd.f32 %v1166_v5, %v1046_v33  ;;  %v4207_v18 = vld [vmem:[#allocation44_spill] sm:$0xff]  ;;  %v4211_v50 = vld [vmem:[#allocation46_spill] sm:$0xff] }
 0x166   : > { %4161 = vst [vmem:[#allocation161_spill] sm:$0xff] %v2955_v41  ;;  %v3028_v0 = vadd.f32 %v1169_v40, %v1049_v51  ;;  %v3030_v30 = vadd.f32 %v1170_v63, %v1050_v16  ;;  %v3032_v32 = vadd.f32 %v1171_v28, %v1051_v35  ;;  %v3034_v42 = vadd.f32 %v1172_v21, %v1052_v27  ;;  %v4204_v51 = vld [vmem:[#allocation74_spill] sm:$0xff]  ;;  %v4205_v16 = vld [vmem:[#allocation43_spill] sm:$0xff]  ;;  %v4208_v27 = vld [vmem:[#allocation76_spill] sm:$0xff] }
 0x167   : > { %4162 = vst [vmem:[#allocation162_spill] sm:$0xff] %v2958_v14  ;;  %v3036_v52 = vadd.f32 %v1173_v56, %v1053_v23  ;;  %v3038_v12 = vadd.f32 %v1174_v38, %v1054_v60  ;;  %v3040_v58 = vadd.f32 %v1175_v37, %v1055_v8  ;;  %v3042_v33 = vadd.f32 %v1176_v45, %v1056_v13  ;;  %v4209_v23 = vld [vmem:[#allocation45_spill] sm:$0xff]  ;;  %v4212_v8 = vld [vmem:[#allocation78_spill] sm:$0xff]  ;;  %v4213_v13 = vld [vmem:[#allocation47_spill] sm:$0xff] }
 0x168   : > { %4164 = vst [vmem:[#allocation57_spill] sm:$0xff] %v2961_v48  ;;  %v706_v46 = vadd.f32 %v4204_v51, %v4203_v17  ;;  %v707_v35 = vadd.f32 %v4206_v25, %v4205_v16  ;;  %v708_v1 = vadd.f32 %v4208_v27, %v4207_v18  ;;  %v709_v60 = vadd.f32 %v4210_v49, %v4209_v23  ;;  %v4215_v40 = vld [vmem:[#allocation85_spill] sm:$0xff]  ;;  %v4216_v63 = vld [vmem:[#allocation80_spill] sm:$0xff]  ;;  %v4217_v21 = vld [vmem:[#allocation86_spill] sm:$0xff] }
 0x169   : > { %4166 = vst [vmem:[#allocation59_spill] sm:$0xff] %v2964_v54  ;;  %v710_v5 = vadd.f32 %v4212_v8, %v4211_v50  ;;  %v712_v28 = vadd.f32 %v4216_v63, %v4215_v40  ;;  %v4218_v56 = vld [vmem:[#allocation81_spill] sm:$0xff]  ;;  %v4219_v37 = vld [vmem:[#allocation87_spill] sm:$0xff]  ;;  %v4220_v45 = vld [vmem:[#allocation82_spill] sm:$0xff] }
 0x16a   : > { %4168 = vst [vmem:[#allocation61_spill] sm:$0xff] %v2967_v44  ;;  %v713_v38 = vadd.f32 %v4218_v56, %v4217_v21  ;;  %v4222_v17 = vld [vmem:[#allocation17_spill] sm:$0xff]  ;;  %v4224_v25 = vld [vmem:[#allocation18_spill] sm:$0xff]  ;;  %v4226_v23 = vld [vmem:[#allocation19_spill] sm:$0xff] }
 0x16b   : > { %4170 = vst [vmem:[#allocation65_spill] sm:$0xff] %v2970_v53  ;;  %v4223_v16 = vld [vmem:[#allocation89_spill] sm:$0xff]  ;;  %v4225_v27 = vld [vmem:[#allocation90_spill] sm:$0xff]  ;;  %v4227_v50 = vld [vmem:[#allocation91_spill] sm:$0xff] }
 0x16c   : > { %4172 = vst [vmem:[#allocation126_spill] sm:$0xff] %v2973_v43  ;;  %v716_v18 = vadd.f32 %v4224_v25, %v4223_v16  ;;  %v717_v49 = vadd.f32 %v4226_v23, %v4225_v27  ;;  %v4228_v8 = vld [vmem:[#allocation23_spill] sm:$0xff]  ;;  %v4230_v40 = vld [vmem:[#allocation24_spill] sm:$0xff]  ;;  %v4232_v21 = vld [vmem:[#allocation25_spill] sm:$0xff]  ;;  %v1099_v43 = vpop.permute.xlu2 %1098 }
 0x16d   : > { %4174 = vst [vmem:[#allocation128_spill] sm:$0xff] %v2976_v31  ;;  %v3024_v31 = vadd.f32 %v1167_v7, %v1047_v24  ;;  %v4201_v24 = vld [vmem:[#allocation41_spill] sm:$0xff]  ;;  %v4214_v7 = vld [vmem:[#allocation79_spill] sm:$0xff]  ;;  %v4239_v27 = vld [vmem:[#allocation110_spill] sm:$0xff] }
 0x16e   : > { %4176 = vst [vmem:[#allocation130_spill] sm:$0xff] %v2979_v3  ;;  %v4238_v25 = vld [vmem:[#allocation109_spill] sm:$0xff]  ;;  %v845_v23 = vadd.f32 %v4239_v27, %v707_v35  ;;  %v4249_v35 = vld [vmem:[#allocation120_spill] sm:$0xff] }
 0x16f   : > { %4178 = vst [vmem:[#allocation132_spill] sm:$0xff] %v2982_v61  ;;  %v855_v27 = vadd.f32 %v4249_v35, %v717_v49  ;;  %v4260_v35 = vld [vmem:[#allocation54_spill] sm:$0xff] }
 0x170   : > { %4180 = vst [vmem:[#allocation134_spill] sm:$0xff] %v2985_v59  ;;  %v3026_v59 = vadd.f32 %v1168_v62, %v1048_v9  ;;  %v705_v9 = vadd.f32 %v4202_v15, %v4201_v24  ;;  %v711_v62 = vadd.f32 %v4214_v7, %v4213_v13  ;;  %v714_v24 = vadd.f32 %v4220_v45, %v4219_v37  ;;  %v4221_v15 = vld [vmem:[#allocation88_spill] sm:$0xff]  ;;  %v4234_v37 = vld [vmem:[#allocation26_spill] sm:$0xff] }
 0x171   : > { %4182 = vst [vmem:[#allocation136_spill] sm:$0xff] %v2988_v55  ;;  %v715_v51 = vadd.f32 %v4222_v17, %v4221_v15  ;;  %v718_v13 = vadd.f32 %v4228_v8, %v4227_v50  ;;  %v4229_v7 = vld [vmem:[#allocation92_spill] sm:$0xff]  ;;  %v4236_v15 = vld [vmem:[#allocation27_spill] sm:$0xff] }
 0x172   : > { %4183 = vst [vmem:[#allocation163_spill] sm:$0xff] %v3008_v19  ;;  %v719_v63 = vadd.f32 %v4230_v40, %v4229_v7  ;;  %v4241_v8 = vld [vmem:[#allocation112_spill] sm:$0xff]  ;;  %v4242_v7 = vld [vmem:[#allocation113_spill] sm:$0xff] }
 0x173   : > { %4184 = vst [vmem:[#allocation164_spill] sm:$0xff] %v3010_v29  ;;  %v848_v40 = vadd.f32 %v4242_v7, %v710_v5  ;;  %v4252_v5 = vld [vmem:[#allocation123_spill] sm:$0xff]  ;;  %v4268_v29 = vld [vmem:[#allocation129_spill] sm:$0xff] }
 0x174   : > { %4185 = vst [vmem:[#allocation165_spill] sm:$0xff] %v3012_v26 }
 0x175   : > { %4186 = vst [vmem:[#allocation166_spill] sm:$0xff] %v3014_v11  ;;  %v4267_v11 = vld [vmem:[#allocation127_spill] sm:$0xff] }
 0x176   : > { %4187 = vst [vmem:[#allocation167_spill] sm:$0xff] %v3016_v2 }
 0x177   : > { %4188 = vst [vmem:[#allocation168_spill] sm:$0xff] %v3018_v6  ;;  %v4266_v6 = vld [vmem:[#allocation66_spill] sm:$0xff] }
 0x178   : > { %4189 = vst [vmem:[#allocation169_spill] sm:$0xff] %v3020_v34 }
 0x179   : > { %4190 = vst [vmem:[#allocation170_spill] sm:$0xff] %v3022_v4  ;;  %v847_v4 = vadd.f32 %v4241_v8, %v709_v60  ;;  %v4251_v60 = vld [vmem:[#allocation122_spill] sm:$0xff] }
 0x17a   : > { %4191 = vst [vmem:[#allocation171_spill] sm:$0xff] %v3024_v31  ;;  %v4240_v31 = vld [vmem:[#allocation111_spill] sm:$0xff]  ;;  %v857_v8 = vadd.f32 %v4251_v60, %v719_v63  ;;  %v4262_v60 = vld [vmem:[#allocation56_spill] sm:$0xff] }
 0x17b   : > { %4192 = vst [vmem:[#allocation172_spill] sm:$0xff] %v3026_v59  ;;  %v844_v59 = vadd.f32 %v4238_v25, %v706_v46  ;;  %v846_v50 = vadd.f32 %v4240_v31, %v708_v1  ;;  %v4248_v46 = vld [vmem:[#allocation119_spill] sm:$0xff]  ;;  %v4250_v31 = vld [vmem:[#allocation121_spill] sm:$0xff] }
 0x17c   : > { %4193 = vst [vmem:[#allocation173_spill] sm:$0xff] %v3028_v0  ;;  %v4237_v0 = vld [vmem:[#allocation108_spill] sm:$0xff]  ;;  %v854_v25 = vadd.f32 %v4248_v46, %v716_v18  ;;  %v856_v1 = vadd.f32 %v4250_v31, %v718_v13  ;;  %v4259_v46 = vld [vmem:[#allocation53_spill] sm:$0xff]  ;;  %v4261_v31 = vld [vmem:[#allocation55_spill] sm:$0xff] }
 0x17d   : > { %4194 = vst [vmem:[#allocation174_spill] sm:$0xff] %v3030_v30  ;;  %v4235_v30 = vld [vmem:[#allocation95_spill] sm:$0xff]  ;;  %v843_v16 = vadd.f32 %v4237_v0, %v705_v9  ;;  %v4247_v0 = vld [vmem:[#allocation118_spill] sm:$0xff] }
 0x17e   : > { %4195 = vst [vmem:[#allocation175_spill] sm:$0xff] %v3032_v32  ;;  %v4233_v32 = vld [vmem:[#allocation94_spill] sm:$0xff]  ;;  %v722_v17 = vadd.f32 %v4236_v15, %v4235_v30  ;;  %v4246_v30 = vld [vmem:[#allocation117_spill] sm:$0xff]  ;;  %v853_v9 = vadd.f32 %v4247_v0, %v715_v51  ;;  %v4258_v0 = vld [vmem:[#allocation52_spill] sm:$0xff] }
 0x17f   : > { %4196 = vst [vmem:[#allocation176_spill] sm:$0xff] %v3034_v42  ;;  %v4231_v42 = vld [vmem:[#allocation93_spill] sm:$0xff]  ;;  %v721_v45 = vadd.f32 %v4234_v37, %v4233_v32  ;;  %v4245_v37 = vld [vmem:[#allocation116_spill] sm:$0xff]  ;;  %v852_v15 = vadd.f32 %v4246_v30, %v714_v24  ;;  %v4257_v30 = vld [vmem:[#allocation51_spill] sm:$0xff] }
 0x180   : > { %4197 = vst [vmem:[#allocation177_spill] sm:$0xff] %v3036_v52  ;;  %v720_v56 = vadd.f32 %v4232_v21, %v4231_v42  ;;  %v4243_v42 = vld [vmem:[#allocation114_spill] sm:$0xff]  ;;  %v4253_v52 = vld [vmem:[#allocation124_spill] sm:$0xff] }
 0x181   : > { %4198 = vst [vmem:[#allocation178_spill] sm:$0xff] %v3038_v12  ;;  %v849_v21 = vadd.f32 %v4243_v42, %v711_v62  ;;  %v851_v12 = vadd.f32 %v4245_v37, %v713_v38  ;;  %v859_v62 = vadd.f32 %v4253_v52, %v721_v45  ;;  %v4254_v42 = vld [vmem:[#allocation125_spill] sm:$0xff]  ;;  %v4256_v37 = vld [vmem:[#allocation50_spill] sm:$0xff]  ;;  %v4264_v45 = vld [vmem:[#allocation60_spill] sm:$0xff] }
 0x182   : > { %4199 = vst [vmem:[#allocation179_spill] sm:$0xff] %v3040_v58  ;;  %v4244_v58 = vld [vmem:[#allocation115_spill] sm:$0xff]  ;;  %v858_v7 = vadd.f32 %v4252_v5, %v720_v56  ;;  %v4263_v5 = vld [vmem:[#allocation58_spill] sm:$0xff] }
 0x183   : > { %4200 = vst [vmem:[#allocation180_spill] sm:$0xff] %v3042_v33  ;;  %v961_v33 = vpop.permute.xlu1 %960  ;;  %v850_v32 = vadd.f32 %v4244_v58, %v712_v28  ;;  %v860_v58 = vadd.f32 %v4254_v42, %v722_v17  ;;  %v4255_v28 = vld [vmem:[#allocation49_spill] sm:$0xff]  ;;  %v4265_v42 = vld [vmem:[#allocation62_spill] sm:$0xff] }
 0x184   : > { %v963_v38 = vmul.f32 %v961_v33, %v4255_v28  ;;  %v964_v24 = vmul.f32 %v961_v33, %v4256_v37  ;;  %v965_v51 = vmul.f32 %v961_v33, %v4257_v30  ;;  %v966_v18 = vmul.f32 %v961_v33, %v4258_v0  ;;  %v4269_v0 = vld [vmem:[#allocation131_spill] sm:$0xff]  ;;  %v4270_v30 = vld [vmem:[#allocation133_spill] sm:$0xff] }
 0x185   : > { %v967_v49 = vmul.f32 %v961_v33, %v4259_v46  ;;  %v968_v13 = vmul.f32 %v961_v33, %v4260_v35  ;;  %v969_v63 = vmul.f32 %v961_v33, %v4261_v31  ;;  %v970_v56 = vmul.f32 %v961_v33, %v4262_v60  ;;  %v4271_v37 = vld [vmem:[#allocation135_spill] sm:$0xff]  ;;  %v4272_v28 = vld [vmem:[#allocation137_spill] sm:$0xff] }
 0x186   : > { %v971_v52 = vmul.f32 %v961_v33, %v4263_v5  ;;  %v972_v17 = vmul.f32 %v961_v33, %v4264_v45  ;;  %v973_v34 = vmul.f32 %v961_v33, %v4265_v42  ;;  %v974_v2 = vmul.f32 %v961_v33, %v4266_v6 }
 0x187   : > { %v975_v26 = vmul.f32 %v961_v33, %v4267_v11  ;;  %v976_v19 = vmul.f32 %v961_v33, %v4268_v29  ;;  %v977_v46 = vmul.f32 %v961_v33, %v4269_v0  ;;  %v978_v35 = vmul.f32 %v961_v33, %v4270_v30 }
 0x188   : > { %v979_v31 = vmul.f32 %v961_v33, %v4271_v37  ;;  %v980_v60 = vmul.f32 %v961_v33, %v4272_v28  ;;  %v981_v55 = vadd.f32 %v963_v38, %v843_v16  ;;  %v982_v5 = vadd.f32 %v964_v24, %v844_v59  ;;  %v4273_v33 = vld [vmem:[#allocation138_spill] sm:$0xff]  ;;  %v4274_v59 = vld [vmem:[#allocation139_spill] sm:$0xff] }
 0x189   : > { %v983_v45 = vadd.f32 %v965_v51, %v845_v23  ;;  %v984_v53 = vadd.f32 %v966_v18, %v846_v50  ;;  %v985_v42 = vadd.f32 %v967_v49, %v847_v4  ;;  %v986_v44 = vadd.f32 %v968_v13, %v848_v40  ;;  %v4275_v23 = vld [vmem:[#allocation140_spill] sm:$0xff]  ;;  %v4276_v4 = vld [vmem:[#allocation141_spill] sm:$0xff]  ;;  %v4285_v24 = vld [vmem:[#allocation150_spill] sm:$0xff] }
 0x18a   : > { %v987_v6 = vadd.f32 %v969_v63, %v849_v21  ;;  %v988_v61 = vadd.f32 %v970_v56, %v850_v32  ;;  %v989_v11 = vadd.f32 %v971_v52, %v851_v12  ;;  %v990_v3 = vadd.f32 %v972_v17, %v852_v15  ;;  %v4277_v21 = vld [vmem:[#allocation142_spill] sm:$0xff]  ;;  %v4278_v12 = vld [vmem:[#allocation143_spill] sm:$0xff]  ;;  %v4287_v49 = vld [vmem:[#allocation152_spill] sm:$0xff] }
 0x18b   : > { %v991_v29 = vadd.f32 %v973_v34, %v853_v9  ;;  %v992_v54 = vadd.f32 %v974_v2, %v854_v25  ;;  %v993_v0 = vadd.f32 %v975_v26, %v855_v27  ;;  %v994_v48 = vadd.f32 %v976_v19, %v856_v1  ;;  %v4279_v34 = vld [vmem:[#allocation144_spill] sm:$0xff]  ;;  %v4280_v26 = vld [vmem:[#allocation145_spill] sm:$0xff]  ;;  %v4281_v9 = vld [vmem:[#allocation146_spill] sm:$0xff] }
 0x18c   : > { %v995_v30 = vadd.f32 %v977_v46, %v857_v8  ;;  %v996_v14 = vadd.f32 %v978_v35, %v858_v7  ;;  %v997_v37 = vadd.f32 %v979_v31, %v859_v62  ;;  %v998_v41 = vadd.f32 %v980_v60, %v860_v58  ;;  %v4282_v27 = vld [vmem:[#allocation147_spill] sm:$0xff]  ;;  %v4283_v8 = vld [vmem:[#allocation148_spill] sm:$0xff]  ;;  %v4284_v62 = vld [vmem:[#allocation149_spill] sm:$0xff] }
 0x18d   : > { %v1101_v16 = vmul.f32 %v1099_v43, %v4273_v33  ;;  %v1102_v38 = vmul.f32 %v1099_v43, %v4274_v59  ;;  %v1103_v50 = vmul.f32 %v1099_v43, %v4275_v23  ;;  %v1104_v40 = vmul.f32 %v1099_v43, %v4276_v4  ;;  %v4286_v18 = vld [vmem:[#allocation151_spill] sm:$0xff]  ;;  %v4288_v13 = vld [vmem:[#allocation153_spill] sm:$0xff]  ;;  %v4289_v63 = vld [vmem:[#allocation154_spill] sm:$0xff] }
 0x18e   : > { %v1105_v32 = vmul.f32 %v1099_v43, %v4277_v21  ;;  %v1106_v15 = vmul.f32 %v1099_v43, %v4278_v12  ;;  %v1107_v2 = vmul.f32 %v1099_v43, %v4279_v34  ;;  %v1108_v19 = vmul.f32 %v1099_v43, %v4280_v26  ;;  %v3134_v34 = vpop.permute.xlu2 %1236 }
 0x18f   : > { %v1109_v25 = vmul.f32 %v1099_v43, %v4281_v9  ;;  %v1110_v1 = vmul.f32 %v1099_v43, %v4282_v27  ;;  %v1111_v7 = vmul.f32 %v1099_v43, %v4283_v8  ;;  %v1112_v58 = vmul.f32 %v1099_v43, %v4284_v62  ;;  %4290 = vst [vmem:[#allocation41_spill] sm:$0xff] %v3134_v34 }
 0x190   : > { %v1113_v51 = vmul.f32 %v1099_v43, %v4285_v24  ;;  %v1114_v46 = vmul.f32 %v1099_v43, %v4286_v18  ;;  %v1115_v35 = vmul.f32 %v1099_v43, %v4287_v49  ;;  %v1116_v31 = vmul.f32 %v1099_v43, %v4288_v13 }
 0x191   : > { %v1117_v60 = vmul.f32 %v1099_v43, %v4289_v63  ;;  %v1118_v56 = vmul.f32 %v1099_v43, %v2914_v10  ;;  %v1119_v52 = vadd.f32 %v1101_v16, %v981_v55  ;;  %v1120_v17 = vadd.f32 %v1102_v38, %v982_v5  ;;  %v4302_v16 = vld [vmem:[#allocation130_spill] sm:$0xff] }
 0x192   : > { %v1121_v9 = vadd.f32 %v1103_v50, %v983_v45  ;;  %v1122_v27 = vadd.f32 %v1104_v40, %v984_v53  ;;  %v1123_v26 = vadd.f32 %v1105_v32, %v985_v42  ;;  %v1124_v8 = vadd.f32 %v1106_v15, %v986_v44  ;;  %v4303_v50 = vld [vmem:[#allocation132_spill] sm:$0xff]  ;;  %v4304_v32 = vld [vmem:[#allocation61_spill] sm:$0xff] }
 0x193   : > { %v1125_v62 = vadd.f32 %v1107_v2, %v987_v6  ;;  %v1126_v24 = vadd.f32 %v1108_v19, %v988_v61  ;;  %v1127_v12 = vadd.f32 %v1109_v25, %v989_v11  ;;  %v3136_v18 = vadd.f32 %v1110_v1, %v990_v3  ;;  %v4298_v11 = vld [vmem:[#allocation162_spill] sm:$0xff]  ;;  %v4306_v2 = vld [vmem:[#allocation65_spill] sm:$0xff] }
 0x194   : > { %v3138_v49 = vadd.f32 %v1111_v7, %v991_v29  ;;  %v3140_v13 = vadd.f32 %v1112_v58, %v992_v54  ;;  %v3142_v63 = vadd.f32 %v1113_v51, %v993_v0  ;;  %v3144_v43 = vadd.f32 %v1114_v46, %v994_v48  ;;  %v4300_v0 = vld [vmem:[#allocation59_spill] sm:$0xff]  ;;  %v4308_v25 = vld [vmem:[#allocation126_spill] sm:$0xff]  ;;  %v4311_v51 = vld [vmem:[#allocation136_spill] sm:$0xff] }
 0x195   : > { %4291 = vst [vmem:[#allocation73_spill] sm:$0xff] %v3136_v18  ;;  %v1133_v55 = vadd.f32 %v1115_v35, %v995_v30  ;;  %v1134_v5 = vadd.f32 %v1116_v31, %v996_v14  ;;  %v1135_v53 = vadd.f32 %v1117_v60, %v997_v37  ;;  %v3146_v45 = vadd.f32 %v1118_v56, %v998_v41  ;;  %v4297_v41 = vld [vmem:[#allocation161_spill] sm:$0xff]  ;;  %v4310_v7 = vld [vmem:[#allocation134_spill] sm:$0xff]  ;;  %v4349_v18 = vld [vmem:[#allocation67_spill] sm:$0xff] }
 0x196   : > { %4292 = vst [vmem:[#allocation42_spill] sm:$0xff] %v3138_v49  ;;  %v1239_v44 = vmul.f32 %v3134_v34, %v2937_v20  ;;  %v1240_v3 = vmul.f32 %v3134_v34, %v2940_v22  ;;  %v1241_v61 = vmul.f32 %v3134_v34, %v2943_v57  ;;  %v1242_v54 = vmul.f32 %v3134_v34, %v2946_v36  ;;  %v4299_v37 = vld [vmem:[#allocation57_spill] sm:$0xff]  ;;  %v4343_v49 = vld [vmem:[#allocation102_spill] sm:$0xff] }
 0x197   : > { %4293 = vst [vmem:[#allocation74_spill] sm:$0xff] %v3140_v13  ;;  %v1243_v48 = vmul.f32 %v3134_v34, %v2949_v47  ;;  %v1244_v14 = vmul.f32 %v3134_v34, %v2952_v39  ;;  %v1245_v29 = vmul.f32 %v3134_v34, %v4297_v41  ;;  %v1246_v6 = vmul.f32 %v3134_v34, %v4298_v11 }
 0x198   : > { %4294 = vst [vmem:[#allocation43_spill] sm:$0xff] %v3142_v63  ;;  %v1247_v30 = vmul.f32 %v3134_v34, %v4299_v37  ;;  %v3168_v42 = vmul.f32 %v3134_v34, %v4300_v0  ;;  %v1253_v38 = vmul.f32 %v3134_v34, %v4302_v16  ;;  %v1254_v40 = vmul.f32 %v3134_v34, %v4303_v50 }
 0x199   : > { %4295 = vst [vmem:[#allocation75_spill] sm:$0xff] %v3144_v43  ;;  %v3176_v15 = vmul.f32 %v3134_v34, %v4304_v32  ;;  %v3180_v19 = vmul.f32 %v3134_v34, %v4306_v2  ;;  %v3184_v1 = vmul.f32 %v3134_v34, %v4308_v25  ;;  %v1255_v58 = vmul.f32 %v3134_v34, %v4310_v7  ;;  %v4394_v25 = vld [vmem:[#allocation131_spill] sm:$0xff]  ;;  %v1059_v2 = vpop.permute.xlu1 %1058 }
 0x19a   : > { %4296 = vst [vmem:[#allocation44_spill] sm:$0xff] %v3146_v45  ;;  %v3190_v46 = vmul.f32 %v3134_v34, %v4311_v51  ;;  %v3192_v35 = vadd.f32 %v1239_v44, %v1119_v52  ;;  %v3194_v31 = vadd.f32 %v1240_v3, %v1120_v17  ;;  %v3196_v60 = vadd.f32 %v1241_v61, %v1121_v9  ;;  %v4325_v9 = vld [vmem:[#allocation83_spill] sm:$0xff]  ;;  %v4326_v44 = vld [vmem:[#allocation28_spill] sm:$0xff] }
 0x19b   : > { %4301 = vst [vmem:[#allocation76_spill] sm:$0xff] %v3168_v42  ;;  %v3198_v56 = vadd.f32 %v1242_v54, %v1122_v27  ;;  %v3200_v43 = vadd.f32 %v1243_v48, %v1123_v26  ;;  %v3202_v63 = vadd.f32 %v1244_v14, %v1124_v8  ;;  %v3208_v13 = vadd.f32 %v1247_v30, %v1127_v12  ;;  %v4327_v3 = vld [vmem:[#allocation84_spill] sm:$0xff]  ;;  %v4328_v26 = vld [vmem:[#allocation29_spill] sm:$0xff]  ;;  %v4329_v8 = vld [vmem:[#allocation107_spill] sm:$0xff] }
 0x19c   : > { %4305 = vst [vmem:[#allocation45_spill] sm:$0xff] %v3176_v15  ;;  %v3210_v15 = vadd.f32 %v1253_v38, %v1133_v55  ;;  %v3212_v52 = vadd.f32 %v1254_v40, %v1134_v5  ;;  %v3214_v17 = vadd.f32 %v1255_v58, %v1135_v53  ;;  %v665_v27 = vadd.f32 %v4326_v44, %v4325_v9  ;;  %v4330_v54 = vld [vmem:[#allocation30_spill] sm:$0xff]  ;;  %v4331_v48 = vld [vmem:[#allocation96_spill] sm:$0xff]  ;;  %v4333_v12 = vld [vmem:[#allocation97_spill] sm:$0xff] }
 0x19d   : > { %4307 = vst [vmem:[#allocation77_spill] sm:$0xff] %v3180_v19  ;;  %v3206_v19 = vadd.f32 %v1246_v6, %v1126_v24  ;;  %v666_v61 = vadd.f32 %v4328_v26, %v4327_v3  ;;  %v4332_v24 = vld [vmem:[#allocation31_spill] sm:$0xff]  ;;  %v4335_v6 = vld [vmem:[#allocation98_spill] sm:$0xff]  ;;  %v4336_v5 = vld [vmem:[#allocation33_spill] sm:$0xff] }
 0x19e   : > { %4309 = vst [vmem:[#allocation46_spill] sm:$0xff] %v3184_v1  ;;  %v3204_v1 = vadd.f32 %v1245_v29, %v1125_v62  ;;  %v667_v62 = vadd.f32 %v4330_v54, %v4329_v8  ;;  %v668_v14 = vadd.f32 %v4332_v24, %v4331_v48  ;;  %v4334_v29 = vld [vmem:[#allocation32_spill] sm:$0xff]  ;;  %v670_v30 = vadd.f32 %v4336_v5, %v4335_v6  ;;  %v4337_v53 = vld [vmem:[#allocation99_spill] sm:$0xff]  ;;  %v4338_v38 = vld [vmem:[#allocation34_spill] sm:$0xff] }
 0x19f   : > { %4312 = vst [vmem:[#allocation78_spill] sm:$0xff] %v3190_v46  ;;  %v669_v55 = vadd.f32 %v4334_v29, %v4333_v12  ;;  %v671_v40 = vadd.f32 %v4338_v38, %v4337_v53  ;;  %v4339_v58 = vld [vmem:[#allocation100_spill] sm:$0xff]  ;;  %v4340_v9 = vld [vmem:[#allocation35_spill] sm:$0xff]  ;;  %v4344_v8 = vld [vmem:[#allocation37_spill] sm:$0xff] }
 0x1a0   : > { %4313 = vst [vmem:[#allocation47_spill] sm:$0xff] %v3192_v35  ;;  %v672_v44 = vadd.f32 %v4340_v9, %v4339_v58  ;;  %v4342_v3 = vld [vmem:[#allocation36_spill] sm:$0xff]  ;;  %v674_v54 = vadd.f32 %v4344_v8, %v4343_v49  ;;  %v4348_v12 = vld [vmem:[#allocation38_spill] sm:$0xff]  ;;  %v4350_v6 = vld [vmem:[#allocation39_spill] sm:$0xff] }
 0x1a1   : > { %4314 = vst [vmem:[#allocation79_spill] sm:$0xff] %v3194_v31  ;;  %v4346_v48 = vld [vmem:[#allocation48_spill] sm:$0xff]  ;;  %v677_v5 = vadd.f32 %v4350_v6, %v4349_v18  ;;  %v4354_v58 = vld [vmem:[#allocation103_spill] sm:$0xff]  ;;  %v4358_v49 = vld [vmem:[#allocation105_spill] sm:$0xff] }
 0x1a2   : > { %4315 = vst [vmem:[#allocation85_spill] sm:$0xff] %v3196_v60  ;;  %v4347_v42 = vld [vmem:[#allocation64_spill] sm:$0xff]  ;;  %v4370_v31 = vld [vmem:[#allocation11_spill] sm:$0xff]  ;;  %v4393_v35 = vld [vmem:[#allocation129_spill] sm:$0xff] }
 0x1a3   : > { %4316 = vst [vmem:[#allocation80_spill] sm:$0xff] %v3198_v56  ;;  %v676_v29 = vadd.f32 %v4348_v12, %v4347_v42  ;;  %v4351_v34 = vld [vmem:[#allocation68_spill] sm:$0xff]  ;;  %v4362_v12 = vld [vmem:[#allocation3_spill] sm:$0xff]  ;;  %v4364_v56 = vld [vmem:[#allocation5_spill] sm:$0xff] }
 0x1a4   : > { %4317 = vst [vmem:[#allocation86_spill] sm:$0xff] %v3200_v43  ;;  %v4352_v53 = vld [vmem:[#allocation40_spill] sm:$0xff]  ;;  %v804_v43 = vadd.f32 %v4362_v12, %v666_v61  ;;  %v4373_v12 = vld [vmem:[#allocation14_spill] sm:$0xff] }
 0x1a5   : > { %4318 = vst [vmem:[#allocation81_spill] sm:$0xff] %v3202_v63  ;;  %v678_v38 = vadd.f32 %v4352_v53, %v4351_v34  ;;  %v4361_v63 = vld [vmem:[#allocation2_spill] sm:$0xff]  ;;  %v4363_v18 = vld [vmem:[#allocation4_spill] sm:$0xff]  ;;  %v806_v34 = vadd.f32 %v4364_v56, %v668_v14 }
 0x1a6   : > { %4319 = vst [vmem:[#allocation87_spill] sm:$0xff] %v3204_v1  ;;  %v4355_v1 = vld [vmem:[#allocation70_spill] sm:$0xff]  ;;  %v803_v42 = vadd.f32 %v4361_v63, %v665_v27  ;;  %v805_v6 = vadd.f32 %v4363_v18, %v667_v62  ;;  %v4367_v45 = vld [vmem:[#allocation8_spill] sm:$0xff]  ;;  %v4372_v27 = vld [vmem:[#allocation13_spill] sm:$0xff]  ;;  %v815_v62 = vadd.f32 %v4373_v12, %v677_v5 }
 0x1a7   : > { %4320 = vst [vmem:[#allocation82_spill] sm:$0xff] %v3206_v19  ;;  %v4345_v19 = vld [vmem:[#allocation63_spill] sm:$0xff]  ;;  %v4365_v53 = vld [vmem:[#allocation6_spill] sm:$0xff]  ;;  %v814_v61 = vadd.f32 %v4372_v27, %v676_v29  ;;  %v4375_v14 = vld [vmem:[#allocation16_spill] sm:$0xff] }
 0x1a8   : > { %4321 = vst [vmem:[#allocation88_spill] sm:$0xff] %v3208_v13  ;;  %v4341_v13 = vld [vmem:[#allocation101_spill] sm:$0xff]  ;;  %v675_v24 = vadd.f32 %v4346_v48, %v4345_v19  ;;  %v4360_v19 = vld [vmem:[#allocation106_spill] sm:$0xff]  ;;  %v807_v46 = vadd.f32 %v4365_v53, %v669_v55  ;;  %v4374_v18 = vld [vmem:[#allocation15_spill] sm:$0xff] }
 0x1a9   : > { %4322 = vst [vmem:[#allocation17_spill] sm:$0xff] %v3210_v15  ;;  %v673_v26 = vadd.f32 %v4342_v3, %v4341_v13  ;;  %v4356_v13 = vld [vmem:[#allocation104_spill] sm:$0xff]  ;;  %v816_v56 = vadd.f32 %v4374_v18, %v678_v38  ;;  %v4386_v27 = vld [vmem:[#allocation55_spill] sm:$0xff] }
 0x1aa   : > { %4323 = vst [vmem:[#allocation89_spill] sm:$0xff] %v3212_v52  ;;  %v680_v3 = vadd.f32 %v4356_v13, %v4355_v1  ;;  %v4357_v52 = vld [vmem:[#allocation71_spill] sm:$0xff]  ;;  %v4359_v15 = vld [vmem:[#allocation72_spill] sm:$0xff]  ;;  %v809_v1 = vadd.f32 %v4367_v45, %v671_v40  ;;  %v4368_v13 = vld [vmem:[#allocation9_spill] sm:$0xff] }
 0x1ab   : > { %4324 = vst [vmem:[#allocation18_spill] sm:$0xff] %v3214_v17  ;;  %v4353_v17 = vld [vmem:[#allocation69_spill] sm:$0xff]  ;;  %v681_v8 = vadd.f32 %v4358_v49, %v4357_v52  ;;  %v682_v48 = vadd.f32 %v4360_v19, %v4359_v15  ;;  %v810_v60 = vadd.f32 %v4368_v13, %v672_v44  ;;  %v4369_v52 = vld [vmem:[#allocation10_spill] sm:$0xff]  ;;  %v812_v15 = vadd.f32 %v4370_v31, %v674_v54  ;;  %v4371_v19 = vld [vmem:[#allocation12_spill] sm:$0xff] }
 0x1ac   : > { %v679_v9 = vadd.f32 %v4354_v58, %v4353_v17  ;;  %v4366_v17 = vld [vmem:[#allocation7_spill] sm:$0xff]  ;;  %v811_v49 = vadd.f32 %v4369_v52, %v673_v26  ;;  %v813_v63 = vadd.f32 %v4371_v19, %v675_v24  ;;  %v4376_v53 = vld [vmem:[#allocation20_spill] sm:$0xff]  ;;  %v4378_v40 = vld [vmem:[#allocation22_spill] sm:$0xff] }
 0x1ad   : > { %v808_v58 = vadd.f32 %v4366_v17, %v670_v30  ;;  %v818_v30 = vadd.f32 %v4376_v53, %v680_v3  ;;  %v4377_v17 = vld [vmem:[#allocation21_spill] sm:$0xff]  ;;  %v820_v44 = vadd.f32 %v4378_v40, %v682_v48  ;;  %v4380_v26 = vld [vmem:[#allocation155_spill] sm:$0xff]  ;;  %v4381_v31 = vld [vmem:[#allocation50_spill] sm:$0xff] }
 0x1ae   : > { %v817_v55 = vadd.f32 %v4375_v14, %v679_v9  ;;  %v819_v45 = vadd.f32 %v4377_v17, %v681_v8  ;;  %v4379_v13 = vld [vmem:[#allocation49_spill] sm:$0xff]  ;;  %v924_v54 = vmul.f32 %v4380_v26, %v4381_v31  ;;  %v4382_v24 = vld [vmem:[#allocation51_spill] sm:$0xff]  ;;  %v4383_v5 = vld [vmem:[#allocation52_spill] sm:$0xff]  ;;  %v929_v48 = vmul.f32 %v4380_v26, %v4386_v27 }
 0x1af   : > { %v923_v52 = vmul.f32 %v4380_v26, %v4379_v13  ;;  %v925_v29 = vmul.f32 %v4380_v26, %v4382_v24  ;;  %v926_v38 = vmul.f32 %v4380_v26, %v4383_v5  ;;  %v4384_v19 = vld [vmem:[#allocation53_spill] sm:$0xff]  ;;  %v4385_v3 = vld [vmem:[#allocation54_spill] sm:$0xff]  ;;  %v4387_v12 = vld [vmem:[#allocation56_spill] sm:$0xff]  ;;  %v936_v27 = vmul.f32 %v4380_v26, %v4393_v35 }
 0x1b0   : > { %v927_v9 = vmul.f32 %v4380_v26, %v4384_v19  ;;  %v928_v8 = vmul.f32 %v4380_v26, %v4385_v3  ;;  %v930_v18 = vmul.f32 %v4380_v26, %v4387_v12  ;;  %v4388_v14 = vld [vmem:[#allocation58_spill] sm:$0xff]  ;;  %v4389_v17 = vld [vmem:[#allocation60_spill] sm:$0xff]  ;;  %v4392_v19 = vld [vmem:[#allocation127_spill] sm:$0xff]  ;;  %v937_v12 = vmul.f32 %v4380_v26, %v4394_v25 }
 0x1b1   : > { %v931_v53 = vmul.f32 %v4380_v26, %v4388_v14  ;;  %v932_v40 = vmul.f32 %v4380_v26, %v4389_v17  ;;  %v4390_v13 = vld [vmem:[#allocation62_spill] sm:$0xff]  ;;  %v935_v3 = vmul.f32 %v4380_v26, %v4392_v19  ;;  %v4395_v14 = vld [vmem:[#allocation133_spill] sm:$0xff]  ;;  %v4396_v17 = vld [vmem:[#allocation135_spill] sm:$0xff]  ;;  %v942_v37 = vadd.f32 %v924_v54, %v804_v43 }
 0x1b2   : > { %v933_v31 = vmul.f32 %v4380_v26, %v4390_v13  ;;  %v4391_v24 = vld [vmem:[#allocation66_spill] sm:$0xff]  ;;  %v938_v32 = vmul.f32 %v4380_v26, %v4395_v14  ;;  %v939_v0 = vmul.f32 %v4380_v26, %v4396_v17  ;;  %v940_v13 = vmul.f32 %v4380_v26, %v4272_v28 }
 0x1b3   : > { %v934_v5 = vmul.f32 %v4380_v26, %v4391_v24  ;;  %v941_v24 = vadd.f32 %v923_v52, %v803_v42  ;;  %v943_v51 = vadd.f32 %v925_v29, %v805_v6  ;;  %v944_v19 = vadd.f32 %v926_v38, %v806_v34  ;;  %v4397_v6 = vld [vmem:[#allocation143_spill] sm:$0xff]  ;;  %v4408_v52 = vld [vmem:[#allocation154_spill] sm:$0xff] }
 0x1b4   : > { %v945_v7 = vadd.f32 %v927_v9, %v807_v46  ;;  %v946_v50 = vadd.f32 %v928_v8, %v808_v58  ;;  %v947_v35 = vadd.f32 %v929_v48, %v809_v1  ;;  %v948_v16 = vadd.f32 %v930_v18, %v810_v60  ;;  %v4398_v58 = vld [vmem:[#allocation144_spill] sm:$0xff]  ;;  %v1197_v9 = vpop.permute.xlu1 %1196 }
 0x1b5   : > { %v949_v11 = vadd.f32 %v931_v53, %v811_v49  ;;  %v950_v25 = vadd.f32 %v932_v40, %v812_v15  ;;  %v951_v41 = vadd.f32 %v933_v31, %v813_v63  ;;  %v952_v39 = vadd.f32 %v934_v5, %v814_v61  ;;  %v4399_v49 = vld [vmem:[#allocation145_spill] sm:$0xff]  ;;  %v4400_v63 = vld [vmem:[#allocation146_spill] sm:$0xff] }
 0x1b6   : > { %v953_v47 = vadd.f32 %v935_v3, %v815_v62  ;;  %v954_v14 = vadd.f32 %v936_v27, %v816_v56  ;;  %v955_v36 = vadd.f32 %v937_v12, %v817_v55  ;;  %v956_v57 = vadd.f32 %v938_v32, %v818_v30  ;;  %v4402_v62 = vld [vmem:[#allocation148_spill] sm:$0xff]  ;;  %v4403_v56 = vld [vmem:[#allocation149_spill] sm:$0xff]  ;;  %v4404_v55 = vld [vmem:[#allocation150_spill] sm:$0xff] }
 0x1b7   : > { %v957_v17 = vadd.f32 %v939_v0, %v819_v45  ;;  %v958_v22 = vadd.f32 %v940_v13, %v820_v44  ;;  %v1061_v28 = vmul.f32 %v1059_v2, %v4273_v33  ;;  %v1062_v43 = vmul.f32 %v1059_v2, %v4274_v59  ;;  %v4401_v0 = vld [vmem:[#allocation147_spill] sm:$0xff]  ;;  %v4406_v45 = vld [vmem:[#allocation152_spill] sm:$0xff]  ;;  %v4407_v44 = vld [vmem:[#allocation153_spill] sm:$0xff] }
 0x1b8   : > { %v1063_v42 = vmul.f32 %v1059_v2, %v4275_v23  ;;  %v1064_v46 = vmul.f32 %v1059_v2, %v4276_v4  ;;  %v1065_v60 = vmul.f32 %v1059_v2, %v4277_v21  ;;  %v1066_v34 = vmul.f32 %v1059_v2, %v4397_v6  ;;  %v4405_v30 = vld [vmem:[#allocation151_spill] sm:$0xff] }
 0x1b9   : > { %v1067_v1 = vmul.f32 %v1059_v2, %v4398_v58  ;;  %v1068_v15 = vmul.f32 %v1059_v2, %v4399_v49  ;;  %v1069_v32 = vmul.f32 %v1059_v2, %v4400_v63  ;;  %v1070_v61 = vmul.f32 %v1059_v2, %v4401_v0  ;;  %v4409_v63 = vld [vmem:[#allocation156_spill] sm:$0xff] }
 0x1ba   : > { %v1071_v33 = vmul.f32 %v1059_v2, %v4402_v62  ;;  %v1072_v59 = vmul.f32 %v1059_v2, %v4403_v56  ;;  %v1073_v23 = vmul.f32 %v1059_v2, %v4404_v55  ;;  %v1074_v4 = vmul.f32 %v1059_v2, %v4405_v30  ;;  %v4422_v62 = vld [vmem:[#allocation61_spill] sm:$0xff] }
 0x1bb   : > { %v1075_v21 = vmul.f32 %v1059_v2, %v4406_v45  ;;  %v1076_v26 = vmul.f32 %v1059_v2, %v4407_v44  ;;  %v1077_v54 = vmul.f32 %v1059_v2, %v4408_v52  ;;  %v1078_v29 = vmul.f32 %v1059_v2, %v2914_v10  ;;  %v4410_v10 = vld [vmem:[#allocation157_spill] sm:$0xff] }
 0x1bc   : > { %v1079_v38 = vadd.f32 %v1061_v28, %v941_v24  ;;  %v1080_v8 = vadd.f32 %v1062_v43, %v942_v37  ;;  %v1081_v48 = vadd.f32 %v1063_v42, %v943_v51  ;;  %v1082_v18 = vadd.f32 %v1064_v46, %v944_v19  ;;  %v4411_v19 = vld [vmem:[#allocation158_spill] sm:$0xff]  ;;  %v4417_v43 = vld [vmem:[#allocation132_spill] sm:$0xff] }
 0x1bd   : > { %v1083_v53 = vadd.f32 %v1065_v60, %v945_v7  ;;  %v1084_v40 = vadd.f32 %v1066_v34, %v946_v50  ;;  %v1085_v31 = vadd.f32 %v1067_v1, %v947_v35  ;;  %v1086_v5 = vadd.f32 %v1068_v15, %v948_v16  ;;  %v4412_v35 = vld [vmem:[#allocation159_spill] sm:$0xff]  ;;  %v4416_v28 = vld [vmem:[#allocation130_spill] sm:$0xff] }
 0x1be   : > { %v1087_v3 = vadd.f32 %v1069_v32, %v949_v11  ;;  %v1088_v27 = vadd.f32 %v1070_v61, %v950_v25  ;;  %v1089_v12 = vadd.f32 %v1071_v33, %v951_v41  ;;  %v1090_v13 = vadd.f32 %v1072_v59, %v952_v39  ;;  %v4413_v11 = vld [vmem:[#allocation160_spill] sm:$0xff]  ;;  %v4414_v41 = vld [vmem:[#allocation161_spill] sm:$0xff]  ;;  %v4418_v46 = vld [vmem:[#allocation134_spill] sm:$0xff] }
 0x1bf   : > { %v1091_v6 = vadd.f32 %v1073_v23, %v953_v47  ;;  %v1092_v58 = vadd.f32 %v1074_v4, %v954_v14  ;;  %v1199_v49 = vmul.f32 %v1197_v9, %v2937_v20  ;;  %v1200_v0 = vmul.f32 %v1197_v9, %v4409_v63  ;;  %v4415_v47 = vld [vmem:[#allocation162_spill] sm:$0xff]  ;;  %v4421_v32 = vld [vmem:[#allocation59_spill] sm:$0xff]  ;;  %v4423_v59 = vld [vmem:[#allocation65_spill] sm:$0xff] }
 0x1c0   : > { %v1201_v2 = vmul.f32 %v1197_v9, %v4410_v10  ;;  %v1093_v24 = vadd.f32 %v1075_v21, %v955_v36  ;;  %v1094_v37 = vadd.f32 %v1076_v26, %v956_v57  ;;  %v1095_v51 = vadd.f32 %v1077_v54, %v957_v17  ;;  %v4419_v36 = vld [vmem:[#allocation136_spill] sm:$0xff]  ;;  %v4424_v23 = vld [vmem:[#allocation126_spill] sm:$0xff] }
 0x1c1   : > { %v1202_v7 = vmul.f32 %v1197_v9, %v4411_v19  ;;  %v1096_v50 = vadd.f32 %v1078_v29, %v958_v22  ;;  %v1203_v16 = vmul.f32 %v1197_v9, %v4412_v35  ;;  %v1204_v25 = vmul.f32 %v1197_v9, %v4413_v11  ;;  %v4420_v22 = vld [vmem:[#allocation57_spill] sm:$0xff]  ;;  %v4425_v29 = vld [vmem:[#allocation163_spill] sm:$0xff]  ;;  %v4429_v19 = vld [vmem:[#allocation166_spill] sm:$0xff] }
 0x1c2   : > { %v1205_v39 = vmul.f32 %v1197_v9, %v4414_v41  ;;  %v1206_v14 = vmul.f32 %v1197_v9, %v4415_v47  ;;  %v1213_v20 = vmul.f32 %v1197_v9, %v4416_v28  ;;  %v1214_v42 = vmul.f32 %v1197_v9, %v4417_v43  ;;  %v4435_v11 = vld [vmem:[#allocation179_spill] sm:$0xff]  ;;  %v4439_v28 = vld [vmem:[#allocation85_spill] sm:$0xff]  ;;  %v4440_v43 = vld [vmem:[#allocation44_spill] sm:$0xff] }
 0x1c3   : > { %v1215_v60 = vmul.f32 %v1197_v9, %v4418_v46  ;;  %v1216_v57 = vmul.f32 %v1197_v9, %v4419_v36  ;;  %v1217_v17 = vadd.f32 %v1199_v49, %v1079_v38  ;;  %v1218_v34 = vadd.f32 %v1200_v0, %v1080_v8  ;;  %v4426_v8 = vld [vmem:[#allocation164_spill] sm:$0xff]  ;;  %v4427_v49 = vld [vmem:[#allocation165_spill] sm:$0xff]  ;;  %v4437_v41 = vld [vmem:[#allocation47_spill] sm:$0xff] }
 0x1c4   : > { %v1219_v1 = vadd.f32 %v1201_v2, %v1081_v48  ;;  %v1207_v15 = vmul.f32 %v1197_v9, %v4420_v22  ;;  %v1208_v61 = vmul.f32 %v1197_v9, %v4421_v32  ;;  %v1209_v33 = vmul.f32 %v1197_v9, %v4422_v62  ;;  %v4428_v0 = vld [vmem:[#allocation128_spill] sm:$0xff]  ;;  %v4438_v47 = vld [vmem:[#allocation79_spill] sm:$0xff]  ;;  %v4442_v36 = vld [vmem:[#allocation170_spill] sm:$0xff] }
 0x1c5   : > { %v1220_v56 = vadd.f32 %v1202_v7, %v1082_v18  ;;  %v1210_v55 = vmul.f32 %v1197_v9, %v4423_v59  ;;  %v1211_v30 = vmul.f32 %v1197_v9, %v4424_v23  ;;  %v1221_v4 = vadd.f32 %v1203_v16, %v1083_v53  ;;  %v4433_v16 = vld [vmem:[#allocation177_spill] sm:$0xff] }
 0x1c6   : > { %v1222_v45 = vadd.f32 %v1204_v25, %v1084_v40  ;;  %v1223_v21 = vadd.f32 %v1205_v39, %v1085_v31  ;;  %v1231_v44 = vadd.f32 %v1213_v20, %v1093_v24  ;;  %v1232_v26 = vadd.f32 %v1214_v42, %v1094_v37  ;;  %v4430_v31 = vld [vmem:[#allocation167_spill] sm:$0xff]  ;;  %v4431_v24 = vld [vmem:[#allocation168_spill] sm:$0xff]  ;;  %v4441_v42 = vld [vmem:[#allocation78_spill] sm:$0xff] }
 0x1c7   : > { %v1233_v52 = vadd.f32 %v1215_v60, %v1095_v51  ;;  %v1234_v54 = vadd.f32 %v1216_v57, %v1096_v50  ;;  %v1275_v38 = vmul.f32 %v1217_v17, %v4425_v29  ;;  %v1276_v48 = vmul.f32 %v1218_v34, %v4426_v8  ;;  %v4432_v51 = vld [vmem:[#allocation169_spill] sm:$0xff]  ;;  %v4443_v17 = vld [vmem:[#allocation80_spill] sm:$0xff] }
 0x1c8   : > { %v1277_v63 = vmul.f32 %v1219_v1, %v4427_v49  ;;  %v1212_v18 = vmul.f32 %v1197_v9, %v4428_v0  ;;  %v1224_v10 = vadd.f32 %v1206_v14, %v1086_v5  ;;  %v1225_v2 = vadd.f32 %v1207_v15, %v1087_v3  ;;  %v4434_v5 = vld [vmem:[#allocation178_spill] sm:$0xff]  ;;  %v4444_v15 = vld [vmem:[#allocation171_spill] sm:$0xff]  ;;  %v4447_v59 = vld [vmem:[#allocation81_spill] sm:$0xff] }
 0x1c9   : > { %v1278_v7 = vmul.f32 %v1220_v56, %v4429_v19  ;;  %v1226_v53 = vadd.f32 %v1208_v61, %v1088_v27  ;;  %v1227_v40 = vadd.f32 %v1209_v33, %v1089_v12  ;;  %v1279_v35 = vmul.f32 %v1221_v4, %v4430_v31  ;;  %v4436_v12 = vld [vmem:[#allocation180_spill] sm:$0xff]  ;;  %v4445_v61 = vld [vmem:[#allocation86_spill] sm:$0xff]  ;;  %v4448_v4 = vld [vmem:[#allocation17_spill] sm:$0xff] }
 0x1ca   : > { %v1280_v37 = vmul.f32 %v1222_v45, %v4431_v24  ;;  %v1281_v50 = vmul.f32 %v1223_v21, %v4432_v51  ;;  %v1289_v9 = vmul.f32 %v1231_v44, %v4433_v16  ;;  %v1290_v3 = vmul.f32 %v1232_v26, %v4434_v5  ;;  %v4446_v33 = vld [vmem:[#allocation172_spill] sm:$0xff]  ;;  %v4450_v21 = vld [vmem:[#allocation173_spill] sm:$0xff]  ;;  %v4456_v49 = vld [vmem:[#allocation174_spill] sm:$0xff] }
 0x1cb   : > { %v1291_v27 = vmul.f32 %v1233_v52, %v4435_v11  ;;  %v1292_v25 = vmul.f32 %v1234_v54, %v4436_v12  ;;  %v1293_v39 = vadd.f32 %v1275_v38, %v4437_v41  ;;  %v1294_v14 = vadd.f32 %v1276_v48, %v4438_v47  ;;  %v4453_v54 = vld [vmem:[#allocation41_spill] sm:$0xff]  ;;  %v4455_v8 = vld [vmem:[#allocation76_spill] sm:$0xff]  ;;  %v4466_v5 = vld [vmem:[#allocation46_spill] sm:$0xff] }
 0x1cc   : > { %v1295_v20 = vadd.f32 %v1277_v63, %v4439_v28  ;;  %v1274_v46 = vadd.f32 %v4441_v42, %v4440_v43  ;;  %v1228_v60 = vadd.f32 %v1210_v55, %v1090_v13  ;;  %v1282_v57 = vmul.f32 %v1224_v10, %v4442_v36  ;;  %v4449_v13 = vld [vmem:[#allocation89_spill] sm:$0xff]  ;;  %v4461_v31 = vld [vmem:[#allocation88_spill] sm:$0xff] }
 0x1cd   : > { %v1296_v34 = vadd.f32 %v1278_v7, %v4443_v17  ;;  %v1229_v1 = vadd.f32 %v1211_v30, %v1091_v6  ;;  %v1230_v22 = vadd.f32 %v1212_v18, %v1092_v58  ;;  %v1283_v32 = vmul.f32 %v1225_v2, %v4444_v15  ;;  %1311 = vst [vmem:[%s3353_s24] sm:$0xff] %v1293_v39  ;;  %v4451_v6 = vld [vmem:[#allocation87_spill] sm:$0xff]  ;;  %v4452_v30 = vld [vmem:[#allocation18_spill] sm:$0xff]  ;;  %v4454_v38 = vld [vmem:[#allocation73_spill] sm:$0xff] }
 0x1ce   : > { %v1297_v62 = vadd.f32 %v1279_v35, %v4445_v61  ;;  %v1284_v56 = vmul.f32 %v1226_v53, %v4446_v33  ;;  %v1298_v23 = vadd.f32 %v1280_v37, %v4447_v59  ;;  %v1307_v45 = vadd.f32 %v1289_v9, %v4448_v4  ;;  %1312 = vst [vmem:[%s3353_s24 + $0x8] sm:$0xff] %v1294_v14  ;;  %v4457_v18 = vld [vmem:[#allocation82_spill] sm:$0xff]  ;;  %v4459_v19 = vld [vmem:[#allocation45_spill] sm:$0xff]  ;;  %v4460_v53 = vld [vmem:[#allocation175_spill] sm:$0xff] }
 0x1cf   : > { %v1308_v55 = vadd.f32 %v1290_v3, %v4449_v13  ;;  %v1285_v44 = vmul.f32 %v1227_v40, %v4450_v21  ;;  %v1299_v58 = vadd.f32 %v1281_v50, %v4451_v6  ;;  %v1309_v26 = vadd.f32 %v1291_v27, %v4452_v30  ;;  %1313 = vst [vmem:[%s3353_s24 + $0x10] sm:$0xff] %v1295_v20  ;;  %v4458_v2 = vld [vmem:[#allocation42_spill] sm:$0xff]  ;;  %v4463_v24 = vld [vmem:[#allocation77_spill] sm:$0xff]  ;;  %v4464_v51 = vld [vmem:[#allocation176_spill] sm:$0xff] }
 0x1d0   : > { %v1310_v52 = vadd.f32 %v1292_v25, %v1274_v46  ;;  %v1252_v29 = vmul.f32 %v4453_v54, %v4428_v0  ;;  %v1266_v48 = vadd.f32 %v4455_v8, %v4454_v38  ;;  %v1286_v63 = vmul.f32 %v1228_v60, %v4456_v49  ;;  %1314 = vst [vmem:[%s3353_s24 + $0x18] sm:$0xff] %v1296_v34  ;;  %v4462_v0 = vld [vmem:[#allocation74_spill] sm:$0xff]  ;;  %v4465_v9 = vld [vmem:[#allocation43_spill] sm:$0xff] }
 0x1d1   : > { %v1300_v10 = vadd.f32 %v1282_v57, %v4457_v18  ;;  %v1267_v7 = vadd.f32 %v4459_v19, %v4458_v2  ;;  %v1287_v40 = vmul.f32 %v1229_v1, %v4460_v53  ;;  %v1301_v35 = vadd.f32 %v1283_v32, %v4461_v31  ;;  %1315 = vst [vmem:[%s3353_s24 + $0x20] sm:$0xff] %v1297_v62  ;;  %v4467_v27 = vld [vmem:[#allocation75_spill] sm:$0xff] }
 0x1d2   : > { %v1268_v37 = vadd.f32 %v4463_v24, %v4462_v0  ;;  %v1288_v50 = vmul.f32 %v1230_v22, %v4464_v51  ;;  %v1302_v16 = vadd.f32 %v1284_v56, %v1266_v48  ;;  %1316 = vst [vmem:[%s3353_s24 + $0x28] sm:$0xff] %v1298_v23  ;;  %v1269_v3 = vadd.f32 %v4466_v5, %v4465_v9 }
 0x1d3   : > { %v1303_v11 = vadd.f32 %v1285_v44, %v1267_v7  ;;  %1317 = vst [vmem:[%s3353_s24 + $0x30] sm:$0xff] %v1299_v58  ;;  %v1270_v12 = vadd.f32 %v1252_v29, %v4467_v27 }
 0x1d4   : > { %v1304_v25 = vadd.f32 %v1286_v63, %v1268_v37  ;;  %1318 = vst [vmem:[%s3353_s24 + $0x38] sm:$0xff] %v1300_v10  ;;  %v1305_v41 = vadd.f32 %v1287_v40, %v1269_v3 }
 0x1d5   : > { %1319 = vst [vmem:[%s3353_s24 + $0x40] sm:$0xff] %v1301_v35  ;;  %v1306_v39 = vadd.f32 %v1288_v50, %v1270_v12 }
 0x1d6   : > { %1320 = vst [vmem:[%s3353_s24 + $0x48] sm:$0xff] %v1302_v16 }
 0x1d7   : > { %1321 = vst [vmem:[%s3353_s24 + $0x50] sm:$0xff] %v1303_v11 }
 0x1d8   : > { %1322 = vst [vmem:[%s3353_s24 + $0x58] sm:$0xff] %v1304_v25 }
 0x1d9   : > { %1323 = vst [vmem:[%s3353_s24 + $0x60] sm:$0xff] %v1305_v41 }
 0x1da   : > { %1324 = vst [vmem:[%s3353_s24 + $0x68] sm:$0xff] %v1306_v39 }
 0x1db   : > { %1325 = vst [vmem:[%s3353_s24 + $0x70] sm:$0xff] %v1307_v45 }
 0x1dc   : > { %1326 = vst [vmem:[%s3353_s24 + $0x78] sm:$0xff] %v1308_v55 }
 0x1dd   : > { %1327 = vst [vmem:[%s3353_s24 + $0x80] sm:$0xff] %v1309_v26 }
 0x1de   : > { %1328 = vst [vmem:[%s3353_s24 + $0x88] sm:$0xff] %v1310_v52 }
 0x1df PF: > { %s12_s9 = sadd.s32 1, %s1454_s9  }
 0x1e0   : > { %p9_p4 = scmp.ge.s32.totalorder %s12_s9, 4  }
 0x1e2   :  { %11 = sbr.rel (!%p9_p4) target bundleno = 1 (0x1), region = 58 }

</bundles_post_ra>
